<compile_context>
chip_gen: v5e
topology: v5e:2x2
jax: 0.10.0
libtpu: 0.0.40
codegen_flags: <defaults>
</compile_context>

<pallas_src>
import numpy as np
import jax
import jax.numpy as jnp
from jax import lax
from jax.experimental import pallas as pl
from jax.experimental.pallas import tpu as pltpu


# ------------------------- host-side layout helpers -------------------------
def _oihw_to_k(w):
    """PyTorch OIHW conv weight -> (KH*KW*Cin, Cout), tap-major / cin-minor."""
    O, I, KH, KW = w.shape
    return jnp.transpose(w, (2, 3, 1, 0)).reshape(KH * KW * I, O)


def _pool_matrix(Hv, Wv, row_stride, n_rows):
    """(Hv//2*Wv//2, n_rows) constant: 2x2 average pooling + valid-row
    extraction over a flat feature map whose row index is i*row_stride + j."""
    Ho, Wo = Hv // 2, Wv // 2
    P = np.zeros((Ho * Wo, n_rows), np.float32)
    for io in range(Ho):
        for jo in range(Wo):
            for dh in range(2):
                for dw in range(2):
                    P[io * Wo + jo, (2 * io + dh) * row_stride + (2 * jo + dw)] = 0.25
    return jnp.asarray(P)


# ------------------------------ fused kernel --------------------------------
def _build_fused_kernel(H, W):
    """Derive static geometry for an (H, W) input and return the kernel body."""
    H1, W1 = H - 4, W - 4            # conv1 5x5 valid output (compact rows)
    Hp1, Wp1 = H1 // 2, W1 // 2      # pool1 output
    H2, W2 = Hp1 - 2, Wp1 - 2        # conv2 3x3 valid output (padded rows, width Wp1)
    L2 = (H2 - 1) * Wp1 + W2
    Hp2, Wp2 = H2 // 2, W2 // 2      # pool2 output
    H3, W3 = Hp2 - 2, Wp2 - 2        # conv3 3x3 valid output (padded rows, width Wp2)
    L3 = (H3 - 1) * Wp2 + W3

    def kernel(xcol_ref, w1_ref, p1_ref, w2_ref, p2_ref, w3_ref, wfc_ref, o_ref):
        f32 = jnp.float32
        # conv1: wrapper-built valid im2col -> one matmul, K = KH*KW*Cin.
        a1 = jnp.dot(xcol_ref[0], w1_ref[...], preferred_element_type=f32)   # (H1*W1, C1)
        # pool1: 2x2 average as a single selection matmul.
        h1 = jnp.dot(p1_ref[...], a1, preferred_element_type=f32)            # (Hp1*Wp1, C1)

        # conv2: fold all 9 taps into K via in-register im2col (shifted slices).
        lhs2 = jnp.concatenate(
            [h1[kh * Wp1 + kw: kh * Wp1 + kw + L2, :]
             for kh in range(3) for kw in range(3)], axis=1)                 # (L2, 9*C1)
        a2 = jnp.dot(lhs2, w2_ref[...], preferred_element_type=f32)          # (L2, C2)
        # pool2: averages AND extracts the valid rows of the padded conv2 map.
        h2 = jnp.dot(p2_ref[...], a2, preferred_element_type=f32)            # (Hp2*Wp2, C2)

        # conv3: same tap folding over the padded-row layout.
        lhs3 = jnp.concatenate(
            [h2[kh * Wp2 + kw: kh * Wp2 + kw + L3, :]
             for kh in range(3) for kw in range(3)], axis=1)                 # (L3, 9*C2)
        a3 = jnp.dot(lhs3, w3_ref[...], preferred_element_type=f32)          # (L3, C3)

        # flatten the H3*W3 valid rows into one lane-dense (1, H3*W3*C3) vector
        # in (h, w, c) order (the fc weight is pre-permuted to match).
        flat = jnp.concatenate(
            [a3[i * Wp2 + j: i * Wp2 + j + 1, :]
             for i in range(H3) for j in range(W3)], axis=1)
        o_ref[0] = jnp.dot(flat, wfc_ref[...], preferred_element_type=f32)   # (1, n_out)

    dims = dict(H1=H1, W1=W1, Hp1=Hp1, Wp1=Wp1, H2=H2, W2=W2, L2=L2,
                Hp2=Hp2, Wp2=Wp2, H3=H3, W3=W3, L3=L3)
    return kernel, dims


@jax.jit
def testnet1_forward(x_nchw, params):
    w1, w2, w3, wfc = params
    N, Cin, H, W = x_nchw.shape
    KH = w1.shape[2]                                   # 5
    kernel, d = _build_fused_kernel(H, W)
    H1, W1 = d["H1"], d["W1"]

    # Layout glue (zero FLOPs): NCHW -> NHWC, then full valid im2col for conv1.
    x_nhwc = jnp.transpose(x_nchw, (0, 2, 3, 1))
    xcol = jnp.concatenate(
        [x_nhwc[:, kh:kh + H1, kw:kw + W1, :]
         for kh in range(KH) for kw in range(KH)],
        axis=-1).reshape(N, H1 * W1, KH * KH * Cin)

    # Weight re-layouts (tap-major / cin-minor to match the im2col columns).
    w1k, w2k, w3k = _oihw_to_k(w1), _oihw_to_k(w2), _oihw_to_k(w3)
    C3, H3, W3 = w3.shape[0], d["H3"], d["W3"]
    n_out = wfc.shape[0]
    # fc weight: PyTorch flattens (c, h, w); the kernel's flat vector is (h, w, c).
    wfc_k = jnp.transpose(wfc.reshape(n_out, C3, H3, W3),
                          (0, 2, 3, 1)).reshape(n_out, -1).T                 # (H3*W3*C3, n_out)

    p1 = _pool_matrix(d["H1"], d["W1"], d["W1"], d["H1"] * d["W1"])
    p2 = _pool_matrix(d["H2"], d["W2"], d["Wp1"], d["L2"])

    out = pl.pallas_call(
        kernel,
        out_shape=jax.ShapeDtypeStruct((N, 1, n_out), jnp.float32),
        grid_spec=pltpu.PrefetchScalarGridSpec(
            num_scalar_prefetch=0,
            grid=(N,),
            in_specs=[
                pl.BlockSpec((1,) + xcol.shape[1:], lambda n: (n, 0, 0)),
                pl.BlockSpec(w1k.shape, lambda n: (0, 0)),
                pl.BlockSpec(p1.shape, lambda n: (0, 0)),
                pl.BlockSpec(w2k.shape, lambda n: (0, 0)),
                pl.BlockSpec(p2.shape, lambda n: (0, 0)),
                pl.BlockSpec(w3k.shape, lambda n: (0, 0)),
                pl.BlockSpec(wfc_k.shape, lambda n: (0, 0)),
            ],
            out_specs=pl.BlockSpec((1, 1, n_out), lambda n: (n, 0, 0)),
        ),
        compiler_params=pltpu.CompilerParams(
            dimension_semantics=("parallel",)),
    )(xcol, w1k, p1, w2k, p2, w3k, wfc_k)
    return out.reshape(N, n_out)


# ------------------------------ parameters ----------------------------------
def init_params(key, scale=1):
    c1, c2, c3 = int(16 * scale), int(32 * scale), int(32 * scale)
    k1, k2, k3, k4 = jax.random.split(key, 4)
    w1 = jax.random.normal(k1, (c1, 3, 5, 5), jnp.float32) / np.sqrt(3 * 25)
    w2 = jax.random.normal(k2, (c2, c1, 3, 3), jnp.float32) / np.sqrt(c1 * 9)
    w3 = jax.random.normal(k3, (c3, c2, 3, 3), jnp.float32) / np.sqrt(c2 * 9)
    wfc = jax.random.normal(k4, (10, c3 * 4 * 4), jnp.float32) / np.sqrt(c3 * 16)
    return w1, w2, w3, wfc


# --------------------------- pure-JAX reference ------------------------------
def reference_forward(x, params):
    w1, w2, w3, wfc = params
    dn = ('NCHW', 'OIHW', 'NCHW')
    hp = lax.Precision.HIGHEST

    def conv(y, w):
        return lax.conv_general_dilated(y, w, (1, 1), 'VALID',
                                        dimension_numbers=dn, precision=hp)

    def pool(y):
        n, c, h, w = y.shape
        return y.reshape(n, c, h // 2, 2, w // 2, 2).mean(axis=(3, 5))

    y = pool(conv(x, w1))
    y = pool(conv(y, w2))
    y = conv(y, w3)
    y = y.reshape(y.shape[0], -1)             # PyTorch NCHW flatten order
    return jnp.dot(y, wfc.T, precision=hp)


if __name__ == "__main__":
    key = jax.random.PRNGKey(0)
    kx, kp = jax.random.split(key)
    # CIFAR10 geometry (3x32x32) is fixed by the fc shape (32*4*4); batch = 2.
    x = jax.random.normal(kx, (2, 3, 32, 32), jnp.float32)
    params = init_params(kp, scale=1)

    out = jax.block_until_ready(testnet1_forward(x, params))
    ref = jax.block_until_ready(reference_forward(x, params))

    assert out.shape == (2, 10), out.shape
    err = float(np.max(np.abs(np.asarray(out) - np.asarray(ref))))
    if not np.allclose(np.asarray(out), np.asarray(ref), atol=1e-2, rtol=1e-2):
        raise AssertionError(f"mismatch vs reference, max abs err {err}")
    print("KERNEL_OK")
</pallas_src>

<mosaic_0001>
module attributes {stable_mosaic.version = 11 : i64} {
  func.func @kernel(%arg0: i32, %arg1: memref<1x784x75xf32, #tpu.memory_space<vmem>>, %arg2: memref<75x16xf32, #tpu.memory_space<vmem>>, %arg3: memref<196x784xf32, #tpu.memory_space<vmem>>, %arg4: memref<144x32xf32, #tpu.memory_space<vmem>>, %arg5: memref<36x166xf32, #tpu.memory_space<vmem>>, %arg6: memref<288x32xf32, #tpu.memory_space<vmem>>, %arg7: memref<512x10xf32, #tpu.memory_space<vmem>>, %arg8: memref<1x1x10xf32, #tpu.memory_space<vmem>>) attributes {dimension_semantics = [#tpu.dimension_semantics<parallel>], iteration_bounds = array<i64: 2>, scalar_prefetch = 0 : i64, scratch_operands = 0 : i64, tpu.core_type = #tpu.core_type<tc>, window_params = [{transform_indices = @transform_0, window_bounds = array<i64: 1, 784, 75>}, {pipeline_mode = #tpu.pipeline_mode<synchronous>, transform_indices = @transform_1, window_bounds = array<i64: 75, 16>}, {pipeline_mode = #tpu.pipeline_mode<synchronous>, transform_indices = @transform_2, window_bounds = array<i64: 196, 784>}, {pipeline_mode = #tpu.pipeline_mode<synchronous>, transform_indices = @transform_3, window_bounds = array<i64: 144, 32>}, {pipeline_mode = #tpu.pipeline_mode<synchronous>, transform_indices = @transform_4, window_bounds = array<i64: 36, 166>}, {pipeline_mode = #tpu.pipeline_mode<synchronous>, transform_indices = @transform_5, window_bounds = array<i64: 288, 32>}, {pipeline_mode = #tpu.pipeline_mode<synchronous>, transform_indices = @transform_6, window_bounds = array<i64: 512, 10>}, {transform_indices = @transform_7, window_bounds = array<i64: 1, 1, 10>}]} {
    %c0 = arith.constant 0 : index
    %c0_0 = arith.constant 0 : index
    %c0_1 = arith.constant 0 : index
    %0 = vector.load %arg1[%c0, %c0_0, %c0_1] : memref<1x784x75xf32, #tpu.memory_space<vmem>>, vector<1x784x75xf32>
    %1 = vector.shape_cast %0 : vector<1x784x75xf32> to vector<784x75xf32>
    %c0_2 = arith.constant 0 : index
    %c0_3 = arith.constant 0 : index
    %2 = vector.load %arg2[%c0_2, %c0_3] : memref<75x16xf32, #tpu.memory_space<vmem>>, vector<75x16xf32>
    %cst = arith.constant dense<0.000000e+00> : vector<784x16xf32>
    %3 = tpu.matmul %1, %2, %cst {dimension_numbers = #tpu.dot_dimension_numbers<[1], [0], [0], [1], [0, 0, 1, 1], [], []>} : vector<784x75xf32>, vector<75x16xf32>, vector<784x16xf32> -> vector<784x16xf32>
    %c0_4 = arith.constant 0 : index
    %c0_5 = arith.constant 0 : index
    %4 = vector.load %arg3[%c0_4, %c0_5] : memref<196x784xf32, #tpu.memory_space<vmem>>, vector<196x784xf32>
    %cst_6 = arith.constant dense<0.000000e+00> : vector<196x16xf32>
    %5 = tpu.matmul %4, %3, %cst_6 {dimension_numbers = #tpu.dot_dimension_numbers<[1], [0], [0], [1], [0, 0, 1, 1], [], []>} : vector<196x784xf32>, vector<784x16xf32>, vector<196x16xf32> -> vector<196x16xf32>
    %6 = vector.extract_strided_slice %5 {offsets = [0, 0], sizes = [166, 16], strides = [1, 1]} : vector<196x16xf32> to vector<166x16xf32>
    %7 = vector.extract_strided_slice %5 {offsets = [1, 0], sizes = [166, 16], strides = [1, 1]} : vector<196x16xf32> to vector<166x16xf32>
    %8 = vector.extract_strided_slice %5 {offsets = [2, 0], sizes = [166, 16], strides = [1, 1]} : vector<196x16xf32> to vector<166x16xf32>
    %9 = vector.extract_strided_slice %5 {offsets = [14, 0], sizes = [166, 16], strides = [1, 1]} : vector<196x16xf32> to vector<166x16xf32>
    %10 = vector.extract_strided_slice %5 {offsets = [15, 0], sizes = [166, 16], strides = [1, 1]} : vector<196x16xf32> to vector<166x16xf32>
    %11 = vector.extract_strided_slice %5 {offsets = [16, 0], sizes = [166, 16], strides = [1, 1]} : vector<196x16xf32> to vector<166x16xf32>
    %12 = vector.extract_strided_slice %5 {offsets = [28, 0], sizes = [166, 16], strides = [1, 1]} : vector<196x16xf32> to vector<166x16xf32>
    %13 = vector.extract_strided_slice %5 {offsets = [29, 0], sizes = [166, 16], strides = [1, 1]} : vector<196x16xf32> to vector<166x16xf32>
    %14 = vector.extract_strided_slice %5 {offsets = [30, 0], sizes = [166, 16], strides = [1, 1]} : vector<196x16xf32> to vector<166x16xf32>
    %15 = tpu.concatenate %6, %7, %8, %9, %10, %11, %12, %13, %14 in 1 : vector<166x16xf32>, vector<166x16xf32>, vector<166x16xf32>, vector<166x16xf32>, vector<166x16xf32>, vector<166x16xf32>, vector<166x16xf32>, vector<166x16xf32>, vector<166x16xf32> -> vector<166x144xf32>
    %c0_7 = arith.constant 0 : index
    %c0_8 = arith.constant 0 : index
    %16 = vector.load %arg4[%c0_7, %c0_8] : memref<144x32xf32, #tpu.memory_space<vmem>>, vector<144x32xf32>
    %cst_9 = arith.constant dense<0.000000e+00> : vector<166x32xf32>
    %17 = tpu.matmul %15, %16, %cst_9 {dimension_numbers = #tpu.dot_dimension_numbers<[1], [0], [0], [1], [0, 0, 1, 1], [], []>} : vector<166x144xf32>, vector<144x32xf32>, vector<166x32xf32> -> vector<166x32xf32>
    %c0_10 = arith.constant 0 : index
    %c0_11 = arith.constant 0 : index
    %18 = vector.load %arg5[%c0_10, %c0_11] : memref<36x166xf32, #tpu.memory_space<vmem>>, vector<36x166xf32>
    %cst_12 = arith.constant dense<0.000000e+00> : vector<36x32xf32>
    %19 = tpu.matmul %18, %17, %cst_12 {dimension_numbers = #tpu.dot_dimension_numbers<[1], [0], [0], [1], [0, 0, 1, 1], [], []>} : vector<36x166xf32>, vector<166x32xf32>, vector<36x32xf32> -> vector<36x32xf32>
    %20 = vector.extract_strided_slice %19 {offsets = [0, 0], sizes = [22, 32], strides = [1, 1]} : vector<36x32xf32> to vector<22x32xf32>
    %21 = vector.extract_strided_slice %19 {offsets = [1, 0], sizes = [22, 32], strides = [1, 1]} : vector<36x32xf32> to vector<22x32xf32>
    %22 = vector.extract_strided_slice %19 {offsets = [2, 0], sizes = [22, 32], strides = [1, 1]} : vector<36x32xf32> to vector<22x32xf32>
    %23 = vector.extract_strided_slice %19 {offsets = [6, 0], sizes = [22, 32], strides = [1, 1]} : vector<36x32xf32> to vector<22x32xf32>
    %24 = vector.extract_strided_slice %19 {offsets = [7, 0], sizes = [22, 32], strides = [1, 1]} : vector<36x32xf32> to vector<22x32xf32>
    %25 = vector.extract_strided_slice %19 {offsets = [8, 0], sizes = [22, 32], strides = [1, 1]} : vector<36x32xf32> to vector<22x32xf32>
    %26 = vector.extract_strided_slice %19 {offsets = [12, 0], sizes = [22, 32], strides = [1, 1]} : vector<36x32xf32> to vector<22x32xf32>
    %27 = vector.extract_strided_slice %19 {offsets = [13, 0], sizes = [22, 32], strides = [1, 1]} : vector<36x32xf32> to vector<22x32xf32>
    %28 = vector.extract_strided_slice %19 {offsets = [14, 0], sizes = [22, 32], strides = [1, 1]} : vector<36x32xf32> to vector<22x32xf32>
    %29 = tpu.concatenate %20, %21, %22, %23, %24, %25, %26, %27, %28 in 1 : vector<22x32xf32>, vector<22x32xf32>, vector<22x32xf32>, vector<22x32xf32>, vector<22x32xf32>, vector<22x32xf32>, vector<22x32xf32>, vector<22x32xf32>, vector<22x32xf32> -> vector<22x288xf32>
    %c0_13 = arith.constant 0 : index
    %c0_14 = arith.constant 0 : index
    %30 = vector.load %arg6[%c0_13, %c0_14] : memref<288x32xf32, #tpu.memory_space<vmem>>, vector<288x32xf32>
    %cst_15 = arith.constant dense<0.000000e+00> : vector<22x32xf32>
    %31 = tpu.matmul %29, %30, %cst_15 {dimension_numbers = #tpu.dot_dimension_numbers<[1], [0], [0], [1], [0, 0, 1, 1], [], []>} : vector<22x288xf32>, vector<288x32xf32>, vector<22x32xf32> -> vector<22x32xf32>
    %32 = vector.extract_strided_slice %31 {offsets = [0, 0], sizes = [1, 32], strides = [1, 1]} : vector<22x32xf32> to vector<1x32xf32>
    %33 = vector.extract_strided_slice %31 {offsets = [1, 0], sizes = [1, 32], strides = [1, 1]} : vector<22x32xf32> to vector<1x32xf32>
    %34 = vector.extract_strided_slice %31 {offsets = [2, 0], sizes = [1, 32], strides = [1, 1]} : vector<22x32xf32> to vector<1x32xf32>
    %35 = vector.extract_strided_slice %31 {offsets = [3, 0], sizes = [1, 32], strides = [1, 1]} : vector<22x32xf32> to vector<1x32xf32>
    %36 = vector.extract_strided_slice %31 {offsets = [6, 0], sizes = [1, 32], strides = [1, 1]} : vector<22x32xf32> to vector<1x32xf32>
    %37 = vector.extract_strided_slice %31 {offsets = [7, 0], sizes = [1, 32], strides = [1, 1]} : vector<22x32xf32> to vector<1x32xf32>
    %38 = vector.extract_strided_slice %31 {offsets = [8, 0], sizes = [1, 32], strides = [1, 1]} : vector<22x32xf32> to vector<1x32xf32>
    %39 = vector.extract_strided_slice %31 {offsets = [9, 0], sizes = [1, 32], strides = [1, 1]} : vector<22x32xf32> to vector<1x32xf32>
    %40 = vector.extract_strided_slice %31 {offsets = [12, 0], sizes = [1, 32], strides = [1, 1]} : vector<22x32xf32> to vector<1x32xf32>
    %41 = vector.extract_strided_slice %31 {offsets = [13, 0], sizes = [1, 32], strides = [1, 1]} : vector<22x32xf32> to vector<1x32xf32>
    %42 = vector.extract_strided_slice %31 {offsets = [14, 0], sizes = [1, 32], strides = [1, 1]} : vector<22x32xf32> to vector<1x32xf32>
    %43 = vector.extract_strided_slice %31 {offsets = [15, 0], sizes = [1, 32], strides = [1, 1]} : vector<22x32xf32> to vector<1x32xf32>
    %44 = vector.extract_strided_slice %31 {offsets = [18, 0], sizes = [1, 32], strides = [1, 1]} : vector<22x32xf32> to vector<1x32xf32>
    %45 = vector.extract_strided_slice %31 {offsets = [19, 0], sizes = [1, 32], strides = [1, 1]} : vector<22x32xf32> to vector<1x32xf32>
    %46 = vector.extract_strided_slice %31 {offsets = [20, 0], sizes = [1, 32], strides = [1, 1]} : vector<22x32xf32> to vector<1x32xf32>
    %47 = vector.extract_strided_slice %31 {offsets = [21, 0], sizes = [1, 32], strides = [1, 1]} : vector<22x32xf32> to vector<1x32xf32>
    %48 = tpu.concatenate %32, %33, %34, %35, %36, %37, %38, %39, %40, %41, %42, %43, %44, %45, %46, %47 in 1 : vector<1x32xf32>, vector<1x32xf32>, vector<1x32xf32>, vector<1x32xf32>, vector<1x32xf32>, vector<1x32xf32>, vector<1x32xf32>, vector<1x32xf32>, vector<1x32xf32>, vector<1x32xf32>, vector<1x32xf32>, vector<1x32xf32>, vector<1x32xf32>, vector<1x32xf32>, vector<1x32xf32>, vector<1x32xf32> -> vector<1x512xf32>
    %c0_16 = arith.constant 0 : index
    %c0_17 = arith.constant 0 : index
    %49 = vector.load %arg7[%c0_16, %c0_17] : memref<512x10xf32, #tpu.memory_space<vmem>>, vector<512x10xf32>
    %cst_18 = arith.constant dense<0.000000e+00> : vector<1x10xf32>
    %50 = tpu.matmul %48, %49, %cst_18 {dimension_numbers = #tpu.dot_dimension_numbers<[1], [0], [0], [1], [0, 0, 1, 1], [], []>} : vector<1x512xf32>, vector<512x10xf32>, vector<1x10xf32> -> vector<1x10xf32>
    %c0_19 = arith.constant 0 : index
    %c0_20 = arith.constant 0 : index
    %c0_21 = arith.constant 0 : index
    %51 = vector.load %arg8[%c0_19, %c0_20, %c0_21] : memref<1x1x10xf32, #tpu.memory_space<vmem>>, vector<1x1x10xf32>
    %52 = vector.shape_cast %51 : vector<1x1x10xf32> to vector<1x10xf32>
    %53 = vector.shape_cast %50 : vector<1x10xf32> to vector<1x1x10xf32>
    tpu.vector_store %arg8[%c0_19, %c0_20, %c0_21], %53 {strides = array<i32>} : memref<1x1x10xf32, #tpu.memory_space<vmem>>, vector<1x1x10xf32>,
    return
  }
  func.func @transform_0(%arg0: i32) -> (i32, i32, i32) {
    %c0_i32 = arith.constant 0 : i32
    %c0_i32_0 = arith.constant 0 : i32
    %c0_i32_1 = arith.constant 0 : i32
    return %arg0, %c0_i32, %c0_i32_0 : i32, i32, i32
  }
  func.func @transform_1(%arg0: i32) -> (i32, i32) {
    %c0_i32 = arith.constant 0 : i32
    %c0_i32_0 = arith.constant 0 : i32
    %c0_i32_1 = arith.constant 0 : i32
    return %c0_i32, %c0_i32_0 : i32, i32
  }
  func.func @transform_2(%arg0: i32) -> (i32, i32) {
    %c0_i32 = arith.constant 0 : i32
    %c0_i32_0 = arith.constant 0 : i32
    %c0_i32_1 = arith.constant 0 : i32
    return %c0_i32, %c0_i32_0 : i32, i32
  }
  func.func @transform_3(%arg0: i32) -> (i32, i32) {
    %c0_i32 = arith.constant 0 : i32
    %c0_i32_0 = arith.constant 0 : i32
    %c0_i32_1 = arith.constant 0 : i32
    return %c0_i32, %c0_i32_0 : i32, i32
  }
  func.func @transform_4(%arg0: i32) -> (i32, i32) {
    %c0_i32 = arith.constant 0 : i32
    %c0_i32_0 = arith.constant 0 : i32
    %c0_i32_1 = arith.constant 0 : i32
    return %c0_i32, %c0_i32_0 : i32, i32
  }
  func.func @transform_5(%arg0: i32) -> (i32, i32) {
    %c0_i32 = arith.constant 0 : i32
    %c0_i32_0 = arith.constant 0 : i32
    %c0_i32_1 = arith.constant 0 : i32
    return %c0_i32, %c0_i32_0 : i32, i32
  }
  func.func @transform_6(%arg0: i32) -> (i32, i32) {
    %c0_i32 = arith.constant 0 : i32
    %c0_i32_0 = arith.constant 0 : i32
    %c0_i32_1 = arith.constant 0 : i32
    return %c0_i32, %c0_i32_0 : i32, i32
  }
  func.func @transform_7(%arg0: i32) -> (i32, i32, i32) {
    %c0_i32 = arith.constant 0 : i32
    %c0_i32_0 = arith.constant 0 : i32
    %c0_i32_1 = arith.constant 0 : i32
    return %arg0, %c0_i32, %c0_i32_0 : i32, i32, i32
  }
}

</mosaic_0001>

<bundles_post_ra>
// kernel: testnet1_forward.1
= control target key start
LH: loop header
LB: loop body
LE: loop exit
PB: predicated region body
PF: predicated region fallthrough
CT: control target
= control target key end

     0   :  { %12 = vsyncpa [#allocation3], 0  ;;  %s7269_s0 = inlined_call_operand.vmem [shape: f32[2,784,75], index: 0, kind: input, shape index: {}]   ;;  %s7270_s1 = inlined_call_operand.vmem [shape: f32[75,16], index: 1, kind: input, shape index: {}]   ;;  %s7271_s2 = inlined_call_operand.vmem [shape: f32[196,784], index: 2, kind: input, shape index: {}]   ;;  %s7272_s3 = inlined_call_operand.vmem [shape: f32[144,32], index: 3, kind: input, shape index: {}]   ;;  %s7273_s4 = inlined_call_operand.vmem [shape: f32[36,166], index: 4, kind: input, shape index: {}]   ;;  %s7274_s5 = inlined_call_operand.vmem [shape: f32[288,32], index: 5, kind: input, shape index: {}]   ;;  %s7275_s6 = inlined_call_operand.vmem [shape: f32[512,10], index: 6, kind: input, shape index: {}]   ;;  %s7276_s7 = inlined_call_operand.hbm [shape: f32[2,1,10], index: 7, kind: output, shape index: {}]  }
   0x1   :  { %14 = vsyncpa [#allocation3 + $0x1], 0  ;;  %s4345_s24 = smov 0   ;;  %s4347_s25 = smov 0  }
   0x2   :  { %s4349_s26 = smov 0   ;;  %s4351_s27 = smov 0  }
   0x3 LB: > { %s4366_s28 = sadd.s32 4294967295, %s4296_s27   ;;  %s3606_s29 = sadd.s32 4294967294, %s4296_s27   ;;  %s4296_s27 = sphi %s4351_s27, %s7400_s27   ;;  %s4292_s26 = sphi %s4349_s26, %s7399_s26   ;;  %s4288_s25 = sphi %s4347_s25, %s7398_s25   ;;  %s4284_s24 = sphi %s4345_s24, %s7397_s24  }
   0x4   : > { %s4370_s30 = sadd.s32 1, %s4296_s27   ;;  %s179_s8 = sadd.s32 1, %s4292_s26 }
   0x5   : > { %s176_s9 = ssub.s32 %s4296_s27, %s4370_s30  ;;  %p189_p0 = scmp.ne.s32.totalorder %s4292_s26, %s4288_s25 }
   0x6   : > { %p177_p1 = scmp.eq.s32.totalorder %s176_s9, 0  ;;  %p190_p2 = scmp.eq.s32.totalorder %s4366_s28, 1 }
   0x7   : > { %p195_p3 = scmp.ne.s32.totalorder %s4288_s25, %s4284_s24  ;;  %p196_p4 = scmp.eq.s32.totalorder %s3606_s29, 1 }
   0x8   : > { %s4381_s10 = scalar_select %p177_p1, %s4292_s26, %s179_s8  }
   0x9   : > { %p4383_p5 = por %p190_p2, %p189_p0  ;;  %p4387_p6 = por %p196_p4, %p195_p3 }
   0xa   : > { %p3609_p7 = scmp.ge.s32.totalorder %s4296_s27, 1  ;;  %p240_p8 = scmp.lt.s32.totalorder %s4296_s27, 3 }
   0xc   : > { %p241_p9 = pnand %p3609_p7, %p240_p8 }
   0xe   : > { %244 = sbr.rel (%p241_p9) target bundleno = 2205 (0x89d), region = 48 }
  0x13   : > { %v383_v0 = vld [vmem:[%s7270_s1 + $0x48] sm:$0x7]  ;;  %vm679_vm0 = vcmask 1042432   ;;  %v382_v1 = vld [vmem:[%s7270_s1 + $0x40] sm:$0xff]  ;;  %v381_v2 = vld [vmem:[%s7270_s1 + $0x38] sm:$0xff]  ;;  %p271_p10 = scmp.lt.s32.totalorder %s4366_s28, 1 }
  0x14   : > { %3611 = vmatpush.msk.msra.mxu0 %vm679_vm0, %v383_v0  ;;  %3767 = vmatpush.msk.msra.mxu2 %vm679_vm0, %v383_v0  ;;  %v380_v3 = vld [vmem:[%s7270_s1 + $0x30] sm:$0xff]  ;;  %v379_v4 = vld [vmem:[%s7270_s1 + $0x28] sm:$0xff]  ;;  %v378_v5 = vld [vmem:[%s7270_s1 + $0x20] sm:$0xff]  ;;  %vm384_vm1 = vcmask 613376   ;;  %vm1169_vm2 = vcmask 130048   ;;  %vm1910_vm3 = vcmask 1046528  }
  0x15   : > { %3768 = vmatpush.msk.msra.mxu3 %vm679_vm0, %v383_v0  ;;  %s272_s23 = scalar_select %p271_p10, %s4366_s28, 1  ;;  %v377_v6 = vld [vmem:[%s7270_s1 + $0x18] sm:$0xff]  ;;  %v376_v7 = vld [vmem:[%s7270_s1 + $0x10] sm:$0xff]  ;;  %v375_v8 = vld [vmem:[%s7270_s1 + $0x8] sm:$0xff]  ;;  %vm2122_vm4 = vcmask 1041408   ;;  %vm2015_vm5 = vcmask 1045504  }
  0x16   : > { %690 = vmatpush.msra.mxu0 %v382_v1  ;;  %3769 = vmatpush.msra.mxu2 %v382_v1  ;;  %v374_v9 = vld [vmem:[%s7270_s1] sm:$0xff]  ;;  %s4298_s8 = smov 16   ;;  %s4300_s17 = smov 48   ;;  %vm2229_vm6 = vcmask 1040384   ;;  %vm2401_vm7 = vcmask 1043456   ;;  %vm2639_vm8 = vcmask 261120  }
  0x17   : > { %3770 = vmatpush.msra.mxu3 %v382_v1  ;;  %s3787_s14 = smul.u32 784, %s272_s23  ;;  %s4301_s18 = smov 32   ;;  %vm2661_vm9 = vcmask 392192   ;;  %vm2683_vm10 = vcmask 523264   ;;  %vm2705_vm11 = vcmask 654336   ;;  %vm2727_vm12 = vcmask 785408  }
  0x18   : > { %691 = vmatpush.msra.mxu0 %v381_v2  ;;  %3771 = vmatpush.msra.mxu2 %v381_v2  ;;  %s4302_s20 = smov 64   ;;  %s4303_s13 = smov 112   ;;  %vm2749_vm13 = vcmask 916480   ;;  %vm3001_vm14 = vcmask 310272   ;;  %vm3536_vm15 = vcmask 73728  }
  0x19   : > { %3772 = vmatpush.msra.mxu3 %v381_v2  ;;  %s4428_s21 = scalar_lea.vmem %s7269_s0, %s3787_s14  ;;  %s4299_s14 = smov 80  }
  0x1a   : > { %692 = vmatpush.msra.mxu0 %v380_v3  ;;  %3773 = vmatpush.msra.mxu2 %v380_v3  ;;  %v276_v10 = vld [vmem:[%s4428_s21] sm:$0xff]  ;;  %v277_v11 = vld [vmem:[%s4428_s21 + $0x8] sm:$0xff]  ;;  %v278_v12 = vld [vmem:[%s4428_s21 + $0x10] sm:$0xff]  ;;  %s4304_s15 = smov 96   ;;  %s269_s9 = sand.u32 1, %s4288_s25  }
  0x1b   : > { %3774 = vmatpush.msra.mxu3 %v380_v3  ;;  %v279_v13 = vld [vmem:[%s4428_s21 + $0x18] sm:$0xff]  ;;  %v280_v14 = vld [vmem:[%s4428_s21 + $0x20] sm:$0xff]  ;;  %v281_v15 = vld [vmem:[%s4428_s21 + $0x28] sm:$0xff]  ;;  %s4254_s22 = scalar_lea.hbm %s7276_s7, 2 }
  0x1c   : > { %693 = vmatpush.msra.mxu0 %v379_v4  ;;  %3775 = vmatpush.msra.mxu2 %v379_v4  ;;  %v282_v16 = vld [vmem:[%s4428_s21 + $0x30] sm:$0xff]  ;;  %v283_v17 = vld [vmem:[%s4428_s21 + $0x38] sm:$0xff]  ;;  %v284_v18 = vld [vmem:[%s4428_s21 + $0x40] sm:$0xff] }
  0x1d   : > { %3776 = vmatpush.msra.mxu3 %v379_v4  ;;  %v285_v19 = vld [vmem:[%s4428_s21 + $0x48] sm:$0xff]  ;;  %v286_v20 = vld [vmem:[%s4428_s21 + $0x50] sm:$0xff]  ;;  %v287_v21 = vld [vmem:[%s4428_s21 + $0x58] sm:$0xff] }
  0x1e   : > { %694 = vmatpush.msra.mxu0 %v378_v5  ;;  %3777 = vmatpush.msra.mxu2 %v378_v5  ;;  %v288_v22 = vld [vmem:[%s4428_s21 + $0x60] sm:$0xff]  ;;  %v289_v23 = vld [vmem:[%s4428_s21 + $0x68] sm:$0xff]  ;;  %v290_v24 = vld [vmem:[%s4428_s21 + $0x70] sm:$0xff] }
  0x1f   : > { %3778 = vmatpush.msra.mxu3 %v378_v5  ;;  %v291_v25 = vld [vmem:[%s4428_s21 + $0x78] sm:$0xff]  ;;  %v292_v27 = vld [vmem:[%s4428_s21 + $0x80] sm:$0xff]  ;;  %v293_v29 = vld [vmem:[%s4428_s21 + $0x88] sm:$0xff] }
  0x20   : > { %695 = vmatpush.msra.mxu0 %v377_v6  ;;  %3779 = vmatpush.msra.mxu2 %v377_v6  ;;  %v294_v31 = vld [vmem:[%s4428_s21 + $0x90] sm:$0xff]  ;;  %v295_v33 = vld [vmem:[%s4428_s21 + $0x98] sm:$0xff]  ;;  %v296_v35 = vld [vmem:[%s4428_s21 + $0xa0] sm:$0xff] }
  0x21   : > { %3780 = vmatpush.msra.mxu3 %v377_v6  ;;  %v297_v37 = vld [vmem:[%s4428_s21 + $0xa8] sm:$0xff]  ;;  %v298_v39 = vld [vmem:[%s4428_s21 + $0xb0] sm:$0xff]  ;;  %v299_v41 = vld [vmem:[%s4428_s21 + $0xb8] sm:$0xff] }
  0x22   : > { %696 = vmatpush.msra.mxu0 %v376_v7  ;;  %3781 = vmatpush.msra.mxu2 %v376_v7  ;;  %v300_v43 = vld [vmem:[%s4428_s21 + $0xc0] sm:$0xff]  ;;  %v301_v45 = vld [vmem:[%s4428_s21 + $0xc8] sm:$0xff]  ;;  %v302_v47 = vld [vmem:[%s4428_s21 + $0xd0] sm:$0xff] }
  0x23   : > { %3782 = vmatpush.msra.mxu3 %v376_v7  ;;  %v303_v49 = vld [vmem:[%s4428_s21 + $0xd8] sm:$0xff]  ;;  %v304_v51 = vld [vmem:[%s4428_s21 + $0xe0] sm:$0xff]  ;;  %v305_v53 = vld [vmem:[%s4428_s21 + $0xe8] sm:$0xff] }
  0x24   : > { %697 = vmatpush.msra.mxu0 %v375_v8  ;;  %3783 = vmatpush.msra.mxu2 %v375_v8  ;;  %v306_v55 = vld [vmem:[%s4428_s21 + $0xf0] sm:$0xff]  ;;  %v307_v57 = vld [vmem:[%s4428_s21 + $0xf8] sm:$0xff]  ;;  %v308_v59 = vld [vmem:[%s4428_s21 + $0x100] sm:$0xff] }
  0x25   : > { %3784 = vmatpush.msra.mxu3 %v375_v8  ;;  %v309_v61 = vld [vmem:[%s4428_s21 + $0x108] sm:$0xff]  ;;  %v310_v63 = vld [vmem:[%s4428_s21 + $0x110] sm:$0xff]  ;;  %v311_v1 = vld [vmem:[%s4428_s21 + $0x118] sm:$0xff] }
  0x26   : > { %698 = vmatpush.msra.mxu0 %v374_v9  ;;  %3785 = vmatpush.msra.mxu2 %v374_v9  ;;  %v312_v3 = vld [vmem:[%s4428_s21 + $0x120] sm:$0xff]  ;;  %v313_v5 = vld [vmem:[%s4428_s21 + $0x128] sm:$0xff]  ;;  %v314_v7 = vld [vmem:[%s4428_s21 + $0x130] sm:$0xff] }
  0x27   : > { %3612 = vmatmul.msk.f32.vlgmr.msra.gmra.mxu0 %vm384_vm1, %v276_v10  ;;  %3786 = vmatpush.msra.mxu3 %v374_v9  ;;  %v315_v9 = vld [vmem:[%s4428_s21 + $0x138] sm:$0xff] }
  0x2f   : > { %3613 = vmatmul.msk.f32.gmra.mxu0 %vm384_vm1, %v277_v11  ;;  %v316_v11 = vld [vmem:[%s4428_s21 + $0x140] sm:$0xff] }
  0x37   : > { %3614 = vmatmul.msk.f32.gmra.mxu0 %vm384_vm1, %v278_v12 }
  0x3f   : > { %3615 = vmatmul.msk.f32.gmra.mxu0 %vm384_vm1, %v279_v13  ;;  %v317_v13 = vld [vmem:[%s4428_s21 + $0x148] sm:$0xff] }
  0x47   : > { %3616 = vmatmul.msk.f32.gmra.mxu0 %vm384_vm1, %v280_v14 }
  0x4f   : > { %3617 = vmatmul.msk.f32.gmra.mxu0 %vm384_vm1, %v281_v15  ;;  %v318_v15 = vld [vmem:[%s4428_s21 + $0x150] sm:$0xff] }
  0x57   : > { %3618 = vmatmul.msk.f32.gmra.mxu0 %vm384_vm1, %v282_v16 }
  0x5f   : > { %3619 = vmatmul.msk.f32.gmra.mxu0 %vm384_vm1, %v283_v17  ;;  %v319_v17 = vld [vmem:[%s4428_s21 + $0x158] sm:$0xff] }
  0x67   : > { %3620 = vmatmul.msk.f32.gmra.mxu0 %vm384_vm1, %v284_v18 }
  0x6f   : > { %3621 = vmatmul.msk.f32.gmra.mxu0 %vm384_vm1, %v285_v19  ;;  %v320_v19 = vld [vmem:[%s4428_s21 + $0x160] sm:$0xff] }
  0x77   : > { %3622 = vmatmul.msk.f32.gmra.mxu0 %vm384_vm1, %v286_v20 }
  0x7f   : > { %3623 = vmatmul.msk.f32.gmra.mxu0 %vm384_vm1, %v287_v21  ;;  %v321_v21 = vld [vmem:[%s4428_s21 + $0x168] sm:$0xff] }
  0x87   : > { %3624 = vmatmul.msk.f32.gmra.mxu0 %vm384_vm1, %v288_v22 }
  0x8f   : > { %3625 = vmatmul.msk.f32.gmra.mxu0 %vm384_vm1, %v289_v23  ;;  %v322_v23 = vld [vmem:[%s4428_s21 + $0x170] sm:$0xff] }
  0x97   : > { %3626 = vmatmul.msk.f32.gmra.mxu0 %vm384_vm1, %v290_v24 }
  0x9f   : > { %3627 = vmatmul.msk.f32.gmra.mxu0 %vm384_vm1, %v291_v25  ;;  %v323_v25 = vld [vmem:[%s4428_s21 + $0x178] sm:$0xff] }
  0xa4   : > { %v4465_v26 = vpop.f32.mrf.mxu0 }
  0xa7   : > { %3628 = vmatmul.msk.f32.gmra.mxu0 %vm384_vm1, %v292_v27 }
  0xac   : > { %v4469_v28 = vpop.f32.mrf.mxu0 }
  0xaf   : > { %3629 = vmatmul.msk.f32.gmra.mxu0 %vm384_vm1, %v293_v29  ;;  %v364_v29 = vld [vmem:[%s4428_s21 + $0x2c0] sm:$0xff] }
  0xb4   : > { %v4473_v30 = vpop.f32.mrf.mxu0 }
  0xb7   : > { %3630 = vmatmul.msk.f32.gmra.mxu0 %vm384_vm1, %v294_v31  ;;  %v325_v31 = vld [vmem:[%s4428_s21 + $0x188] sm:$0xff] }
  0xbc   : > { %v709_v32 = vpop.f32.mrf.mxu0 }
  0xbf   : > { %3631 = vmatmul.msk.f32.gmra.mxu0 %vm384_vm1, %v295_v33 }
  0xc4   : > { %v712_v34 = vpop.f32.mrf.mxu0 }
  0xc7   : > { %3632 = vmatmul.msk.f32.gmra.mxu0 %vm384_vm1, %v296_v35  ;;  %v366_v35 = vld [vmem:[%s4428_s21 + $0x2d0] sm:$0xff] }
  0xcc   : > { %v715_v36 = vpop.f32.mrf.mxu0 }
  0xcf   : > { %3633 = vmatmul.msk.f32.gmra.mxu0 %vm384_vm1, %v297_v37  ;;  %v327_v37 = vld [vmem:[%s4428_s21 + $0x198] sm:$0xff] }
  0xd4   : > { %v718_v38 = vpop.f32.mrf.mxu0 }
  0xd7   : > { %3634 = vmatmul.msk.f32.gmra.mxu0 %vm384_vm1, %v298_v39 }
  0xdc   : > { %v721_v40 = vpop.f32.mrf.mxu0 }
  0xdf   : > { %3635 = vmatmul.msk.f32.gmra.mxu0 %vm384_vm1, %v299_v41  ;;  %v368_v41 = vld [vmem:[%s4428_s21 + $0x2e0] sm:$0xff] }
  0xe4   : > { %v724_v42 = vpop.f32.mrf.mxu0 }
  0xe7   : > { %3636 = vmatmul.msk.f32.gmra.mxu0 %vm384_vm1, %v300_v43  ;;  %v329_v43 = vld [vmem:[%s4428_s21 + $0x1a8] sm:$0xff] }
  0xec   : > { %v727_v44 = vpop.f32.mrf.mxu0 }
  0xef   : > { %3637 = vmatmul.msk.f32.gmra.mxu0 %vm384_vm1, %v301_v45  ;;  %v994_v45 = vld [vmem:[%s7271_s2] sm:$0xff] }
  0xf4   : > { %v730_v46 = vpop.f32.mrf.mxu0 }
  0xf7   : > { %3638 = vmatmul.msk.f32.gmra.mxu0 %vm384_vm1, %v302_v47  ;;  %v330_v47 = vld [vmem:[%s4428_s21 + $0x1b0] sm:$0xff] }
  0xfc   : > { %v733_v48 = vpop.f32.mrf.mxu0 }
  0xff   : > { %3639 = vmatmul.msk.f32.gmra.mxu0 %vm384_vm1, %v303_v49  ;;  %v1001_v49 = vld [vmem:[%s7271_s2 + $0x38] sm:$0xff] }
 0x104   : > { %v736_v50 = vpop.f32.mrf.mxu0 }
 0x107   : > { %3640 = vmatmul.msk.f32.gmra.mxu0 %vm384_vm1, %v304_v51  ;;  %v331_v51 = vld [vmem:[%s4428_s21 + $0x1b8] sm:$0xff] }
 0x10c   : > { %v739_v52 = vpop.f32.mrf.mxu0 }
 0x10f   : > { %3641 = vmatmul.msk.f32.gmra.mxu0 %vm384_vm1, %v305_v53  ;;  %v1008_v53 = vld [vmem:[%s7271_s2 + $0x70] sm:$0xff] }
 0x114   : > { %v742_v54 = vpop.f32.mrf.mxu0 }
 0x117   : > { %3642 = vmatmul.msk.f32.gmra.mxu0 %vm384_vm1, %v306_v55  ;;  %v332_v55 = vld [vmem:[%s4428_s21 + $0x1c0] sm:$0xff] }
 0x11c   : > { %v745_v56 = vpop.f32.mrf.mxu0 }
 0x11d   : > { %1245 = vmatpush.msra.mxu1 %v745_v56  ;;  %v1016_v56 = vld [vmem:[%s7271_s2 + $0xb0] sm:$0xff] }
 0x11f   : > { %3643 = vmatmul.msk.f32.gmra.mxu0 %vm384_vm1, %v307_v57  ;;  %1246 = vmatpush.msra.mxu1 %v742_v54  ;;  %v1015_v57 = vld [vmem:[%s7271_s2 + $0xa8] sm:$0xff] }
 0x121   : > { %1247 = vmatpush.msra.mxu1 %v739_v52  ;;  %v1009_v52 = vld [vmem:[%s7271_s2 + $0x78] sm:$0xff] }
 0x123   : > { %1248 = vmatpush.msra.mxu1 %v736_v50 }
 0x124   : > { %v4503_v58 = vpop.f32.mrf.mxu0 }
 0x125   : > { %1249 = vmatpush.msra.mxu1 %v733_v48  ;;  %v1002_v48 = vld [vmem:[%s7271_s2 + $0x40] sm:$0xff] }
 0x127   : > { %3644 = vmatmul.msk.f32.gmra.mxu0 %vm384_vm1, %v308_v59  ;;  %1250 = vmatpush.msra.mxu1 %v730_v46  ;;  %v333_v59 = vld [vmem:[%s4428_s21 + $0x1c8] sm:$0xff] }
 0x129   : > { %1251 = vmatpush.msra.mxu1 %v727_v44  ;;  %v995_v44 = vld [vmem:[%s7271_s2 + $0x8] sm:$0xff] }
 0x12b   : > { %1252 = vmatpush.msra.mxu1 %v724_v42 }
 0x12c   : > { %v4507_v60 = vpop.f32.mrf.mxu0 }
 0x12d   : > { %1253 = vmatpush.msra.mxu1 %v721_v40  ;;  %v328_v40 = vld [vmem:[%s4428_s21 + $0x1a0] sm:$0xff] }
 0x12f   : > { %3645 = vmatmul.msk.f32.gmra.mxu0 %vm384_vm1, %v309_v61  ;;  %1254 = vmatpush.msra.mxu1 %v718_v38  ;;  %v367_v38 = vld [vmem:[%s4428_s21 + $0x2d8] sm:$0xff]  ;;  %v369_v61 = vld [vmem:[%s4428_s21 + $0x2e8] sm:$0xff] }
 0x130   : > { %3705 = vmatmul.msk.f32.vlgmr.msra.gmra.mxu3 %vm384_vm1, %v369_v61 }
 0x131   : > { %1255 = vmatpush.msra.mxu1 %v715_v36 }
 0x133   : > { %1256 = vmatpush.msra.mxu1 %v712_v34  ;;  %v326_v34 = vld [vmem:[%s4428_s21 + $0x190] sm:$0xff] }
 0x134   : > { %v4511_v62 = vpop.f32.mrf.mxu0 }
 0x135   : > { %1257 = vmatpush.msra.mxu1 %v709_v32  ;;  %v365_v32 = vld [vmem:[%s4428_s21 + $0x2c8] sm:$0xff] }
 0x137   : > { %3646 = vmatmul.msk.f32.gmra.mxu0 %vm384_vm1, %v310_v63  ;;  %1258 = vmatpush.msra.mxu1 %v4473_v30 }
 0x139   : > { %1259 = vmatpush.msra.mxu1 %v4469_v28  ;;  %v324_v28 = vld [vmem:[%s4428_s21 + $0x180] sm:$0xff] }
 0x13b   : > { %1260 = vmatpush.msra.mxu1 %v4465_v26  ;;  %v363_v26 = vld [vmem:[%s4428_s21 + $0x2b8] sm:$0xff] }
 0x13c   : > { %v4518_v0 = vpop.f32.mrf.mxu0  ;;  %3699 = vmatmul.msk.f32.vlgmr.msra.gmra.mxu2 %vm384_vm1, %v363_v26  ;;  %1261 = vmatmul.f32.vlgmr.msra.gmra.mxu1 %v994_v45  ;;  %v1064_v26 = vld [vmem:[%s7271_s2 + $0x230] sm:$0xff] }
 0x13f   : > { %3647 = vmatmul.msk.f32.gmra.mxu0 %vm384_vm1, %v311_v1  ;;  %v1030_v1 = vld [vmem:[%s7271_s2 + $0x120] sm:$0xff] }
 0x144   : > { %v760_v2 = vpop.f32.mrf.mxu0  ;;  %3700 = vmatmul.msk.f32.gmra.mxu2 %vm384_vm1, %v364_v29  ;;  %1264 = vmatmul.f32.gmra.mxu1 %v1001_v49  ;;  %v340_v29 = vld [vmem:[%s4428_s21 + $0x200] sm:$0xff]  ;;  %v1099_v49 = vld [vmem:[%s7271_s2 + $0x348] sm:$0xff] }
 0x147   : > { %3648 = vmatmul.msk.f32.gmra.mxu0 %vm384_vm1, %v312_v3  ;;  %v1029_v3 = vld [vmem:[%s7271_s2 + $0x118] sm:$0xff] }
 0x14c   : > { %v763_v4 = vpop.f32.mrf.mxu0  ;;  %3701 = vmatmul.msk.f32.gmra.mxu2 %vm384_vm1, %v365_v32  ;;  %1267 = vmatmul.f32.gmra.mxu1 %v1008_v53  ;;  %v1071_v32 = vld [vmem:[%s7271_s2 + $0x268] sm:$0xff]  ;;  %v1017_v53 = vld [vmem:[%s7271_s2 + $0xb8] sm:$0xff] }
 0x14f   : > { %3649 = vmatmul.msk.f32.gmra.mxu0 %vm384_vm1, %v313_v5  ;;  %v335_v5 = vld [vmem:[%s4428_s21 + $0x1d8] sm:$0xff] }
 0x154   : > { %v766_v6 = vpop.f32.mrf.mxu0  ;;  %3702 = vmatmul.msk.f32.gmra.mxu2 %vm384_vm1, %v366_v35  ;;  %1270 = vmatmul.f32.gmra.mxu1 %v1015_v57  ;;  %v341_v35 = vld [vmem:[%s4428_s21 + $0x208] sm:$0xff] }
 0x157   : > { %3650 = vmatmul.msk.f32.gmra.mxu0 %vm384_vm1, %v314_v7  ;;  %v371_v7 = vld [vmem:[%s4428_s21 + $0x2f8] sm:$0xff] }
 0x15c   : > { %v769_v8 = vpop.f32.mrf.mxu0  ;;  %3703 = vmatmul.msk.f32.gmra.mxu2 %vm384_vm1, %v367_v38  ;;  %v1078_v38 = vld [vmem:[%s7271_s2 + $0x2a0] sm:$0xff] }
 0x15f   : > { %3651 = vmatmul.msk.f32.gmra.mxu0 %vm384_vm1, %v315_v9 }
 0x164   : > { %v772_v10 = vpop.f32.mrf.mxu0  ;;  %3704 = vmatmul.msk.f32.gmra.mxu2 %vm384_vm1, %v368_v41  ;;  %v342_v41 = vld [vmem:[%s4428_s21 + $0x210] sm:$0xff] }
 0x167   : > { %3652 = vmatmul.msk.f32.gmra.mxu0 %vm384_vm1, %v316_v11  ;;  %v1044_v11 = vld [vmem:[%s7271_s2 + $0x190] sm:$0xff] }
 0x16c   : > { %v775_v12 = vpop.f32.mrf.mxu0 }
 0x16f   : > { %3653 = vmatmul.msk.f32.gmra.mxu0 %vm384_vm1, %v317_v13  ;;  %v1043_v13 = vld [vmem:[%s7271_s2 + $0x188] sm:$0xff] }
 0x174   : > { %v778_v14 = vpop.f32.mrf.mxu0 }
 0x177   : > { %3654 = vmatmul.msk.f32.gmra.mxu0 %vm384_vm1, %v318_v15  ;;  %v337_v15 = vld [vmem:[%s4428_s21 + $0x1e8] sm:$0xff] }
 0x17c   : > { %v781_v16 = vpop.f32.mrf.mxu0 }
 0x17f   : > { %3655 = vmatmul.msk.f32.gmra.mxu0 %vm384_vm1, %v319_v17  ;;  %v373_v17 = vld [vmem:[%s4428_s21 + $0x308] sm:$0xff] }
 0x184   : > { %v784_v18 = vpop.f32.mrf.mxu0 }
 0x187   : > { %3656 = vmatmul.msk.f32.gmra.mxu0 %vm384_vm1, %v320_v19 }
 0x18c   : > { %v787_v20 = vpop.f32.mrf.mxu0 }
 0x18f   : > { %3657 = vmatmul.msk.f32.gmra.mxu0 %vm384_vm1, %v321_v21  ;;  %v1058_v21 = vld [vmem:[%s7271_s2 + $0x200] sm:$0xff] }
 0x194   : > { %v790_v22 = vpop.f32.mrf.mxu0 }
 0x197   : > { %3658 = vmatmul.msk.f32.gmra.mxu0 %vm384_vm1, %v322_v23 }
 0x19c   : > { %v793_v24 = vpop.f32.mrf.mxu0 }
 0x19d   : > { %1337 = vmatpush.msrb.mxu2 %v793_v24  ;;  %v339_v24 = vld [vmem:[%s4428_s21 + $0x1f8] sm:$0xff] }
 0x19f   : > { %3659 = vmatmul.msk.f32.gmra.mxu0 %vm384_vm1, %v323_v25  ;;  %1338 = vmatpush.msrb.mxu2 %v790_v22  ;;  %v1057_v22 = vld [vmem:[%s7271_s2 + $0x1f8] sm:$0xff] }
 0x1a0   : > { %v1065_v25 = vld [vmem:[%s7271_s2 + $0x238] sm:$0xff] }
 0x1a1   : > { %1339 = vmatpush.msrb.mxu2 %v787_v20  ;;  %v338_v20 = vld [vmem:[%s4428_s21 + $0x1f0] sm:$0xff] }
 0x1a3   : > { %1340 = vmatpush.msrb.mxu2 %v784_v18  ;;  %v1050_v18 = vld [vmem:[%s7271_s2 + $0x1c0] sm:$0xff] }
 0x1a4   : > { %v4548_v27 = vpop.f32.mrf.mxu0 }
 0x1a5   : > { %1341 = vmatpush.msrb.mxu2 %v781_v16  ;;  %v1051_v16 = vld [vmem:[%s7271_s2 + $0x1c8] sm:$0xff] }
 0x1a7   : > { %3660 = vmatmul.msk.f32.gmra.mxu0 %vm384_vm1, %v324_v28  ;;  %1342 = vmatpush.msrb.mxu2 %v778_v14 }
 0x1a9   : > { %1343 = vmatpush.msrb.mxu2 %v775_v12  ;;  %v372_v12 = vld [vmem:[%s4428_s21 + $0x300] sm:$0xff] }
 0x1ab   : > { %1344 = vmatpush.msrb.mxu2 %v772_v10  ;;  %v336_v10 = vld [vmem:[%s4428_s21 + $0x1e0] sm:$0xff] }
 0x1ac   : > { %v4554_v30 = vpop.f32.mrf.mxu0 }
 0x1ad   : > { %1345 = vmatpush.msrb.mxu2 %v769_v8  ;;  %v1036_v8 = vld [vmem:[%s7271_s2 + $0x150] sm:$0xff] }
 0x1af   : > { %3661 = vmatmul.msk.f32.gmra.mxu0 %vm384_vm1, %v325_v31  ;;  %1346 = vmatpush.msrb.mxu2 %v766_v6  ;;  %v1037_v6 = vld [vmem:[%s7271_s2 + $0x158] sm:$0xff]  ;;  %v1072_v31 = vld [vmem:[%s7271_s2 + $0x270] sm:$0xff] }
 0x1b1   : > { %1347 = vmatpush.msrb.mxu2 %v763_v4 }
 0x1b3   : > { %1348 = vmatpush.msrb.mxu2 %v760_v2  ;;  %v370_v2 = vld [vmem:[%s4428_s21 + $0x2f0] sm:$0xff] }
 0x1b4   : > { %v4560_v33 = vpop.f32.mrf.mxu0  ;;  %3706 = vmatmul.msk.f32.gmra.mxu3 %vm384_vm1, %v370_v2  ;;  %v1121_v2 = vld [vmem:[%s7271_s2 + $0x3f8] sm:$0xff] }
 0x1b5   : > { %1349 = vmatpush.msrb.mxu2 %v4518_v0  ;;  %v334_v0 = vld [vmem:[%s4428_s21 + $0x1d0] sm:$0xff] }
 0x1b7   : > { %3662 = vmatmul.msk.f32.gmra.mxu0 %vm384_vm1, %v326_v34  ;;  %1350 = vmatpush.msrb.mxu2 %v4511_v62  ;;  %v1022_v62 = vld [vmem:[%s7271_s2 + $0xe0] sm:$0xff] }
 0x1b8   : > { %1273 = vmatmul.f32.gmra.mxu1 %v1022_v62  ;;  %v1113_v62 = vld [vmem:[%s7271_s2 + $0x3b8] sm:$0xff] }
 0x1b9   : > { %1351 = vmatpush.msrb.mxu2 %v4507_v60  ;;  %v1023_v60 = vld [vmem:[%s7271_s2 + $0xe8] sm:$0xff] }
 0x1bb   : > { %1352 = vmatpush.msrb.mxu2 %v4503_v58 }
 0x1bc   : > { %v4570_v36 = vpop.f32.mrf.mxu0  ;;  %1353 = vmatmul.f32.vlgmr.msrb.gmra.mxu2 %v995_v44  ;;  %3707 = vmatmul.msk.f32.gmra.mxu3 %vm384_vm1, %v371_v7  ;;  %v343_v44 = vld [vmem:[%s4428_s21 + $0x218] sm:$0xff]  ;;  %v348_v7 = vld [vmem:[%s4428_s21 + $0x240] sm:$0xff] }
 0x1bf   : > { %3663 = vmatmul.msk.f32.gmra.mxu0 %vm384_vm1, %v327_v37  ;;  %v1079_v37 = vld [vmem:[%s7271_s2 + $0x2a8] sm:$0xff] }
 0x1c0   : > { %1276 = vmatmul.f32.gmra.mxu1 %v1029_v3  ;;  %v1031_v3 = vld [vmem:[%s7271_s2 + $0x128] sm:$0xff] }
 0x1c4   : > { %v4576_v39 = vpop.f32.mrf.mxu0  ;;  %1356 = vmatmul.f32.gmra.mxu2 %v1002_v48  ;;  %3708 = vmatmul.msk.f32.gmra.mxu3 %vm384_vm1, %v372_v12  ;;  %v1010_v48 = vld [vmem:[%s7271_s2 + $0x80] sm:$0xff]  ;;  %v1127_v12 = vld [vmem:[%s7271_s2 + $0x428] sm:$0xff] }
 0x1c7   : > { %3664 = vmatmul.msk.f32.gmra.mxu0 %vm384_vm1, %v328_v40 }
 0x1c8   : > { %1279 = vmatmul.f32.gmra.mxu1 %v1036_v8  ;;  %v1128_v8 = vld [vmem:[%s7271_s2 + $0x430] sm:$0xff] }
 0x1cc   : > { %v4582_v42 = vpop.f32.mrf.mxu0  ;;  %1359 = vmatmul.f32.gmra.mxu2 %v1009_v52  ;;  %3709 = vmatmul.msk.f32.gmra.mxu3 %vm384_vm1, %v373_v17  ;;  %v1107_v52 = vld [vmem:[%s7271_s2 + $0x388] sm:$0xff]  ;;  %v1045_v17 = vld [vmem:[%s7271_s2 + $0x198] sm:$0xff] }
 0x1cf   : > { %3665 = vmatmul.msk.f32.gmra.mxu0 %vm384_vm1, %v329_v43  ;;  %v1086_v43 = vld [vmem:[%s7271_s2 + $0x2e0] sm:$0xff] }
 0x1d0   : > { %1282 = vmatmul.f32.gmra.mxu1 %v1043_v13 }
 0x1d4   : > { %v4592_v46 = vpop.f32.mrf.mxu0  ;;  %1362 = vmatmul.f32.gmra.mxu2 %v1016_v56  ;;  %v1106_v56 = vld [vmem:[%s7271_s2 + $0x380] sm:$0xff] }
 0x1d7   : > { %3666 = vmatmul.msk.f32.gmra.mxu0 %vm384_vm1, %v330_v47  ;;  %v1100_v47 = vld [vmem:[%s7271_s2 + $0x350] sm:$0xff] }
 0x1d8   : > { %1285 = vmatmul.f32.gmra.mxu1 %v1050_v18 }
 0x1dc   : > { %v4602_v50 = vpop.f32.mrf.mxu0  ;;  %1365 = vmatmul.f32.gmra.mxu2 %v1023_v60  ;;  %v1024_v60 = vld [vmem:[%s7271_s2 + $0xf0] sm:$0xff] }
 0x1df   : > { %3667 = vmatmul.msk.f32.gmra.mxu0 %vm384_vm1, %v331_v51  ;;  %v345_v51 = vld [vmem:[%s4428_s21 + $0x228] sm:$0xff] }
 0x1e0   : > { %1288 = vmatmul.f32.gmra.mxu1 %v1057_v22  ;;  %v1142_v22 = vld [vmem:[%s7271_s2 + $0x4a0] sm:$0xff] }
 0x1e4   : > { %v4612_v54 = vpop.f32.mrf.mxu0  ;;  %1368 = vmatmul.f32.gmra.mxu2 %v1030_v1  ;;  %v347_v1 = vld [vmem:[%s4428_s21 + $0x238] sm:$0xff] }
 0x1e7   : > { %3668 = vmatmul.msk.f32.gmra.mxu0 %vm384_vm1, %v332_v55  ;;  %v4771_v55 = vpop.f32.mrf.mxu2 }
 0x1e8   : > { %1291 = vmatmul.f32.gmra.mxu1 %v1064_v26 }
 0x1ec   : > { %v4622_v58 = vpop.f32.mrf.mxu0  ;;  %1371 = vmatmul.f32.gmra.mxu2 %v1037_v6 }
 0x1ef   : > { %3669 = vmatmul.msk.f32.gmra.mxu0 %vm384_vm1, %v333_v59  ;;  %v1114_v59 = vld [vmem:[%s7271_s2 + $0x3c0] sm:$0xff] }
 0x1f0   : > { %1294 = vmatmul.f32.gmra.mxu1 %v1071_v32  ;;  %v351_v32 = vld [vmem:[%s4428_s21 + $0x258] sm:$0xff] }
 0x1f4   : > { %v826_v63 = vpop.f32.mrf.mxu0  ;;  %1374 = vmatmul.f32.gmra.mxu2 %v1044_v11 }
 0x1f7   : > { %3670 = vmatmul.msk.f32.gmra.mxu0 %vm384_vm1, %v334_v0 }
 0x1f8   : > { %1297 = vmatmul.f32.gmra.mxu1 %v1078_v38  ;;  %v1059_v38 = vld [vmem:[%s7271_s2 + $0x208] sm:$0xff] }
 0x1fc   : > { %v829_v4 = vpop.f32.mrf.mxu0  ;;  %1377 = vmatmul.f32.gmra.mxu2 %v1051_v16 }
 0x1ff   : > { %3671 = vmatmul.msk.f32.gmra.mxu0 %vm384_vm1, %v335_v5  ;;  %v1120_v5 = vld [vmem:[%s7271_s2 + $0x3f0] sm:$0xff] }
 0x204   : > { %v832_v9 = vpop.f32.mrf.mxu0  ;;  %1380 = vmatmul.f32.gmra.mxu2 %v1058_v21  ;;  %v350_v21 = vld [vmem:[%s4428_s21 + $0x250] sm:$0xff] }
 0x207   : > { %3672 = vmatmul.msk.f32.gmra.mxu0 %vm384_vm1, %v336_v10  ;;  %v1038_v10 = vld [vmem:[%s7271_s2 + $0x160] sm:$0xff] }
 0x20c   : > { %v835_v14 = vpop.f32.mrf.mxu0  ;;  %1383 = vmatmul.f32.gmra.mxu2 %v1065_v25 }
 0x20f   : > { %3673 = vmatmul.msk.f32.gmra.mxu0 %vm384_vm1, %v337_v15  ;;  %v1135_v15 = vld [vmem:[%s7271_s2 + $0x468] sm:$0xff] }
 0x214   : > { %v838_v19 = vpop.f32.mrf.mxu0  ;;  %1386 = vmatmul.f32.gmra.mxu2 %v1072_v31 }
 0x217   : > { %3674 = vmatmul.msk.f32.gmra.mxu0 %vm384_vm1, %v338_v20 }
 0x21c   : > { %v841_v23 = vpop.f32.mrf.mxu0  ;;  %1389 = vmatmul.f32.gmra.mxu2 %v1079_v37 }
 0x21d   : > { %1429 = vmatpush.msrb.mxu3 %v841_v23  ;;  %v979_v23 = vpop.f32.mrf.mxu3 }
 0x21f   : > { %3675 = vmatmul.msk.f32.gmra.mxu0 %vm384_vm1, %v339_v24  ;;  %1430 = vmatpush.msrb.mxu3 %v838_v19  ;;  %v1134_v19 = vld [vmem:[%s7271_s2 + $0x460] sm:$0xff]  ;;  %v1052_v24 = vld [vmem:[%s7271_s2 + $0x1d0] sm:$0xff] }
 0x221   : > { %1431 = vmatpush.msrb.mxu3 %v835_v14  ;;  %v349_v14 = vld [vmem:[%s4428_s21 + $0x248] sm:$0xff] }
 0x223   : > { %1432 = vmatpush.msrb.mxu3 %v832_v9 }
 0x224   : > { %v4690_v28 = vpop.f32.mrf.mxu0  ;;  %1392 = vmatmul.f32.gmra.mxu2 %v1086_v43  ;;  %v1148_v43 = vld [vmem:[%s7271_s2 + $0x4d0] sm:$0xff] }
 0x225   : > { %1433 = vmatpush.msrb.mxu3 %v829_v4 }
 0x227   : > { %3676 = vmatmul.msk.f32.gmra.mxu0 %vm384_vm1, %v340_v29  ;;  %1434 = vmatpush.msrb.mxu3 %v826_v63  ;;  %v4791_v63 = vpop.f32.mrf.mxu2  ;;  %v1141_v29 = vld [vmem:[%s7271_s2 + $0x498] sm:$0xff] }
 0x229   : > { %1435 = vmatpush.msrb.mxu3 %v4622_v58  ;;  %v346_v58 = vld [vmem:[%s4428_s21 + $0x230] sm:$0xff] }
 0x22b   : > { %1436 = vmatpush.msrb.mxu3 %v4612_v54  ;;  %v4769_v54 = vpop.f32.mrf.mxu1 }
 0x22c   : > { %v4702_v34 = vpop.f32.mrf.mxu0 }
 0x22d   : > { %1437 = vmatpush.msrb.mxu3 %v4602_v50 }
 0x22f   : > { %3677 = vmatmul.msk.f32.gmra.mxu0 %vm384_vm1, %v341_v35  ;;  %1438 = vmatpush.msrb.mxu3 %v4592_v46  ;;  %v344_v46 = vld [vmem:[%s4428_s21 + $0x220] sm:$0xff]  ;;  %v4814_v9 = vpop.f32.mrf.mxu2  ;;  %v1149_v35 = vld [vmem:[%s7271_s2 + $0x4d8] sm:$0xff] }
 0x231   : > { %1439 = vmatpush.msrb.mxu3 %v4582_v42 }
 0x233   : > { %1440 = vmatpush.msrb.mxu3 %v4576_v39  ;;  %v996_v39 = vld [vmem:[%s7271_s2 + $0x10] sm:$0xff]  ;;  %v4786_v61 = vpop.f32.mrf.mxu1 }
 0x234   : > { %v4716_v40 = vpop.f32.mrf.mxu0 }
 0x235   : > { %1441 = vmatpush.msrb.mxu3 %v4570_v36  ;;  %v1085_v36 = vld [vmem:[%s7271_s2 + $0x2d8] sm:$0xff] }
 0x236   : > { %1300 = vmatmul.f32.gmra.mxu1 %v1085_v36 }
 0x237   : > { %3678 = vmatmul.msk.f32.gmra.mxu0 %vm384_vm1, %v342_v41  ;;  %1442 = vmatpush.msrb.mxu3 %v4560_v33  ;;  %v1093_v33 = vld [vmem:[%s7271_s2 + $0x318] sm:$0xff]  ;;  %v970_v16 = vpop.f32.mrf.mxu2  ;;  %v982_v37 = vpop.f32.mrf.mxu3 }
 0x238   : > { %1395 = vmatmul.f32.gmra.mxu2 %v1093_v33  ;;  %v1156_v33 = vld [vmem:[%s7271_s2 + $0x510] sm:$0xff] }
 0x239   : > { %1443 = vmatpush.msrb.mxu3 %v4554_v30  ;;  %v1092_v30 = vld [vmem:[%s7271_s2 + $0x310] sm:$0xff] }
 0x23b   : > { %1444 = vmatpush.msrb.mxu3 %v4548_v27  ;;  %v1003_v27 = vld [vmem:[%s7271_s2 + $0x48] sm:$0xff]  ;;  %v4803_v4 = vpop.f32.mrf.mxu1 }
 0x23c   : > { %v4733_v42 = vpop.f32.mrf.mxu0  ;;  %1445 = vmatmul.f32.vlgmr.msrb.gmra.mxu3 %v996_v39 }
 0x23e   : > { %1303 = vmatmul.f32.gmra.mxu1 %v1092_v30  ;;  %v1066_v30 = vld [vmem:[%s7271_s2 + $0x240] sm:$0xff] }
 0x23f   : > { %3679 = vmatmul.msk.f32.gmra.mxu0 %vm384_vm1, %v343_v44  ;;  %v973_v26 = vpop.f32.mrf.mxu2  ;;  %v352_v44 = vld [vmem:[%s4428_s21 + $0x260] sm:$0xff] }
 0x240   : > { %1398 = vmatmul.f32.gmra.mxu2 %v1100_v47  ;;  %v1155_v47 = vld [vmem:[%s7271_s2 + $0x508] sm:$0xff] }
 0x243   : > { %v4820_v11 = vpop.f32.mrf.mxu1 }
 0x244   : > { %v4746_v45 = vpop.f32.mrf.mxu0  ;;  %1448 = vmatmul.f32.gmra.mxu3 %v1003_v27  ;;  %v985_v27 = vpop.f32.mrf.mxu3 }
 0x245   : > { %1705 = vmatpush.msra.mxu3 %v985_v27  ;;  %v1143_v27 = vld [vmem:[%s7271_s2 + $0x4a8] sm:$0xff] }
 0x246   : > { %1306 = vmatmul.f32.gmra.mxu1 %v1099_v49  ;;  %v353_v49 = vld [vmem:[%s4428_s21 + $0x268] sm:$0xff] }
 0x247   : > { %3680 = vmatmul.msk.f32.gmra.mxu0 %vm384_vm1, %v344_v46  ;;  %v976_v39 = vpop.f32.mrf.mxu2  ;;  %1706 = vmatpush.msra.mxu3 %v982_v37  ;;  %v362_v37 = vld [vmem:[%s4428_s21 + $0x2b0] sm:$0xff] }
 0x248   : > { %1401 = vmatmul.f32.gmra.mxu2 %v1107_v52 }
 0x249   : > { %1707 = vmatpush.msra.mxu3 %v979_v23  ;;  %v1011_v23 = vld [vmem:[%s7271_s2 + $0x88] sm:$0xff] }
 0x24b   : > { %v4835_v18 = vpop.f32.mrf.mxu1  ;;  %1708 = vmatpush.msra.mxu3 %v976_v39  ;;  %v1025_v39 = vld [vmem:[%s7271_s2 + $0xf8] sm:$0xff] }
 0x24c   : > { %v4759_v50 = vpop.f32.mrf.mxu0  ;;  %1451 = vmatmul.f32.gmra.mxu3 %v1010_v48 }
 0x24d   : > { %1709 = vmatpush.msra.mxu3 %v973_v26 }
 0x24e   : > { %1309 = vmatmul.f32.gmra.mxu1 %v1106_v56 }
 0x24f   : > { %3681 = vmatmul.msk.f32.gmra.mxu0 %vm384_vm1, %v345_v51  ;;  %v1163_v51 = vld [vmem:[%s7271_s2 + $0x548] sm:$0xf]  ;;  %v4885_v52 = vpop.f32.mrf.mxu2  ;;  %1710 = vmatpush.msra.mxu3 %v970_v16 }
 0x250   : > { %1404 = vmatmul.f32.gmra.mxu2 %v1114_v59 }
 0x251   : > { %1711 = vmatpush.msra.mxu3 %v4814_v9  ;;  %v988_v9 = vpop.f32.mrf.mxu3 }
 0x253   : > { %v4850_v25 = vpop.f32.mrf.mxu1  ;;  %1712 = vmatpush.msra.mxu3 %v4791_v63  ;;  %v1087_v63 = vld [vmem:[%s7271_s2 + $0x2e8] sm:$0xff] }
 0x254   : > { %v4776_v57 = vpop.f32.mrf.mxu0  ;;  %1454 = vmatmul.f32.gmra.mxu3 %v1017_v53  ;;  %v1073_v53 = vld [vmem:[%s7271_s2 + $0x278] sm:$0xff] }
 0x255   : > { %1713 = vmatpush.msra.mxu3 %v4771_v55  ;;  %v356_v55 = vld [vmem:[%s4428_s21 + $0x280] sm:$0xff] }
 0x256   : > { %1312 = vmatmul.f32.gmra.mxu1 %v1113_v62  ;;  %v1080_v62 = vld [vmem:[%s7271_s2 + $0x2b0] sm:$0xff] }
 0x257   : > { %3682 = vmatmul.msk.f32.gmra.mxu0 %vm384_vm1, %v346_v58  ;;  %v1162_v58 = vld [vmem:[%s7271_s2 + $0x540] sm:$0xf] }
 0x258   : > { %1407 = vmatmul.f32.gmra.mxu2 %v1121_v2 }
 0x25b   : > { %v4863_v41 = vpop.f32.mrf.mxu1 }
 0x25c   : > { %v4793_v0 = vpop.f32.mrf.mxu0  ;;  %1457 = vmatmul.f32.gmra.mxu3 %v1024_v60  ;;  %v354_v60 = vld [vmem:[%s4428_s21 + $0x270] sm:$0xff] }
 0x25e   : > { %1315 = vmatmul.f32.gmra.mxu1 %v1120_v5 }
 0x25f   : > { %3683 = vmatmul.msk.f32.gmra.mxu0 %vm384_vm1, %v347_v1 }
 0x260   : > { %1410 = vmatmul.f32.gmra.mxu2 %v1128_v8  ;;  %v1094_v8 = vld [vmem:[%s7271_s2 + $0x320] sm:$0xff] }
 0x263   : > { %v4876_v46 = vpop.f32.mrf.mxu1 }
 0x264   : > { %v4808_v6 = vpop.f32.mrf.mxu0  ;;  %1460 = vmatmul.f32.gmra.mxu3 %v1031_v3  ;;  %v355_v3 = vld [vmem:[%s4428_s21 + $0x278] sm:$0xff] }
 0x266   : > { %1318 = vmatmul.f32.gmra.mxu1 %v1127_v12  ;;  %v357_v12 = vld [vmem:[%s4428_s21 + $0x288] sm:$0xff] }
 0x267   : > { %3684 = vmatmul.msk.f32.gmra.mxu0 %vm384_vm1, %v348_v7 }
 0x268   : > { %1413 = vmatmul.f32.gmra.mxu2 %v1135_v15  ;;  %v358_v15 = vld [vmem:[%s4428_s21 + $0x290] sm:$0xff] }
 0x26b   : > { %v4891_v56 = vpop.f32.mrf.mxu1 }
 0x26c   : > { %v4825_v13 = vpop.f32.mrf.mxu0  ;;  %1463 = vmatmul.f32.gmra.mxu3 %v1038_v10 }
 0x26e   : > { %1321 = vmatmul.f32.gmra.mxu1 %v1134_v19  ;;  %v1004_v19 = vld [vmem:[%s7271_s2 + $0x50] sm:$0xff] }
 0x26f   : > { %3685 = vmatmul.msk.f32.gmra.mxu0 %vm384_vm1, %v349_v14 }
 0x270   : > { %1416 = vmatmul.f32.gmra.mxu2 %v1142_v22  ;;  %v1122_v22 = vld [vmem:[%s7271_s2 + $0x400] sm:$0xff] }
 0x273   : > { %v4903_v1 = vpop.f32.mrf.mxu1 }
 0x274   : > { %v4840_v20 = vpop.f32.mrf.mxu0  ;;  %1466 = vmatmul.f32.gmra.mxu3 %v1045_v17 }
 0x276   : > { %1324 = vmatmul.f32.gmra.mxu1 %v1141_v29  ;;  %v361_v29 = vld [vmem:[%s4428_s21 + $0x2a8] sm:$0xff] }
 0x277   : > { %3686 = vmatmul.msk.f32.gmra.mxu0 %vm384_vm1, %v350_v21 }
 0x278   : > { %1419 = vmatmul.f32.gmra.mxu2 %v1149_v35 }
 0x27b   : > { %v4911_v5 = vpop.f32.mrf.mxu1 }
 0x27c   : > { %v877_v31 = vpop.f32.mrf.mxu0  ;;  %1469 = vmatmul.f32.gmra.mxu3 %v1052_v24 }
 0x27e   : > { %1327 = vmatmul.f32.gmra.mxu1 %v1148_v43  ;;  %v1136_v43 = vld [vmem:[%s7271_s2 + $0x470] sm:$0xff] }
 0x27f   : > { %3687 = vmatmul.msk.f32.gmra.mxu0 %vm384_vm1, %v351_v32  ;;  %v1018_v32 = vld [vmem:[%s7271_s2 + $0xc0] sm:$0xff] }
 0x280   : > { %1422 = vmatmul.f32.gmra.mxu2 %v1156_v33 }
 0x283   : > { %v4927_v14 = vpop.f32.mrf.mxu1 }
 0x284   : > { %v880_v36 = vpop.f32.mrf.mxu0  ;;  %1472 = vmatmul.f32.gmra.mxu3 %v1059_v38  ;;  %7282 = vst [vmem:[#allocation5_spill] sm:$0xff] %v4927_v14 }
 0x286   : > { %1330 = vmatmul.f32.gmra.mxu1 %v1155_v47 }
 0x287   : > { %3688 = vmatmul.msk.f32.gmra.mxu0 %vm384_vm1, %v352_v44 }
 0x288   : > { %1425 = vmatmul.f32.gmra.mxu2 %v1163_v51  ;;  %v1039_v51 = vld [vmem:[%s7271_s2 + $0x168] sm:$0xff] }
 0x28c   : > { %v883_v48 = vpop.f32.mrf.mxu0  ;;  %1475 = vmatmul.f32.gmra.mxu3 %v1066_v30  ;;  %v1032_v30 = vld [vmem:[%s7271_s2 + $0x130] sm:$0xff] }
 0x28e   : > { %1333 = vmatmul.f32.gmra.mxu1 %v1162_v58 }
 0x28f   : > { %3689 = vmatmul.msk.f32.gmra.mxu0 %vm384_vm1, %v353_v49  ;;  %v1150_v49 = vld [vmem:[%s7271_s2 + $0x4e0] sm:$0xff] }
 0x294   : > { %v886_v59 = vpop.f32.mrf.mxu0  ;;  %1478 = vmatmul.f32.gmra.mxu3 %v1073_v53 }
 0x297   : > { %3690 = vmatmul.msk.f32.gmra.mxu0 %vm384_vm1, %v354_v60  ;;  %v1046_v60 = vld [vmem:[%s7271_s2 + $0x1a0] sm:$0xff] }
 0x29c   : > { %v889_v2 = vpop.f32.mrf.mxu0  ;;  %1481 = vmatmul.f32.gmra.mxu3 %v1080_v62 }
 0x29d   : > { %1521 = vmatpush.msrb.mxu1 %v889_v2 }
 0x29f   : > { %3691 = vmatmul.msk.f32.gmra.mxu0 %vm384_vm1, %v355_v3  ;;  %1522 = vmatpush.msrb.mxu1 %v886_v59  ;;  %v1157_v59 = vld [vmem:[%s7271_s2 + $0x518] sm:$0xff] }
 0x2a1   : > { %1523 = vmatpush.msrb.mxu1 %v883_v48 }
 0x2a3   : > { %1524 = vmatpush.msrb.mxu1 %v880_v36  ;;  %v5002_v36 = vpop.f32.mrf.mxu2 }
 0x2a4   : > { %v4913_v7 = vpop.f32.mrf.mxu0  ;;  %1484 = vmatmul.f32.gmra.mxu3 %v1087_v63  ;;  %v1164_v63 = vld [vmem:[%s7271_s2 + $0x550] sm:$0xf] }
 0x2a5   : > { %1525 = vmatpush.msrb.mxu1 %v877_v31  ;;  %v1129_v31 = vld [vmem:[%s7271_s2 + $0x438] sm:$0xff] }
 0x2a7   : > { %3692 = vmatmul.msk.f32.gmra.mxu0 %vm384_vm1, %v356_v55  ;;  %1526 = vmatpush.msrb.mxu1 %v4840_v20  ;;  %v1053_v55 = vld [vmem:[%s7271_s2 + $0x1d8] sm:$0xff] }
 0x2a9   : > { %1527 = vmatpush.msrb.mxu1 %v4825_v13  ;;  %v1101_v13 = vld [vmem:[%s7271_s2 + $0x358] sm:$0xff] }
 0x2ab   : > { %1528 = vmatpush.msrb.mxu1 %v4808_v6  ;;  %v5014_v48 = vpop.f32.mrf.mxu2 }
 0x2ac   : > { %v4923_v10 = vpop.f32.mrf.mxu0  ;;  %1487 = vmatmul.f32.gmra.mxu3 %v1094_v8 }
 0x2ad   : > { %1529 = vmatpush.msrb.mxu1 %v4793_v0  ;;  %v991_v0 = vpop.f32.mrf.mxu3 }
 0x2af   : > { %3693 = vmatmul.msk.f32.gmra.mxu0 %vm384_vm1, %v357_v12  ;;  %1530 = vmatpush.msrb.mxu1 %v4776_v57  ;;  %v4942_v57 = vpop.f32.mrf.mxu1 }
 0x2b0   : > { %7283 = vst [vmem:[#allocation6_spill] sm:$0xff] %v4942_v57  ;;  %v2788_v57 = vld [vmem:[%s7272_s3 + $0x88] sm:$0xff] }
 0x2b1   : > { %1531 = vmatpush.msrb.mxu1 %v4759_v50  ;;  %v997_v50 = vld [vmem:[%s7271_s2 + $0x18] sm:$0xff] }
 0x2b3   : > { %1532 = vmatpush.msrb.mxu1 %v4746_v45  ;;  %v1108_v45 = vld [vmem:[%s7271_s2 + $0x390] sm:$0xff]  ;;  %v5024_v58 = vpop.f32.mrf.mxu2 }
 0x2b4   : > { %v4936_v6 = vpop.f32.mrf.mxu0  ;;  %1490 = vmatmul.f32.gmra.mxu3 %v1101_v13 }
 0x2b5   : > { %1533 = vmatpush.msrb.mxu1 %v4733_v42 }
 0x2b7   : > { %3694 = vmatmul.msk.f32.gmra.mxu0 %vm384_vm1, %v358_v15  ;;  %1534 = vmatpush.msrb.mxu1 %v4716_v40  ;;  %v359_v40 = vld [vmem:[%s4428_s21 + $0x298] sm:$0xff]  ;;  %v4966_v20 = vpop.f32.mrf.mxu1  ;;  %v1060_v15 = vld [vmem:[%s7271_s2 + $0x210] sm:$0xff] }
 0x2b8   : > { %7284 = vst [vmem:[#allocation7_spill] sm:$0xff] %v4966_v20 }
 0x2b9   : > { %1535 = vmatpush.msrb.mxu1 %v4702_v34  ;;  %v1355_v34 = vadd.f32 %v4885_v52, %v4769_v54  ;;  %v360_v54 = vld [vmem:[%s4428_s21 + $0x2a0] sm:$0xff] }
 0x2bb   : > { %1536 = vmatpush.msrb.mxu1 %v4690_v28  ;;  %v1115_v28 = vld [vmem:[%s7271_s2 + $0x3c8] sm:$0xff]  ;;  %v5042_v8 = vpop.f32.mrf.mxu2 }
 0x2bc   : > { %v4952_v42 = vpop.f32.mrf.mxu0  ;;  %1493 = vmatmul.f32.gmra.mxu3 %v1108_v45  ;;  %1537 = vmatmul.f32.vlgmr.msrb.gmra.mxu1 %v997_v50 }
 0x2bd   : > { %1811 = vmatpush.msra.mxu1 %v991_v0 }
 0x2bf   : > { %3695 = vmatmul.msk.f32.gmra.mxu0 %vm384_vm1, %v359_v40  ;;  %v1446_v16 = vpop.f32.mrf.mxu3  ;;  %1812 = vmatpush.msra.mxu1 %v988_v9  ;;  %v4978_v24 = vpop.f32.mrf.mxu1  ;;  %v1067_v40 = vld [vmem:[%s7271_s2 + $0x248] sm:$0xff] }
 0x2c0   : > { %v4958_v17 = vadd.f32 %v1446_v16, %v1355_v34  ;;  %7285 = vst [vmem:[#allocation8_spill] sm:$0xff] %v4978_v24  ;;  %v1145_v24 = vld [vmem:[%s7271_s2 + $0x4b8] sm:$0xff] }
 0x2c3   : > { %v5051_v0 = vpop.f32.mrf.mxu2 }
 0x2c4   : > { %v4968_v21 = vpop.f32.mrf.mxu0  ;;  %1496 = vmatmul.f32.gmra.mxu3 %v1115_v28  ;;  %1540 = vmatmul.f32.gmra.mxu1 %v1004_v19  ;;  %v1074_v19 = vld [vmem:[%s7271_s2 + $0x280] sm:$0xff] }
 0x2c7   : > { %3696 = vmatmul.msk.f32.gmra.mxu0 %vm384_vm1, %v360_v54  ;;  %v4993_v38 = vpop.f32.mrf.mxu1  ;;  %v5034_v3 = vpop.f32.mrf.mxu3 }
 0x2c8   : > { %7286 = vst [vmem:[#allocation9_spill] sm:$0xff] %v4993_v38  ;;  %v1089_v38 = vld [vmem:[%s7271_s2 + $0x2f8] sm:$0xff] }
 0x2cb   : > { %v5060_v28 = vpop.f32.mrf.mxu2 }
 0x2cc   : > { %v4980_v26 = vpop.f32.mrf.mxu0  ;;  %1499 = vmatmul.f32.gmra.mxu3 %v1122_v22  ;;  %1543 = vmatmul.f32.gmra.mxu1 %v1011_v23 }
 0x2cf   : > { %3697 = vmatmul.msk.f32.gmra.mxu0 %vm384_vm1, %v361_v29  ;;  %v5006_v33 = vpop.f32.mrf.mxu1  ;;  %v5046_v13 = vpop.f32.mrf.mxu3 }
 0x2d0   : > { %7287 = vst [vmem:[#allocation10_spill] sm:$0xff] %v5006_v33 }
 0x2d3   : > { %v5069_v29 = vpop.f32.mrf.mxu2 }
 0x2d4   : > { %v4990_v35 = vpop.f32.mrf.mxu0  ;;  %1502 = vmatmul.f32.gmra.mxu3 %v1129_v31  ;;  %1546 = vmatmul.f32.gmra.mxu1 %v1018_v32  ;;  %v1081_v31 = vld [vmem:[%s7271_s2 + $0x2b8] sm:$0xff] }
 0x2d7   : > { %3698 = vmatmul.msk.f32.gmra.mxu0 %vm384_vm1, %v362_v37  ;;  %v5022_v52 = vpop.f32.mrf.mxu1  ;;  %v5058_v34 = vpop.f32.mrf.mxu3 }
 0x2d8   : > { %7288 = vst [vmem:[#allocation11_spill] sm:$0xff] %v5022_v52  ;;  %v1000_v52 = vld [vmem:[%s7271_s2 + $0x30] sm:$0xff] }
 0x2dc   : > { %v5004_v44 = vpop.f32.mrf.mxu0  ;;  %1505 = vmatmul.f32.gmra.mxu3 %v1136_v43  ;;  %1549 = vmatmul.f32.gmra.mxu1 %v1025_v39  ;;  %v1088_v39 = vld [vmem:[%s7271_s2 + $0x2f0] sm:$0xff] }
 0x2df   : > { %v5032_v62 = vpop.f32.mrf.mxu1  ;;  %v5067_v23 = vpop.f32.mrf.mxu3 }
 0x2e0   : > { %7289 = vst [vmem:[#allocation12_spill] sm:$0xff] %v5032_v62  ;;  %v1061_v62 = vld [vmem:[%s7271_s2 + $0x218] sm:$0xff] }
 0x2e4   : > { %v916_v47 = vpop.f32.mrf.mxu0  ;;  %1508 = vmatmul.f32.gmra.mxu3 %v1143_v27  ;;  %1552 = vmatmul.f32.gmra.mxu1 %v1032_v30  ;;  %v5081_v27 = vpop.f32.mrf.mxu2 }
 0x2e7   : > { %v5044_v12 = vpop.f32.mrf.mxu1  ;;  %v5076_v43 = vpop.f32.mrf.mxu3 }
 0x2e8   : > { %7290 = vst [vmem:[#allocation13_spill] sm:$0xff] %v5044_v12  ;;  %v1054_v12 = vld [vmem:[%s7271_s2 + $0x1e0] sm:$0xff] }
 0x2ec   : > { %v919_v53 = vpop.f32.mrf.mxu0  ;;  %1511 = vmatmul.f32.gmra.mxu3 %v1150_v49  ;;  %1555 = vmatmul.f32.gmra.mxu1 %v1039_v51 }
 0x2ef   : > { %v5053_v50 = vpop.f32.mrf.mxu1  ;;  %v5087_v51 = vpop.f32.mrf.mxu3 }
 0x2f0   : > { %7291 = vst [vmem:[#allocation14_spill] sm:$0xff] %v5053_v50  ;;  %v1165_v50 = vld [vmem:[%s7271_s2 + $0x558] sm:$0xf] }
 0x2f4   : > { %v922_v2 = vpop.f32.mrf.mxu0  ;;  %1514 = vmatmul.f32.gmra.mxu3 %v1157_v59  ;;  %1558 = vmatmul.f32.gmra.mxu1 %v1046_v60  ;;  %v1095_v59 = vld [vmem:[%s7271_s2 + $0x328] sm:$0xff]  ;;  %v5092_v60 = vpop.f32.mrf.mxu2 }
 0x2f7   : > { %v5065_v54 = vpop.f32.mrf.mxu1 }
 0x2f8   : > { %7292 = vst [vmem:[#allocation15_spill] sm:$0xff] %v5065_v54 }
 0x2fc   : > { %v925_v9 = vpop.f32.mrf.mxu0  ;;  %1517 = vmatmul.f32.gmra.mxu3 %v1164_v63  ;;  %1561 = vmatmul.f32.gmra.mxu1 %v1053_v55 }
 0x2ff   : > { %v5074_v32 = vpop.f32.mrf.mxu1 }
 0x300   : > { %7293 = vst [vmem:[#allocation16_spill] sm:$0xff] %v5074_v32  ;;  %v1047_v32 = vld [vmem:[%s7271_s2 + $0x1a8] sm:$0xff] }
 0x304   : > { %v928_v45 = vpop.f32.mrf.mxu0  ;;  %1564 = vmatmul.f32.gmra.mxu1 %v1060_v15 }
 0x307   : > { %v5085_v49 = vpop.f32.mrf.mxu1 }
 0x308   : > { %7294 = vst [vmem:[#allocation17_spill] sm:$0xff] %v5085_v49  ;;  %v1158_v49 = vld [vmem:[%s7271_s2 + $0x520] sm:$0xff] }
 0x30c   : > { %v931_v16 = vpop.f32.mrf.mxu0  ;;  %1567 = vmatmul.f32.gmra.mxu1 %v1067_v40 }
 0x30f   : > { %v5096_v55 = vpop.f32.mrf.mxu1 }
 0x310   : > { %7295 = vst [vmem:[#allocation18_spill] sm:$0xff] %v5096_v55 }
 0x314   : > { %v934_v22 = vpop.f32.mrf.mxu0  ;;  %1570 = vmatmul.f32.gmra.mxu1 %v1074_v19  ;;  %v1123_v19 = vld [vmem:[%s7271_s2 + $0x408] sm:$0xff] }
 0x31c   : > { %v937_v37 = vpop.f32.mrf.mxu0  ;;  %1573 = vmatmul.f32.gmra.mxu1 %v1081_v31 }
 0x31d   : > { %1613 = vmatpush.msra.mxu2 %v937_v37 }
 0x31f   : > { %1614 = vmatpush.msra.mxu2 %v934_v22  ;;  %v1012_v22 = vld [vmem:[%s7271_s2 + $0x90] sm:$0xff] }
 0x321   : > { %1615 = vmatpush.msra.mxu2 %v931_v16 }
 0x323   : > { %1616 = vmatpush.msra.mxu2 %v928_v45  ;;  %v1005_v45 = vld [vmem:[%s7271_s2 + $0x58] sm:$0xff] }
 0x324   : > { %v5083_v30 = vpop.f32.mrf.mxu0  ;;  %1576 = vmatmul.f32.gmra.mxu1 %v1088_v39 }
 0x325   : > { %1617 = vmatpush.msra.mxu2 %v925_v9  ;;  %v5106_v9 = vpop.f32.mrf.mxu2 }
 0x327   : > { %1618 = vmatpush.msra.mxu2 %v922_v2  ;;  %v5102_v2 = vpop.f32.mrf.mxu3 }
 0x329   : > { %1619 = vmatpush.msra.mxu2 %v919_v53  ;;  %v1102_v53 = vld [vmem:[%s7271_s2 + $0x360] sm:$0xff] }
 0x32b   : > { %1620 = vmatpush.msra.mxu2 %v916_v47 }
 0x32c   : > { %v943_v63 = vpop.f32.mrf.mxu0  ;;  %1579 = vmatmul.f32.gmra.mxu1 %v1095_v59 }
 0x32d   : > { %1621 = vmatpush.msra.mxu2 %v5004_v44 }
 0x32f   : > { %1622 = vmatpush.msra.mxu2 %v4990_v35 }
 0x331   : > { %1623 = vmatpush.msra.mxu2 %v4980_v26  ;;  %v1109_v26 = vld [vmem:[%s7271_s2 + $0x398] sm:$0xff] }
 0x333   : > { %1624 = vmatpush.msra.mxu2 %v4968_v21  ;;  %v998_v21 = vld [vmem:[%s7271_s2 + $0x20] sm:$0xff] }
 0x334   : > { %v946_v47 = vpop.f32.mrf.mxu0  ;;  %1582 = vmatmul.f32.gmra.mxu1 %v1102_v53  ;;  %v1130_v53 = vld [vmem:[%s7271_s2 + $0x440] sm:$0xff] }
 0x335   : > { %1625 = vmatpush.msra.mxu2 %v4952_v42  ;;  %v5119_v42 = vpop.f32.mrf.mxu3 }
 0x337   : > { %1626 = vmatpush.msra.mxu2 %v4936_v6  ;;  %v5121_v6 = vpop.f32.mrf.mxu2 }
 0x338   : > { %7296 = vst [vmem:[#allocation19_spill] sm:$0xff] %v5121_v6 }
 0x339   : > { %v5109_v35 = vpop.f32.mrf.mxu1  ;;  %1627 = vmatpush.msra.mxu2 %v4923_v10  ;;  %v1116_v10 = vld [vmem:[%s7271_s2 + $0x3d0] sm:$0xff] }
 0x33b   : > { %1628 = vmatpush.msra.mxu2 %v4913_v7 }
 0x33c   : > { %v949_v44 = vpop.f32.mrf.mxu0  ;;  %1585 = vmatmul.f32.gmra.mxu1 %v1109_v26  ;;  %1629 = vmatmul.f32.vlgmr.msra.gmra.mxu2 %v998_v21  ;;  %v1019_v26 = vld [vmem:[%s7271_s2 + $0xc8] sm:$0xff] }
 0x33d   : > { %v5131_v7 = vpop.f32.mrf.mxu3 }
 0x33f   : > { %v5141_v31 = vpop.f32.mrf.mxu2 }
 0x340   : > { %7297 = vst [vmem:[#allocation20_spill] sm:$0xff] %v5141_v31  ;;  %v1358_v31 = vadd.f32 %v5002_v36, %v4786_v61  ;;  %v1361_v61 = vadd.f32 %v5014_v48, %v4803_v4 }
 0x341   : > { %v5123_v15 = vpop.f32.mrf.mxu1 }
 0x344   : > { %v952_v40 = vpop.f32.mrf.mxu0  ;;  %1588 = vmatmul.f32.gmra.mxu1 %v1116_v10  ;;  %1632 = vmatmul.f32.gmra.mxu2 %v1005_v45 }
 0x345   : > { %v5143_v39 = vpop.f32.mrf.mxu3 }
 0x347   : > { %v5153_v21 = vpop.f32.mrf.mxu2 }
 0x348   : > { %7298 = vst [vmem:[#allocation21_spill] sm:$0xff] %v5153_v21  ;;  %v1098_v21 = vld [vmem:[%s7271_s2 + $0x340] sm:$0xff] }
 0x349   : > { %v5133_v16 = vpop.f32.mrf.mxu1 }
 0x34c   : > { %v955_v37 = vpop.f32.mrf.mxu0  ;;  %1591 = vmatmul.f32.gmra.mxu1 %v1123_v19  ;;  %1635 = vmatmul.f32.gmra.mxu2 %v1012_v22  ;;  %v1137_v19 = vld [vmem:[%s7271_s2 + $0x478] sm:$0xff]  ;;  %v1026_v22 = vld [vmem:[%s7271_s2 + $0x100] sm:$0xff] }
 0x34d   : > { %v5163_v55 = vpop.f32.mrf.mxu3 }
 0x34e   : > { %7299 = vst [vmem:[#allocation22_spill] sm:$0xff] %v5163_v55 }
 0x351   : > { %v5145_v59 = vpop.f32.mrf.mxu1 }
 0x354   : > { %v958_v10 = vpop.f32.mrf.mxu0  ;;  %1594 = vmatmul.f32.gmra.mxu1 %v1130_v53  ;;  %1638 = vmatmul.f32.gmra.mxu2 %v1019_v26  ;;  %v5165_v53 = vpop.f32.mrf.mxu2  ;;  %v1144_v26 = vld [vmem:[%s7271_s2 + $0x4b0] sm:$0xff] }
 0x355   : > { %1714 = vmatpush.msra.mxu3 %v958_v10  ;;  %7300 = vst [vmem:[#allocation23_spill] sm:$0xff] %v5165_v53 }
 0x357   : > { %1715 = vmatpush.msra.mxu3 %v955_v37 }
 0x359   : > { %v5155_v45 = vpop.f32.mrf.mxu1  ;;  %1716 = vmatpush.msra.mxu3 %v952_v40  ;;  %v999_v40 = vld [vmem:[%s7271_s2 + $0x28] sm:$0xff] }
 0x35b   : > { %1717 = vmatpush.msra.mxu3 %v949_v44  ;;  %v1033_v44 = vld [vmem:[%s7271_s2 + $0x138] sm:$0xff] }
 0x35c   : > { %1597 = vmatmul.f32.gmra.mxu1 %v1137_v19  ;;  %1641 = vmatmul.f32.gmra.mxu2 %v1026_v22  ;;  %v5184_v10 = vpop.f32.mrf.mxu2  ;;  %v1151_v19 = vld [vmem:[%s7271_s2 + $0x4e8] sm:$0xff]  ;;  %v1040_v22 = vld [vmem:[%s7271_s2 + $0x170] sm:$0xff] }
 0x35d   : > { %1718 = vmatpush.msra.mxu3 %v946_v47  ;;  %v1006_v47 = vld [vmem:[%s7271_s2 + $0x60] sm:$0xff]  ;;  %7302 = vst [vmem:[#allocation25_spill] sm:$0xff] %v5184_v10  ;;  %v1021_v10 = vld [vmem:[%s7271_s2 + $0xd8] sm:$0xff] }
 0x35f   : > { %1719 = vmatpush.msra.mxu3 %v943_v63  ;;  %v5179_v63 = vpop.f32.mrf.mxu3 }
 0x360   : > { %7301 = vst [vmem:[#allocation24_spill] sm:$0xff] %v5179_v63  ;;  %v1112_v63 = vld [vmem:[%s7271_s2 + $0x3b0] sm:$0xff] }
 0x361   : > { %v5170_v37 = vpop.f32.mrf.mxu1  ;;  %1720 = vmatpush.msra.mxu3 %v5083_v30 }
 0x362   : > { %1721 = vmatmul.f32.vlgmr.msra.gmra.mxu3 %v999_v40 }
 0x363   : > { %2925 = vmatpush.msrb.mxu3 %v2788_v57  ;;  %v1539_v57 = vadd.f32 %v5109_v35, %v4958_v17  ;;  %v1153_v17 = vld [vmem:[%s7271_s2 + $0x4f8] sm:$0xff] }
 0x364   : > { %1600 = vmatmul.f32.gmra.mxu1 %v1144_v26  ;;  %1644 = vmatmul.f32.gmra.mxu2 %v1033_v44  ;;  %v1013_v26 = vld [vmem:[%s7271_s2 + $0x98] sm:$0xff]  ;;  %v5207_v54 = vpop.f32.mrf.mxu2 }
 0x365   : > { %7304 = vst [vmem:[#allocation27_spill] sm:$0xff] %v5207_v54  ;;  %v1068_v54 = vld [vmem:[%s7271_s2 + $0x250] sm:$0xff] }
 0x367   : > { %v5194_v40 = vpop.f32.mrf.mxu3 }
 0x368   : > { %7303 = vst [vmem:[#allocation26_spill] sm:$0xff] %v5194_v40 }
 0x369   : > { %v5186_v30 = vpop.f32.mrf.mxu1 }
 0x36a   : > { %1724 = vmatmul.f32.gmra.mxu3 %v1006_v47  ;;  %v1020_v47 = vld [vmem:[%s7271_s2 + $0xd0] sm:$0xff] }
 0x36c   : > { %1603 = vmatmul.f32.gmra.mxu1 %v1151_v19  ;;  %1647 = vmatmul.f32.gmra.mxu2 %v1040_v22 }
 0x36f   : > { %v5212_v19 = vpop.f32.mrf.mxu3 }
 0x370   : > { %7305 = vst [vmem:[#allocation28_spill] sm:$0xff] %v5212_v19  ;;  %v1035_v19 = vld [vmem:[%s7271_s2 + $0x148] sm:$0xff] }
 0x371   : > { %v5199_v44 = vpop.f32.mrf.mxu1 }
 0x372   : > { %1727 = vmatmul.f32.gmra.mxu3 %v1013_v26  ;;  %v5222_v26 = vpop.f32.mrf.mxu2 }
 0x373   : > { %7306 = vst [vmem:[#allocation29_spill] sm:$0xff] %v5222_v26 }
 0x374   : > { %1606 = vmatmul.f32.gmra.mxu1 %v1158_v49  ;;  %1650 = vmatmul.f32.gmra.mxu2 %v1047_v32  ;;  %v1027_v32 = vld [vmem:[%s7271_s2 + $0x108] sm:$0xff] }
 0x379   : > { %v5214_v22 = vpop.f32.mrf.mxu1 }
 0x37a   : > { %1730 = vmatmul.f32.gmra.mxu3 %v1020_v47  ;;  %v5235_v47 = vpop.f32.mrf.mxu3 }
 0x37b   : > { %7307 = vst [vmem:[#allocation30_spill] sm:$0xff] %v5235_v47  ;;  %v1075_v47 = vld [vmem:[%s7271_s2 + $0x288] sm:$0xff] }
 0x37c   : > { %1609 = vmatmul.f32.gmra.mxu1 %v1165_v50  ;;  %1653 = vmatmul.f32.gmra.mxu2 %v1054_v12  ;;  %v5238_v12 = vpop.f32.mrf.mxu2  ;;  %v1034_v50 = vld [vmem:[%s7271_s2 + $0x140] sm:$0xff] }
 0x37d   : > { %7308 = vst [vmem:[#allocation31_spill] sm:$0xff] %v5238_v12 }
 0x381   : > { %v5227_v49 = vpop.f32.mrf.mxu1 }
 0x382   : > { %1733 = vmatmul.f32.gmra.mxu3 %v1027_v32  ;;  %v1007_v32 = vld [vmem:[%s7271_s2 + $0x68] sm:$0xff] }
 0x384   : > { %1656 = vmatmul.f32.gmra.mxu2 %v1061_v62  ;;  %3710 = vmatmul.msk.f32.vlgmr.msra.gmra.mxu1 %vm1169_vm2, %v1000_v52  ;;  %v5252_v52 = vpop.f32.mrf.mxu3  ;;  %v1041_v62 = vld [vmem:[%s7271_s2 + $0x178] sm:$0xff]  ;;  %v5257_v12 = vpop.f32.mrf.mxu2 }
 0x385   : > { %7309 = vst [vmem:[#allocation32_spill] sm:$0xff] %v5252_v52  ;;  %v1082_v52 = vld [vmem:[%s7271_s2 + $0x2c0] sm:$0xff] }
 0x386   : > { %7310 = vst [vmem:[#allocation33_spill] sm:$0xff] %v5257_v12 }
 0x389   : > { %v5243_v26 = vpop.f32.mrf.mxu1 }
 0x38a   : > { %1736 = vmatmul.f32.gmra.mxu3 %v1034_v50 }
 0x38c   : > { %1659 = vmatmul.f32.gmra.mxu2 %v1068_v54  ;;  %3711 = vmatmul.msk.f32.gmra.mxu1 %vm1169_vm2, %v1007_v32  ;;  %v1014_v54 = vld [vmem:[%s7271_s2 + $0xa0] sm:$0xff]  ;;  %v5268_v50 = vpop.f32.mrf.mxu3  ;;  %v1048_v32 = vld [vmem:[%s7271_s2 + $0x1b0] sm:$0xff] }
 0x38d   : > { %7312 = vst [vmem:[#allocation35_spill] sm:$0xff] %v5268_v50 }
 0x391   : > { %v5259_v33 = vpop.f32.mrf.mxu1 }
 0x392   : > { %7311 = vst [vmem:[#allocation34_spill] sm:$0xff] %v5259_v33  ;;  %1739 = vmatmul.f32.gmra.mxu3 %v1041_v62  ;;  %v5281_v62 = vpop.f32.mrf.mxu2  ;;  %v1146_v33 = vld [vmem:[%s7271_s2 + $0x4c0] sm:$0xff] }
 0x393   : > { %7314 = vst [vmem:[#allocation37_spill] sm:$0xff] %v5281_v62  ;;  %v1028_v62 = vld [vmem:[%s7271_s2 + $0x110] sm:$0xff] }
 0x394   : > { %1662 = vmatmul.f32.gmra.mxu2 %v1075_v47  ;;  %3712 = vmatmul.msk.f32.gmra.mxu1 %vm1169_vm2, %v1014_v54  ;;  %v1055_v47 = vld [vmem:[%s7271_s2 + $0x1e8] sm:$0xff]  ;;  %v5287_v54 = vpop.f32.mrf.mxu3 }
 0x395   : > { %7315 = vst [vmem:[#allocation38_spill] sm:$0xff] %v5287_v54  ;;  %v1096_v54 = vld [vmem:[%s7271_s2 + $0x330] sm:$0xff] }
 0x399   : > { %v5273_v12 = vpop.f32.mrf.mxu1 }
 0x39a   : > { %7313 = vst [vmem:[#allocation36_spill] sm:$0xff] %v5273_v12  ;;  %1742 = vmatmul.f32.gmra.mxu3 %v1048_v32  ;;  %v1105_v12 = vld [vmem:[%s7271_s2 + $0x378] sm:$0xff] }
 0x39c   : > { %1665 = vmatmul.f32.gmra.mxu2 %v1082_v52  ;;  %3713 = vmatmul.msk.f32.gmra.mxu1 %vm1169_vm2, %v1021_v10  ;;  %v5297_v52 = vpop.f32.mrf.mxu2  ;;  %v1062_v10 = vld [vmem:[%s7271_s2 + $0x220] sm:$0xff] }
 0x39d   : > { %7317 = vst [vmem:[#allocation40_spill] sm:$0xff] %v5297_v52 }
 0x3a1   : > { %v5289_v50 = vpop.f32.mrf.mxu1 }
 0x3a2   : > { %7316 = vst [vmem:[#allocation39_spill] sm:$0xff] %v5289_v50  ;;  %1745 = vmatmul.f32.gmra.mxu3 %v1055_v47  ;;  %v5311_v47 = vpop.f32.mrf.mxu3  ;;  %v1152_v50 = vld [vmem:[%s7271_s2 + $0x4f0] sm:$0xff] }
 0x3a3   : > { %7319 = vst [vmem:[#allocation42_spill] sm:$0xff] %v5311_v47 }
 0x3a4   : > { %1668 = vmatmul.f32.gmra.mxu2 %v1089_v38  ;;  %3714 = vmatmul.msk.f32.gmra.mxu1 %vm1169_vm2, %v1028_v62  ;;  %v5314_v38 = vpop.f32.mrf.mxu2  ;;  %v1069_v62 = vld [vmem:[%s7271_s2 + $0x258] sm:$0xff] }
 0x3a5   : > { %7320 = vst [vmem:[#allocation43_spill] sm:$0xff] %v5314_v38 }
 0x3a9   : > { %v5303_v32 = vpop.f32.mrf.mxu1 }
 0x3aa   : > { %7318 = vst [vmem:[#allocation41_spill] sm:$0xff] %v5303_v32  ;;  %1748 = vmatmul.f32.gmra.mxu3 %v1062_v10  ;;  %v1103_v32 = vld [vmem:[%s7271_s2 + $0x368] sm:$0xff]  ;;  %v1042_v10 = vld [vmem:[%s7271_s2 + $0x180] sm:$0xff] }
 0x3ac   : > { %1671 = vmatmul.f32.gmra.mxu2 %v1096_v54  ;;  %3715 = vmatmul.msk.f32.gmra.mxu1 %vm1169_vm2, %v1035_v19  ;;  %v5328_v19 = vpop.f32.mrf.mxu3  ;;  %v1076_v54 = vld [vmem:[%s7271_s2 + $0x290] sm:$0xff]  ;;  %v5333_v38 = vpop.f32.mrf.mxu2 }
 0x3ad   : > { %7322 = vst [vmem:[#allocation45_spill] sm:$0xff] %v5328_v19  ;;  %v1117_v19 = vld [vmem:[%s7271_s2 + $0x3d8] sm:$0xff] }
 0x3ae   : > { %7323 = vst [vmem:[#allocation46_spill] sm:$0xff] %v5333_v38 }
 0x3b1   : > { %v5319_v52 = vpop.f32.mrf.mxu1 }
 0x3b2   : > { %7321 = vst [vmem:[#allocation44_spill] sm:$0xff] %v5319_v52  ;;  %1751 = vmatmul.f32.gmra.mxu3 %v1069_v62  ;;  %v1110_v52 = vld [vmem:[%s7271_s2 + $0x3a0] sm:$0xff] }
 0x3b4   : > { %1674 = vmatmul.f32.gmra.mxu2 %v1103_v32  ;;  %3716 = vmatmul.msk.f32.gmra.mxu1 %vm1169_vm2, %v1042_v10  ;;  %v1049_v32 = vld [vmem:[%s7271_s2 + $0x1b8] sm:$0xff]  ;;  %v5344_v62 = vpop.f32.mrf.mxu3  ;;  %v1083_v10 = vld [vmem:[%s7271_s2 + $0x2c8] sm:$0xff] }
 0x3b5   : > { %7325 = vst [vmem:[#allocation48_spill] sm:$0xff] %v5344_v62 }
 0x3b9   : > { %v5335_v47 = vpop.f32.mrf.mxu1 }
 0x3ba   : > { %7324 = vst [vmem:[#allocation47_spill] sm:$0xff] %v5335_v47  ;;  %1754 = vmatmul.f32.gmra.mxu3 %v1076_v54  ;;  %v1056_v47 = vld [vmem:[%s7271_s2 + $0x1f0] sm:$0xff]  ;;  %v5357_v54 = vpop.f32.mrf.mxu2 }
 0x3bb   : > { %7327 = vst [vmem:[#allocation50_spill] sm:$0xff] %v5357_v54  ;;  %v1063_v54 = vld [vmem:[%s7271_s2 + $0x228] sm:$0xff] }
 0x3bc   : > { %1677 = vmatmul.f32.gmra.mxu2 %v1110_v52  ;;  %3717 = vmatmul.msk.f32.gmra.mxu1 %vm1169_vm2, %v1049_v32  ;;  %v1090_v52 = vld [vmem:[%s7271_s2 + $0x300] sm:$0xff]  ;;  %v5363_v32 = vpop.f32.mrf.mxu3 }
 0x3bd   : > { %7328 = vst [vmem:[#allocation51_spill] sm:$0xff] %v5363_v32  ;;  %v1131_v32 = vld [vmem:[%s7271_s2 + $0x448] sm:$0xff] }
 0x3c1   : > { %v5349_v38 = vpop.f32.mrf.mxu1 }
 0x3c2   : > { %7326 = vst [vmem:[#allocation49_spill] sm:$0xff] %v5349_v38  ;;  %1757 = vmatmul.f32.gmra.mxu3 %v1083_v10  ;;  %v1124_v38 = vld [vmem:[%s7271_s2 + $0x410] sm:$0xff]  ;;  %v5373_v10 = vpop.f32.mrf.mxu2 }
 0x3c3   : > { %v1631_v48 = vadd.f32 %v5373_v10, %v1539_v57  ;;  %v1126_v10 = vld [vmem:[%s7271_s2 + $0x420] sm:$0xff]  ;;  %v1133_v57 = vld [vmem:[%s7271_s2 + $0x458] sm:$0xff] }
 0x3c4   : > { %1680 = vmatmul.f32.gmra.mxu2 %v1117_v19  ;;  %3718 = vmatmul.msk.f32.gmra.mxu1 %vm1169_vm2, %v1056_v47  ;;  %v1097_v47 = vld [vmem:[%s7271_s2 + $0x338] sm:$0xff]  ;;  %v5387_v53 = vpop.f32.mrf.mxu3 }
 0x3c5   : > { %7331 = vst [vmem:[#allocation54_spill] sm:$0xff] %v5387_v53  ;;  %v1111_v53 = vld [vmem:[%s7271_s2 + $0x3a8] sm:$0xff] }
 0x3c9   : > { %v5365_v62 = vpop.f32.mrf.mxu1 }
 0x3ca   : > { %7329 = vst [vmem:[#allocation52_spill] sm:$0xff] %v5365_v62  ;;  %1760 = vmatmul.f32.gmra.mxu3 %v1090_v52  ;;  %v1070_v62 = vld [vmem:[%s7271_s2 + $0x260] sm:$0xff] }
 0x3cc   : > { %1683 = vmatmul.f32.gmra.mxu2 %v1124_v38  ;;  %3719 = vmatmul.msk.f32.gmra.mxu1 %vm1169_vm2, %v1063_v54  ;;  %v5389_v38 = vpop.f32.mrf.mxu2  ;;  %v1104_v54 = vld [vmem:[%s7271_s2 + $0x370] sm:$0xff] }
 0x3d1   : > { %v5379_v19 = vpop.f32.mrf.mxu1 }
 0x3d2   : > { %7330 = vst [vmem:[#allocation53_spill] sm:$0xff] %v5379_v19  ;;  %1763 = vmatmul.f32.gmra.mxu3 %v1097_v47  ;;  %v1138_v19 = vld [vmem:[%s7271_s2 + $0x480] sm:$0xff]  ;;  %v1077_v47 = vld [vmem:[%s7271_s2 + $0x298] sm:$0xff] }
 0x3d4   : > { %1686 = vmatmul.f32.gmra.mxu2 %v1131_v32  ;;  %3720 = vmatmul.msk.f32.gmra.mxu1 %vm1169_vm2, %v1070_v62  ;;  %v5404_v32 = vpop.f32.mrf.mxu3  ;;  %v5406_v62 = vpop.f32.mrf.mxu2 }
 0x3d5   : > { %7333 = vst [vmem:[#allocation56_spill] sm:$0xff] %v5404_v32 }
 0x3d9   : > { %v5395_v52 = vpop.f32.mrf.mxu1 }
 0x3da   : > { %7332 = vst [vmem:[#allocation55_spill] sm:$0xff] %v5395_v52  ;;  %1766 = vmatmul.f32.gmra.mxu3 %v1104_v54 }
 0x3dc   : > { %1689 = vmatmul.f32.gmra.mxu2 %v1138_v19  ;;  %3721 = vmatmul.msk.f32.gmra.mxu1 %vm1169_vm2, %v1077_v47  ;;  %v1084_v19 = vld [vmem:[%s7271_s2 + $0x2d0] sm:$0xff]  ;;  %v1118_v47 = vld [vmem:[%s7271_s2 + $0x3e0] sm:$0xff]  ;;  %v5423_v32 = vpop.f32.mrf.mxu2 }
 0x3e1   : > { %v5411_v52 = vpop.f32.mrf.mxu1 }
 0x3e2   : > { %7334 = vst [vmem:[#allocation57_spill] sm:$0xff] %v5411_v52  ;;  %1769 = vmatmul.f32.gmra.mxu3 %v1111_v53  ;;  %v1091_v53 = vld [vmem:[%s7271_s2 + $0x308] sm:$0xff] }
 0x3e4   : > { %1692 = vmatmul.f32.gmra.mxu2 %v1145_v24  ;;  %3722 = vmatmul.msk.f32.gmra.mxu1 %vm1169_vm2, %v1084_v19  ;;  %v1125_v19 = vld [vmem:[%s7271_s2 + $0x418] sm:$0xff]  ;;  %v5445_v20 = vpop.f32.mrf.mxu2 }
 0x3e5   : > { %v1722_v54 = vpop.f32.mrf.mxu3 }
 0x3e9   : > { %v5425_v52 = vpop.f32.mrf.mxu1 }
 0x3ea   : > { %7335 = vst [vmem:[#allocation58_spill] sm:$0xff] %v5425_v52  ;;  %1772 = vmatmul.f32.gmra.mxu3 %v1118_v47  ;;  %v1159_v52 = vld [vmem:[%s7271_s2 + $0x528] sm:$0xff]  ;;  %v1132_v47 = vld [vmem:[%s7271_s2 + $0x450] sm:$0xff] }
 0x3ec   : > { %1695 = vmatmul.f32.gmra.mxu2 %v1152_v50  ;;  %3723 = vmatmul.msk.f32.gmra.mxu1 %vm1169_vm2, %v1091_v53 }
 0x3ed   : > { %v1725_v24 = vpop.f32.mrf.mxu3 }
 0x3f1   : > { %v5437_v40 = vpop.f32.mrf.mxu1 }
 0x3f2   : > { %7336 = vst [vmem:[#allocation59_spill] sm:$0xff] %v5437_v40  ;;  %1775 = vmatmul.f32.gmra.mxu3 %v1125_v19  ;;  %v1166_v40 = vld [vmem:[%s7271_s2 + $0x560] sm:$0xf]  ;;  %v5459_v19 = vpop.f32.mrf.mxu2 }
 0x3f4   : > { %1698 = vmatmul.f32.gmra.mxu2 %v1159_v52  ;;  %3724 = vmatmul.msk.f32.gmra.mxu1 %vm1169_vm2, %v1098_v21  ;;  %v1139_v52 = vld [vmem:[%s7271_s2 + $0x488] sm:$0xff] }
 0x3f5   : > { %v1728_v50 = vpop.f32.mrf.mxu3 }
 0x3f9   : > { %v5451_v53 = vpop.f32.mrf.mxu1 }
 0x3fa   : > { %7337 = vst [vmem:[#allocation60_spill] sm:$0xff] %v5451_v53  ;;  %1778 = vmatmul.f32.gmra.mxu3 %v1132_v47 }
 0x3fc   : > { %1701 = vmatmul.f32.gmra.mxu2 %v1166_v40  ;;  %3725 = vmatmul.msk.f32.gmra.mxu1 %vm1169_vm2, %v1105_v12  ;;  %v1450_v40 = vadd.f32 %v5034_v3, %v1358_v31  ;;  %v5474_v12 = vpop.f32.mrf.mxu2  ;;  %v2787_v3 = vld [vmem:[%s7272_s3 + $0x80] sm:$0xff] }
 0x3fd   : > { %v1731_v21 = vpop.f32.mrf.mxu3  ;;  %2926 = vmatpush.msrb.mxu3 %v2787_v3  ;;  %v1723_v3 = vadd.f32 %v1722_v54, %v1631_v48 }
 0x3fe   : > { %v1542_v36 = vadd.f32 %v5123_v15, %v1450_v40 }
 0x400   : > { %v1634_v55 = vadd.f32 %v5389_v38, %v1542_v36  ;;  %v1160_v36 = vld [vmem:[%s7271_s2 + $0x530] sm:$0xff] }
 0x401   : > { %v1814_v53 = vpop.f32.mrf.mxu1 }
 0x402   : > { %1781 = vmatmul.f32.gmra.mxu3 %v1139_v52  ;;  %v1453_v52 = vadd.f32 %v5046_v13, %v1361_v61  ;;  %v1726_v15 = vadd.f32 %v1725_v24, %v1634_v55  ;;  %v5510_v55 = vadd.f32 %v1814_v53, %v1723_v3  ;;  %v1367_v61 = vadd.f32 %v5042_v8, %v4835_v18 }
 0x404   : > { %3726 = vmatmul.msk.f32.gmra.mxu1 %vm1169_vm2, %v1112_v63  ;;  %v1119_v63 = vld [vmem:[%s7271_s2 + $0x3e8] sm:$0xff]  ;;  %v1545_v4 = vadd.f32 %v5133_v16, %v1453_v52  ;;  %v5508_v35 = vpop.f32.mrf.mxu2  ;;  %v1459_v52 = vadd.f32 %v5067_v23, %v1367_v61  ;;  %v2016_v23 = vrot.slane %v5510_v55, 2  ;;  %v1140_v61 = vld [vmem:[%s7271_s2 + $0x490] sm:$0xff] }
 0x405   : > { %v5471_v47 = vpop.f32.mrf.mxu3 }
 0x406   : > { %v1637_v6 = vadd.f32 %v5406_v62, %v1545_v4  ;;  %v1551_v48 = vadd.f32 %v5155_v45, %v1459_v52 }
 0x408   : > { %v1729_v13 = vadd.f32 %v1728_v50, %v1637_v6 }
 0x409   : > { %v1817_v31 = vpop.f32.mrf.mxu1 }
 0x40a   : > { %1784 = vmatmul.f32.gmra.mxu3 %v1146_v33  ;;  %v5501_v14 = vadd.f32 %v1817_v31, %v1726_v15  ;;  %v1364_v33 = vadd.f32 %v5024_v58, %v4820_v11  ;;  %v1911_v58 = vrot.slane %v5510_v55, 1 }
 0x40c   : > { %3727 = vmatmul.msk.f32.gmra.mxu1 %vm1169_vm2, %v1119_v63  ;;  %v1456_v38 = vadd.f32 %v5058_v34, %v1364_v33  ;;  %v1912_v54 = vrot.slane %v5501_v14, 1  ;;  %v5541_v4 = vpop.f32.mrf.mxu2  ;;  %v2123_v3 = vrot.slane %v5501_v14, 6 }
 0x40d   : > { %v5498_v40 = vpop.f32.mrf.mxu3 }
 0x40e   : > { %v1548_v11 = vadd.f32 %v5145_v59, %v1456_v38  ;;  %v1913_v34 = vsel %vm1910_vm3, %v1911_v58, %v1912_v54  ;;  %v1167_v58 = vld [vmem:[%s7271_s2 + $0x568] sm:$0xf] }
 0x410   : > { %v1640_v50 = vadd.f32 %v5423_v32, %v1548_v11 }
 0x411   : > { %v1820_v16 = vpop.f32.mrf.mxu1 }
 0x412   : > { %v5516_v62 = vadd.f32 %v1820_v16, %v1729_v13  ;;  %1787 = vmatmul.f32.gmra.mxu3 %v1153_v17  ;;  %v1732_v31 = vadd.f32 %v1731_v21, %v1640_v50  ;;  %v2017_v21 = vrot.slane %v5501_v14, 2  ;;  %v1643_v16 = vadd.f32 %v5445_v20, %v1551_v48 }
 0x413   : > { %v1370_v50 = vadd.f32 %v5051_v0, %v4850_v25 }
 0x414   : > { %3728 = vmatmul.msk.f32.gmra.mxu1 %vm1169_vm2, %v1126_v10  ;;  %v1914_v6 = vrot.slane %v5516_v62, 1  ;;  %v2019_v63 = vrot.slane %v5516_v62, 2  ;;  %v2124_v8 = vrot.slane %v5516_v62, 6  ;;  %v2018_v38 = vsel %vm2015_vm5, %v2016_v23, %v2017_v21 }
 0x415   : > { %v5523_v24 = vpop.f32.mrf.mxu3  ;;  %v1735_v20 = vadd.f32 %v5471_v47, %v1643_v16  ;;  %v2231_v0 = vrot.slane %v5516_v62, 7 }
 0x416   : > { %v1915_v53 = vsel %vm1910_vm3, %v1912_v54, %v1914_v6  ;;  %v2020_v33 = vsel %vm2015_vm5, %v2017_v21, %v2019_v63  ;;  %v2125_v45 = vsel %vm2122_vm4, %v2123_v3, %v2124_v8 }
 0x417   : > { %v3834_v59 = vpack.i.bf16 %v1915_v53, %v1913_v34  ;;  %v3839_v11 = vpack.i.bf16 %v2020_v33, %v2018_v38  ;;  %v1373_v33 = vadd.f32 %v5060_v28, %v4863_v41 }
 0x419   : > { %v1823_v32 = vpop.f32.mrf.mxu1  ;;  %3835 = vrot.lane.b32.xlu0 %v3834_v59, %s4298_s8  ;;  %v1462_v59 = vadd.f32 %v5076_v43, %v1370_v50  ;;  %v1465_v38 = vadd.f32 %v5087_v51, %v1373_v33 }
 0x41a   : > { %v5543_v18 = vadd.f32 %v1823_v32, %v1732_v31  ;;  %1790 = vmatmul.f32.gmra.mxu3 %v1160_v36  ;;  %v5580_v31 = vpop.f32.mrf.mxu2  ;;  %v2230_v32 = vrot.slane %v5501_v14, 7 }
 0x41b   : > { %v1554_v47 = vadd.f32 %v5170_v37, %v1462_v59 }
 0x41c   : > { %3729 = vmatmul.msk.f32.gmra.mxu1 %vm1169_vm2, %v1133_v57  ;;  %v3844_v15 = vpack.i.bf16 %v5543_v18, %v5516_v62  ;;  %v2126_v17 = vrot.slane %v5543_v18, 6  ;;  %v2233_v34 = vrot.slane %v5543_v18, 7  ;;  %v2021_v25 = vrot.slane %v5543_v18, 2 }
 0x41d   : > { %v5555_v13 = vpop.f32.mrf.mxu3  ;;  %v1646_v21 = vadd.f32 %v5459_v19, %v1554_v47  ;;  %v2232_v23 = vsel %vm2229_vm6, %v2230_v32, %v2231_v0  ;;  %v1916_v28 = vrot.slane %v5543_v18, 1 }
 0x41e   : > { %3845 = vrot.lane.b32.xlu2 %v3844_v15, %s4299_s14  ;;  %v2127_v10 = vsel %vm2122_vm4, %v2124_v8, %v2126_v17  ;;  %v2234_v43 = vsel %vm2229_vm6, %v2231_v0, %v2233_v34  ;;  %v2022_v37 = vsel %vm2015_vm5, %v2019_v63, %v2021_v25  ;;  %v1147_v63 = vld [vmem:[%s7271_s2 + $0x4c8] sm:$0xff] }
 0x41f   : > { %v3849_v54 = vpack.i.bf16 %v2127_v10, %v2125_v45  ;;  %v3854_v3 = vpack.i.bf16 %v2234_v43, %v2232_v23  ;;  %v1738_v16 = vadd.f32 %v5498_v40, %v1646_v21 }
 0x421   : > { %v1826_v53 = vpop.f32.mrf.mxu1  ;;  %3850 = vrot.lane.b32.xlu1 %v3849_v54, %s4300_s17  ;;  %3840 = vrot.lane.b32.xlu0 %v3839_v11, %s4301_s18  ;;  %v1557_v54 = vadd.f32 %v5186_v30, %v1465_v38  ;;  %v2508_v11 = vrot.slane %v5543_v18, 5  ;;  %v1917_v30 = vsel %vm1910_vm3, %v1914_v6, %v1916_v28 }
 0x422   : > { %v5575_v36 = vadd.f32 %v1826_v53, %v1735_v20  ;;  %1793 = vmatmul.f32.gmra.mxu3 %v1167_v58  ;;  %v5627_v53 = vpop.f32.mrf.mxu2 }
 0x423   : > { %v1649_v20 = vadd.f32 %v5474_v12, %v1557_v54  ;;  %v1376_v12 = vadd.f32 %v5069_v29, %v4876_v46 }
 0x424   : > { %3730 = vmatmul.msk.f32.gmra.mxu1 %vm1169_vm2, %v1140_v61  ;;  %v2023_v52 = vrot.slane %v5575_v36, 2  ;;  %v2128_v8 = vrot.slane %v5575_v36, 6  ;;  %v1918_v45 = vrot.slane %v5575_v36, 1  ;;  %v2509_v40 = vrot.slane %v5575_v36, 5 }
 0x425   : > { %v5588_v57 = vpop.f32.mrf.mxu3  ;;  %v1741_v32 = vadd.f32 %v5523_v24, %v1649_v20  ;;  %v1468_v23 = vadd.f32 %v5102_v2, %v1376_v12  ;;  %v2403_v29 = vrot.slane %v5575_v36, 4  ;;  %v2235_v24 = vrot.slane %v5575_v36, 7 }
 0x426   : > { %v2024_v48 = vsel %vm2015_vm5, %v2021_v25, %v2023_v52  ;;  %v5604_v19 = vsel %vm2122_vm4, %v2126_v17, %v2128_v8  ;;  %v1919_v17 = vsel %vm1910_vm3, %v1916_v28, %v1918_v45  ;;  %v2510_v61 = vsel %vm679_vm0, %v2508_v11, %v2509_v40 }
 0x427   : > { %v3864_v15 = vpack.i.bf16 %v2024_v48, %v2022_v37  ;;  %v3859_v0 = vpack.i.bf16 %v1919_v17, %v1917_v30  ;;  %v1154_v48 = vld [vmem:[%s7271_s2 + $0x500] sm:$0xff] }
 0x429   : > { %v1829_v10 = vpop.f32.mrf.mxu1  ;;  %3865 = vrot.lane.b32.xlu2 %v3864_v15, %s4301_s18  ;;  %3855 = vrot.lane.b32.xlu1 %v3854_v3, %s4302_s20  ;;  %v2402_v15 = vrot.slane %v5543_v18, 4 }
 0x42a   : > { %v5610_v41 = vadd.f32 %v1829_v10, %v1738_v16  ;;  %3735 = vmatmul.msk.f32.vlgmr.msrb.gmra.mxu3 %vm1169_vm2, %v5604_v19  ;;  %v5675_v54 = vpop.f32.mrf.mxu2 }
 0x42c   : > { %3731 = vmatmul.msk.f32.gmra.mxu1 %vm1169_vm2, %v1147_v63  ;;  %v2511_v51 = vrot.slane %v5610_v41, 5  ;;  %v2130_v50 = vrot.slane %v5610_v41, 6  ;;  %v3869_v25 = vpack.i.bf16 %v5610_v41, %v5575_v36  ;;  %v2405_v43 = vrot.slane %v5610_v41, 4 }
 0x42d   : > { %v5623_v58 = vpop.f32.mrf.mxu3  ;;  %v2237_v6 = vrot.slane %v5610_v41, 7  ;;  %v2236_v63 = vsel %vm2229_vm6, %v2233_v34, %v2235_v24 }
 0x42e   : > { %v2512_v59 = vsel %vm679_vm0, %v2509_v40, %v2511_v51  ;;  %v2131_v37 = vsel %vm2122_vm4, %v2128_v8, %v2130_v50  ;;  %v1560_v8 = vadd.f32 %v5199_v44, %v1468_v23  ;;  %v2406_v2 = vsel %vm2401_vm7, %v2403_v29, %v2405_v43 }
 0x42f   : > { %v3879_v47 = vpack.i.bf16 %v2512_v59, %v2510_v61  ;;  %v2238_v3 = vsel %vm2229_vm6, %v2235_v24, %v2237_v6  ;;  %v2404_v44 = vsel %vm2401_vm7, %v2402_v15, %v2403_v29  ;;  %v1379_v40 = vadd.f32 %v5081_v27, %v4891_v56  ;;  %v1161_v56 = vld [vmem:[%s7271_s2 + $0x538] sm:$0xff] }
 0x430   : > { %v1652_v10 = vadd.f32 %v5508_v35, %v1560_v8  ;;  %v3874_v38 = vpack.i.bf16 %v2406_v2, %v2404_v44  ;;  %v3889_v28 = vpack.i.bf16 %v2238_v3, %v2236_v63  ;;  %v3884_v11 = vpack.i.bf16 %v2131_v37, %v5604_v19  ;;  %v1168_v2 = vld [vmem:[%s7271_s2 + $0x570] sm:$0xf] }
 0x431   : > { %v1832_v21 = vpop.f32.mrf.mxu1  ;;  %3870 = vrot.lane.b32.xlu2 %v3869_v25, %s4299_s14  ;;  %3860 = vrot.lane.b32.xlu1 %v3859_v0, %s4298_s8  ;;  %v1920_v19 = vrot.slane %v5610_v41, 1  ;;  %v1382_v24 = vadd.f32 %v5092_v60, %v4903_v1 }
 0x432   : > { %v5650_v46 = vadd.f32 %v1832_v21, %v1741_v32  ;;  %3880 = vrot.lane.b32.xlu0 %v3879_v47, %s4303_s13  ;;  %3736 = vmatmul.msk.f32.gmra.mxu3 %vm1169_vm2, %v2131_v37  ;;  %v1744_v17 = vadd.f32 %v5555_v13, %v1652_v10  ;;  %v1471_v13 = vadd.f32 %v5119_v42, %v1379_v40  ;;  %v5729_v3 = vpop.f32.mrf.mxu2 }
 0x434   : > { %3732 = vmatmul.msk.f32.gmra.mxu1 %vm1169_vm2, %v1154_v48  ;;  %v2132_v16 = vrot.slane %v5650_v46, 6  ;;  %v1922_v20 = vrot.slane %v5650_v46, 1  ;;  %v2027_v27 = vrot.slane %v5650_v46, 2  ;;  %v2513_v61 = vrot.slane %v5650_v46, 5 }
 0x435   : > { %v5665_v33 = vpop.f32.mrf.mxu3  ;;  %v1563_v59 = vadd.f32 %v5214_v22, %v1471_v13  ;;  %v1921_v22 = vsel %vm1910_vm3, %v1918_v45, %v1920_v19  ;;  %v2239_v60 = vrot.slane %v5650_v46, 7 }
 0x436   : > { %v2133_v34 = vsel %vm2122_vm4, %v2130_v50, %v2132_v16  ;;  %v2025_v50 = vrot.slane %v5610_v41, 2  ;;  %v1923_v42 = vsel %vm1910_vm3, %v1920_v19, %v1922_v20  ;;  %v2514_v21 = vsel %vm679_vm0, %v2511_v51, %v2513_v61 }
 0x437   : > { %v1655_v32 = vadd.f32 %v5541_v4, %v1563_v59  ;;  %v3894_v48 = vpack.i.bf16 %v1923_v42, %v1921_v22  ;;  %v2240_v63 = vsel %vm2229_vm6, %v2237_v6, %v2239_v60 }
 0x438   : > { %v2028_v47 = vsel %vm2015_vm5, %v2025_v50, %v2027_v27  ;;  %v2026_v29 = vsel %vm2015_vm5, %v2023_v52, %v2025_v50  ;;  %v1474_v52 = vadd.f32 %v5131_v7, %v1382_v24 }
 0x439   : > { %v1835_v35 = vpop.f32.mrf.mxu1  ;;  %3875 = vrot.lane.b32.xlu2 %v3874_v38, %s4304_s15  ;;  %3890 = vrot.lane.b32.xlu1 %v3889_v28, %s4302_s20  ;;  %v1747_v4 = vadd.f32 %v5588_v57, %v1655_v32  ;;  %v3899_v8 = vpack.i.bf16 %v2028_v47, %v2026_v29 }
 0x43a   : > { %v5688_v30 = vadd.f32 %v1835_v35, %v1744_v17  ;;  %3885 = vrot.lane.b32.xlu0 %v3884_v11, %s4300_s17  ;;  %3737 = vmatmul.msk.f32.gmra.mxu3 %vm1169_vm2, %v2133_v34  ;;  %v1566_v57 = vadd.f32 %v5227_v49, %v1474_v52  ;;  %v1385_v49 = vadd.f32 %v5106_v9, %v4911_v5  ;;  %v5767_v19 = vpop.f32.mrf.mxu2 }
 0x43c   : > { %3733 = vmatmul.msk.f32.gmra.mxu1 %vm1169_vm2, %v1161_v56  ;;  %v2515_v25 = vrot.slane %v5688_v30, 5  ;;  %v2134_v12 = vrot.slane %v5688_v30, 6  ;;  %v2241_v45 = vrot.slane %v5688_v30, 7  ;;  %v1658_v44 = vadd.f32 %v5580_v31, %v1566_v57 }
 0x43d   : > { %v5701_v0 = vpop.f32.mrf.mxu3  ;;  %v3904_v17 = vpack.i.bf16 %v5688_v30, %v5650_v46  ;;  %v2409_v6 = vrot.slane %v5688_v30, 4  ;;  %v2029_v9 = vrot.slane %v5688_v30, 2 }
 0x43e   : > { %v2516_v37 = vsel %vm679_vm0, %v2513_v61, %v2515_v25  ;;  %v2135_v51 = vsel %vm2122_vm4, %v2132_v16, %v2134_v12  ;;  %v2242_v16 = vsel %vm2229_vm6, %v2239_v60, %v2241_v45  ;;  %v1750_v40 = vadd.f32 %v5623_v58, %v1658_v44  ;;  %v7343_v44 = vld [vmem:[#allocation20_spill] sm:$0xff] }
 0x43f   : > { %v3914_v23 = vpack.i.bf16 %v2516_v37, %v2514_v21  ;;  %v3924_v38 = vpack.i.bf16 %v2242_v16, %v2240_v63  ;;  %v3919_v28 = vpack.i.bf16 %v2135_v51, %v2133_v34  ;;  %v1477_v34 = vadd.f32 %v5143_v39, %v1385_v49 }
 0x440   : > { %v2407_v58 = vrot.slane %v5650_v46, 4  ;;  %v2030_v32 = vsel %vm2015_vm5, %v2027_v27, %v2029_v9 }
 0x441   : > { %v1838_v15 = vpop.f32.mrf.mxu1  ;;  %3895 = vrot.lane.b32.xlu2 %v3894_v48, %s4298_s8  ;;  %3915 = vrot.lane.b32.xlu1 %v3914_v23, %s4303_s13  ;;  %v1569_v13 = vadd.f32 %v5243_v26, %v1477_v34  ;;  %v7338_v48 = vld [vmem:[#allocation5_spill] sm:$0xff] }
 0x442   : > { %v5731_v1 = vadd.f32 %v1838_v15, %v1747_v4  ;;  %3900 = vrot.lane.b32.xlu0 %v3899_v8, %s4301_s18  ;;  %3738 = vmatmul.msk.f32.gmra.mxu3 %vm1169_vm2, %v2135_v51  ;;  %v2410_v50 = vsel %vm2401_vm7, %v2407_v58, %v2409_v6  ;;  %v2408_v37 = vsel %vm2401_vm7, %v2405_v43, %v2407_v58  ;;  %v7340_v8 = vld [vmem:[#allocation22_spill] sm:$0xff]  ;;  %v1924_v43 = vrot.slane %v5688_v30, 1  ;;  %v5809_v16 = vpop.f32.mrf.mxu2 }
 0x443   : > { %v1661_v42 = vadd.f32 %v5627_v53, %v1569_v13  ;;  %v7339_v53 = vld [vmem:[#allocation19_spill] sm:$0xff] }
 0x444   : > { %3734 = vmatmul.msk.f32.gmra.mxu1 %vm1169_vm2, %v1168_v2  ;;  %v2136_v7 = vrot.slane %v5731_v1, 6  ;;  %v2031_v11 = vrot.slane %v5731_v1, 2  ;;  %v2517_v5 = vrot.slane %v5731_v1, 5  ;;  %v1388_v23 = vadd.f32 %v7339_v53, %v7338_v48 }
 0x445   : > { %v5741_v10 = vpop.f32.mrf.mxu3  ;;  %v1753_v29 = vadd.f32 %v5665_v33, %v1661_v42  ;;  %v1926_v27 = vrot.slane %v5731_v1, 1  ;;  %v7341_v33 = vld [vmem:[#allocation34_spill] sm:$0xff]  ;;  %v1925_v49 = vsel %vm1910_vm3, %v1922_v20, %v1924_v43  ;;  %v7344_v20 = vld [vmem:[#allocation24_spill] sm:$0xff] }
 0x446   : > { %v2137_v31 = vsel %vm2122_vm4, %v2134_v12, %v2136_v7  ;;  %v2032_v39 = vsel %vm2015_vm5, %v2029_v9, %v2031_v11  ;;  %v2518_v26 = vsel %vm679_vm0, %v2515_v25, %v2517_v5  ;;  %v3909_v25 = vpack.i.bf16 %v2410_v50, %v2408_v37  ;;  %v7345_v42 = vld [vmem:[#allocation36_spill] sm:$0xff] }
 0x447   : > { %v3934_v21 = vpack.i.bf16 %v2032_v39, %v2030_v32  ;;  %v1480_v15 = vadd.f32 %v7340_v8, %v1388_v23  ;;  %v1927_v52 = vsel %vm1910_vm3, %v1924_v43, %v1926_v27  ;;  %v2411_v39 = vrot.slane %v5731_v1, 4 }
 0x448   : > { %v2243_v50 = vrot.slane %v5731_v1, 7 }
 0x449   : > { %v1841_v35 = vpop.f32.mrf.mxu1  ;;  %3925 = vrot.lane.b32.xlu2 %v3924_v38, %s4302_s20  ;;  %3920 = vrot.lane.b32.xlu1 %v3919_v28, %s4300_s17  ;;  %v1572_v2 = vadd.f32 %v7341_v33, %v1480_v15  ;;  %v2412_v48 = vsel %vm2401_vm7, %v2409_v6, %v2411_v39  ;;  %v7348_v33 = vld [vmem:[#allocation26_spill] sm:$0xff] }
 0x44a   : > { %v5759_v56 = vadd.f32 %v1841_v35, %v1750_v40  ;;  %3905 = vrot.lane.b32.xlu0 %v3904_v17, %s4299_s14  ;;  %3739 = vmatmul.msk.f32.gmra.mxu3 %vm1169_vm2, %v2137_v31  ;;  %v3929_v35 = vpack.i.bf16 %v1927_v52, %v1925_v49  ;;  %v5861_v8 = vpop.f32.mrf.mxu2 }
 0x44b   : > { %v1664_v57 = vadd.f32 %v5675_v54, %v1572_v2 }
 0x44c   : > { %v2519_v61 = vrot.slane %v5759_v56, 5  ;;  %v2138_v59 = vrot.slane %v5759_v56, 6  ;;  %v3939_v28 = vpack.i.bf16 %v5759_v56, %v5731_v1  ;;  %v2413_v34 = vrot.slane %v5759_v56, 4 }
 0x44d   : > { %v5778_v47 = vpop.f32.mrf.mxu3  ;;  %v1756_v40 = vadd.f32 %v5701_v0, %v1664_v57  ;;  %v2245_v9 = vrot.slane %v5759_v56, 7  ;;  %v2033_v13 = vrot.slane %v5759_v56, 2 }
 0x44e   : > { %v2520_v12 = vsel %vm679_vm0, %v2517_v5, %v2519_v61  ;;  %v2139_v4 = vsel %vm2122_vm4, %v2136_v7, %v2138_v59  ;;  %v7342_v7 = vld [vmem:[#allocation6_spill] sm:$0xff] }
 0x44f   : > { %v3949_v22 = vpack.i.bf16 %v2520_v12, %v2518_v26  ;;  %v1391_v63 = vadd.f32 %v7343_v44, %v7342_v7  ;;  %v3954_v38 = vpack.i.bf16 %v2139_v4, %v2137_v31  ;;  %v2414_v12 = vsel %vm2401_vm7, %v2411_v39, %v2413_v34  ;;  %v7349_v44 = vld [vmem:[#allocation39_spill] sm:$0xff] }
 0x450   : > { %v2246_v32 = vsel %vm2229_vm6, %v2243_v50, %v2245_v9  ;;  %v2034_v37 = vsel %vm2015_vm5, %v2031_v11, %v2033_v13  ;;  %v3944_v23 = vpack.i.bf16 %v2414_v12, %v2412_v48 }
 0x451   : > { %v1844_v24 = vpop.f32.mrf.mxu1  ;;  %3950 = vrot.lane.b32.xlu2 %v3949_v22, %s4303_s13  ;;  %3935 = vrot.lane.b32.xlu1 %v3934_v21, %s4301_s18  ;;  %v1483_v58 = vadd.f32 %v7344_v20, %v1391_v63  ;;  %v7351_v20 = vld [vmem:[#allocation23_spill] sm:$0xff] }
 0x452   : > { %v5798_v51 = vadd.f32 %v1844_v24, %v1753_v29  ;;  %3910 = vrot.lane.b32.xlu0 %v3909_v25, %s4304_s15  ;;  %3740 = vmatmul.msk.f32.gmra.mxu3 %vm1169_vm2, %v2139_v4  ;;  %v2244_v29 = vsel %vm2229_vm6, %v2241_v45, %v2243_v50  ;;  %v7346_v25 = vld [vmem:[#allocation7_spill] sm:$0xff]  ;;  %v7347_v24 = vld [vmem:[#allocation21_spill] sm:$0xff] }
 0x453   : > { %v1394_v4 = vadd.f32 %v7347_v24, %v7346_v25  ;;  %v3959_v15 = vpack.i.bf16 %v2246_v32, %v2244_v29  ;;  %v7352_v32 = vld [vmem:[#allocation28_spill] sm:$0xff] }
 0x454   : > { %v2140_v60 = vrot.slane %v5798_v51, 6  ;;  %v2035_v54 = vrot.slane %v5798_v51, 2  ;;  %v1930_v11 = vrot.slane %v5798_v51, 1  ;;  %v2521_v7 = vrot.slane %v5798_v51, 5 }
 0x455   : > { %v5819_v17 = vpop.f32.mrf.mxu3  ;;  %v1486_v2 = vadd.f32 %v7348_v33, %v1394_v4  ;;  %v2247_v48 = vrot.slane %v5798_v51, 7 }
 0x456   : > { %v5826_v31 = vsel %vm2122_vm4, %v2138_v59, %v2140_v60  ;;  %v1575_v59 = vadd.f32 %v7345_v42, %v1483_v58  ;;  %v2036_v26 = vsel %vm2015_vm5, %v2033_v13, %v2035_v54  ;;  %v2522_v50 = vsel %vm679_vm0, %v2519_v61, %v2521_v7 }
 0x457   : > { %v3969_v53 = vpack.i.bf16 %v2036_v26, %v2034_v37  ;;  %v5912_v37 = vpop.f32.mrf.mxu2  ;;  %v2248_v33 = vsel %vm2229_vm6, %v2245_v9, %v2247_v48  ;;  %v2782_v9 = vld [vmem:[%s7272_s3 + $0x58] sm:$0xff] }
 0x458   : > { %v1667_v21 = vadd.f32 %v5729_v3, %v1575_v59 }
 0x459   : > { %v1847_v5 = vpop.f32.mrf.mxu1  ;;  %3955 = vrot.lane.b32.xlu2 %v3954_v38, %s4300_s17  ;;  %3940 = vrot.lane.b32.xlu1 %v3939_v28, %s4299_s14 }
 0x45a   : > { %v5830_v0 = vadd.f32 %v1847_v5, %v1756_v40  ;;  %3930 = vrot.lane.b32.xlu0 %v3929_v35, %s4298_s8  ;;  %3741 = vmatmul.msk.f32.gmra.mxu3 %vm1169_vm2, %v5826_v31  ;;  %v1759_v3 = vadd.f32 %v5741_v10, %v1667_v21  ;;  %v1928_v10 = vrot.slane %v5759_v56, 1  ;;  %v2786_v35 = vld [vmem:[%s7272_s3 + $0x78] sm:$0xff] }
 0x45b   : > { %v7350_v5 = vld [vmem:[#allocation8_spill] sm:$0xff]  ;;  %2831 = vmatpush.msrb.mxu2 %v2786_v35 }
 0x45c   : > { %v2142_v22 = vrot.slane %v5830_v0, 6  ;;  %v2523_v45 = vrot.slane %v5830_v0, 5  ;;  %v1931_v63 = vsel %vm1910_vm3, %v1928_v10, %v1930_v11  ;;  %v1929_v40 = vsel %vm1910_vm3, %v1926_v27, %v1928_v10  ;;  %v7354_v10 = vld [vmem:[#allocation9_spill] sm:$0xff] }
 0x45d   : > { %v5872_v52 = vpop.f32.mrf.mxu3  ;;  %v1397_v58 = vadd.f32 %v7351_v20, %v7350_v5  ;;  %v3974_v13 = vpack.i.bf16 %v5830_v0, %v5798_v51  ;;  %v3964_v39 = vpack.i.bf16 %v1931_v63, %v1929_v40  ;;  %v2417_v27 = vrot.slane %v5830_v0, 4 }
 0x45e   : > { %v5868_v6 = vsel %vm2122_vm4, %v2140_v60, %v2142_v22  ;;  %v1578_v60 = vadd.f32 %v7349_v44, %v1486_v2  ;;  %v2524_v38 = vsel %vm679_vm0, %v2521_v7, %v2523_v45  ;;  %v2249_v59 = vrot.slane %v5830_v0, 7  ;;  %v2783_v2 = vld [vmem:[%s7272_s3 + $0x60] sm:$0xff] }
 0x45f   : > { %v3984_v42 = vpack.i.bf16 %v2524_v38, %v2522_v50  ;;  %v1489_v21 = vadd.f32 %v7352_v32, %v1397_v58  ;;  %v7355_v7 = vld [vmem:[#allocation25_spill] sm:$0xff]  ;;  %v3989_v38 = vpack.i.bf16 %v5868_v6, %v5826_v31  ;;  %v7356_v31 = vld [vmem:[#allocation30_spill] sm:$0xff]  ;;  %v1932_v20 = vrot.slane %v5830_v0, 1 }
 0x460   : > { %v1670_v49 = vadd.f32 %v5767_v19, %v1578_v60  ;;  %v2250_v24 = vsel %vm2229_vm6, %v2247_v48, %v2249_v59  ;;  %v1400_v44 = vadd.f32 %v7355_v7, %v7354_v10  ;;  %v7360_v7 = vld [vmem:[#allocation32_spill] sm:$0xff] }
 0x461   : > { %v1850_v43 = vpop.f32.mrf.mxu1  ;;  %3970 = vrot.lane.b32.xlu2 %v3969_v53, %s4301_s18  ;;  %3945 = vrot.lane.b32.xlu1 %v3944_v23, %s4304_s15  ;;  %v7353_v53 = vld [vmem:[#allocation41_spill] sm:$0xff]  ;;  %v3994_v63 = vpack.i.bf16 %v2250_v24, %v2248_v33 }
 0x462   : > { %v5874_v57 = vadd.f32 %v1850_v43, %v1759_v3  ;;  %3960 = vrot.lane.b32.xlu0 %v3959_v15, %s4302_s20  ;;  %3742 = vmatmul.msk.f32.gmra.mxu3 %vm1169_vm2, %v5868_v6  ;;  %v1762_v19 = vadd.f32 %v5778_v47, %v1670_v49  ;;  %v2415_v47 = vrot.slane %v5798_v51, 4  ;;  %v1581_v23 = vadd.f32 %v7353_v53, %v1489_v21  ;;  %v2784_v3 = vld [vmem:[%s7272_s3 + $0x68] sm:$0xff] }
 0x463   : > { %v1492_v6 = vadd.f32 %v7356_v31, %v1400_v44  ;;  %v1933_v53 = vsel %vm1910_vm3, %v1930_v11, %v1932_v20  ;;  %v2779_v11 = vld [vmem:[%s7272_s3 + $0x40] sm:$0xff] }
 0x464   : > { %v2144_v28 = vrot.slane %v5874_v57, 6  ;;  %v2418_v25 = vsel %vm2401_vm7, %v2415_v47, %v2417_v27  ;;  %v1673_v15 = vadd.f32 %v5809_v16, %v1581_v23  ;;  %v2416_v43 = vsel %vm2401_vm7, %v2413_v34, %v2415_v47  ;;  %v2780_v47 = vld [vmem:[%s7272_s3 + $0x48] sm:$0xff] }
 0x465   : > { %v5925_v29 = vpop.f32.mrf.mxu3  ;;  %v3979_v60 = vpack.i.bf16 %v2418_v25, %v2416_v43  ;;  %v1934_v34 = vrot.slane %v5874_v57, 1  ;;  %v2525_v58 = vrot.slane %v5874_v57, 5  ;;  %v7359_v43 = vld [vmem:[#allocation27_spill] sm:$0xff] }
 0x466   : > { %v5909_v12 = vsel %vm2122_vm4, %v2142_v22, %v2144_v28  ;;  %v2785_v22 = vld [vmem:[%s7272_s3 + $0x70] sm:$0xff]  ;;  %v1765_v16 = vadd.f32 %v5819_v17, %v1673_v15  ;;  %v2039_v17 = vrot.slane %v5874_v57, 2 }
 0x467   : > { %2832 = vmatpush.msrb.mxu2 %v2785_v22  ;;  %v2526_v23 = vsel %vm679_vm0, %v2523_v45, %v2525_v58  ;;  %v7358_v15 = vld [vmem:[#allocation10_spill] sm:$0xff] }
 0x469   : > { %v1853_v26 = vpop.f32.mrf.mxu1  ;;  %3975 = vrot.lane.b32.xlu2 %v3974_v13, %s4299_s14  ;;  %3965 = vrot.lane.b32.xlu1 %v3964_v39, %s4298_s8  ;;  %v2037_v13 = vrot.slane %v5830_v0, 2  ;;  %v7357_v39 = vld [vmem:[#allocation44_spill] sm:$0xff] }
 0x46a   : > { %v5914_v61 = vadd.f32 %v1853_v26, %v1762_v19  ;;  %3985 = vrot.lane.b32.xlu0 %v3984_v42, %s4303_s13  ;;  %3743 = vmatmul.msk.f32.gmra.mxu3 %vm1169_vm2, %v5909_v12  ;;  %v1584_v50 = vadd.f32 %v7357_v39, %v1492_v6  ;;  %v5976_v19 = vpop.f32.mrf.mxu2  ;;  %v1935_v42 = vsel %vm1910_vm3, %v1932_v20, %v1934_v34 }
 0x46b   : > { %2833 = vmatpush.msrb.mxu2 %v2784_v3  ;;  %v2040_v32 = vsel %vm2015_vm5, %v2037_v13, %v2039_v17  ;;  %v3999_v25 = vpack.i.bf16 %v1935_v42, %v1933_v53  ;;  %v2038_v3 = vsel %vm2015_vm5, %v2035_v54, %v2037_v13  ;;  %v7363_v13 = vld [vmem:[#allocation29_spill] sm:$0xff] }
 0x46c   : > { %v2146_v4 = vrot.slane %v5914_v61, 6  ;;  %v2527_v49 = vrot.slane %v5914_v61, 5  ;;  %v1676_v48 = vadd.f32 %v5861_v8, %v1584_v50  ;;  %v1403_v8 = vadd.f32 %v7359_v43, %v7358_v15 }
 0x46d   : > { %2834 = vmatpush.msrb.mxu2 %v2783_v2  ;;  %v5992_v22 = vpop.f32.mrf.mxu3  ;;  %v4004_v2 = vpack.i.bf16 %v2040_v32, %v2038_v3  ;;  %v2253_v10 = vrot.slane %v5914_v61, 7  ;;  %v2041_v3 = vrot.slane %v5914_v61, 2  ;;  %v2419_v43 = vrot.slane %v5874_v57, 4 }
 0x46e   : > { %v5960_v35 = vsel %vm2122_vm4, %v2144_v28, %v2146_v4  ;;  %v2781_v28 = vld [vmem:[%s7272_s3 + $0x50] sm:$0xff]  ;;  %v2528_v26 = vsel %vm679_vm0, %v2525_v58, %v2527_v49  ;;  %v1768_v33 = vadd.f32 %v5872_v52, %v1676_v48  ;;  %v1495_v44 = vadd.f32 %v7360_v7, %v1403_v8  ;;  %v7365_v8 = vld [vmem:[#allocation49_spill] sm:$0xff] }
 0x46f   : > { %2835 = vmatpush.msrb.mxu2 %v2782_v9  ;;  %v4019_v24 = vpack.i.bf16 %v2528_v26, %v2526_v23  ;;  %v2251_v52 = vrot.slane %v5874_v57, 7  ;;  %v4024_v42 = vpack.i.bf16 %v5960_v35, %v5909_v12 }
 0x471   : > { %v1856_v40 = vpop.f32.mrf.mxu1  ;;  %3980 = vrot.lane.b32.xlu2 %v3979_v60, %s4304_s15  ;;  %3995 = vrot.lane.b32.xlu1 %v3994_v63, %s4302_s20  ;;  %v2778_v63 = vld [vmem:[%s7272_s3 + $0x38] sm:$0xff]  ;;  %v2254_v9 = vsel %vm2229_vm6, %v2251_v52, %v2253_v10  ;;  %v2252_v58 = vsel %vm2229_vm6, %v2249_v59, %v2251_v52  ;;  %v2776_v59 = vld [vmem:[%s7272_s3 + $0x28] sm:$0xff] }
 0x472   : > { %v5964_v5 = vadd.f32 %v1856_v40, %v1765_v16  ;;  %3990 = vrot.lane.b32.xlu0 %v3989_v38, %s4300_s17  ;;  %3744 = vmatmul.msk.f32.gmra.mxu3 %vm1169_vm2, %v5960_v35  ;;  %v2777_v40 = vld [vmem:[%s7272_s3 + $0x30] sm:$0xff]  ;;  %v6036_v20 = vpop.f32.mrf.mxu2  ;;  %v4029_v50 = vpack.i.bf16 %v2254_v9, %v2252_v58 }
 0x473   : > { %2836 = vmatpush.msrb.mxu2 %v2781_v28  ;;  %v7362_v28 = vld [vmem:[#allocation11_spill] sm:$0xff] }
 0x474   : > { %v2148_v21 = vrot.slane %v5964_v5, 6  ;;  %v1406_v39 = vadd.f32 %v7363_v13, %v7362_v28  ;;  %v2043_v48 = vrot.slane %v5964_v5, 2  ;;  %v7364_v35 = vld [vmem:[#allocation35_spill] sm:$0xff] }
 0x475   : > { %2837 = vmatpush.msrb.mxu2 %v2780_v47  ;;  %v6046_v32 = vpop.f32.mrf.mxu3  ;;  %v7367_v58 = vld [vmem:[#allocation31_spill] sm:$0xff] }
 0x476   : > { %v6013_v54 = vsel %vm2122_vm4, %v2146_v4, %v2148_v21  ;;  %v7361_v4 = vld [vmem:[#allocation47_spill] sm:$0xff]  ;;  %v1498_v23 = vadd.f32 %v7364_v35, %v1406_v39  ;;  %v2772_v35 = vld [vmem:[%s7272_s3 + $0x8] sm:$0xff] }
 0x477   : > { %2838 = vmatpush.msrb.mxu2 %v2779_v11  ;;  %v1587_v38 = vadd.f32 %v7361_v4, %v1495_v44  ;;  %v2044_v11 = vsel %vm2015_vm5, %v2041_v3, %v2043_v48  ;;  %v2042_v4 = vsel %vm2015_vm5, %v2039_v17, %v2041_v3  ;;  %v2773_v17 = vld [vmem:[%s7272_s3 + $0x10] sm:$0xff]  ;;  %v7369_v3 = vld [vmem:[#allocation52_spill] sm:$0xff] }
 0x478   : > { %v6025_v16 = vpop.permute.xlu2 %3845  ;;  %v4039_v9 = vpack.i.bf16 %v2044_v11, %v2042_v4 }
 0x479   : > { %v1859_v45 = vpop.f32.mrf.mxu1  ;;  %4000 = vrot.lane.b32.xlu2 %v3999_v25, %s4298_s8  ;;  %4020 = vrot.lane.b32.xlu1 %v4019_v24, %s4303_s13  ;;  %v1679_v6 = vadd.f32 %v5912_v37, %v1587_v38  ;;  %v4009_v37 = vpack.i.bf16 %v5914_v61, %v5874_v57  ;;  %v2529_v24 = vrot.slane %v5964_v5, 5 }
 0x47a   : > { %v6016_v60 = vadd.f32 %v1859_v45, %v1768_v33  ;;  %4005 = vrot.lane.b32.xlu0 %v4004_v2, %s4301_s18  ;;  %3745 = vmatmul.msk.f32.gmra.mxu3 %vm1169_vm2, %v6013_v54  ;;  %v1590_v33 = vadd.f32 %v7365_v8, %v1498_v23  ;;  %v2774_v45 = vld [vmem:[%s7272_s3 + $0x18] sm:$0xff]  ;;  %v1687_v13 = vpop.f32.mrf.mxu2  ;;  %v2771_v8 = vld [vmem:[%s7272_s3] sm:$0xff] }
 0x47b   : > { %2839 = vmatpush.msrb.mxu2 %v2778_v63  ;;  %v1771_v26 = vadd.f32 %v5925_v29, %v1679_v6  ;;  %v2421_v29 = vrot.slane %v5914_v61, 4  ;;  %v2530_v63 = vsel %vm679_vm0, %v2527_v49, %v2529_v24  ;;  %v7366_v6 = vld [vmem:[#allocation12_spill] sm:$0xff] }
 0x47c   : > { %v2150_v31 = vrot.slane %v6016_v60, 6  ;;  %v2531_v47 = vrot.slane %v6016_v60, 5  ;;  %v1682_v52 = vadd.f32 %v5976_v19, %v1590_v33  ;;  %v1409_v28 = vadd.f32 %v7367_v58, %v7366_v6 }
 0x47d   : > { %2840 = vmatpush.msrb.mxu2 %v2777_v40  ;;  %v2422_v7 = vsel %vm2401_vm7, %v2419_v43, %v2421_v29  ;;  %v2420_v40 = vsel %vm2401_vm7, %v2417_v27, %v2419_v43  ;;  %v2425_v49 = vrot.slane %v6016_v60, 4 }
 0x47e   : > { %v6058_v12 = vsel %vm2122_vm4, %v2148_v21, %v2150_v31  ;;  %v2775_v21 = vld [vmem:[%s7272_s3 + $0x20] sm:$0xff]  ;;  %v2532_v2 = vsel %vm679_vm0, %v2529_v24, %v2531_v47  ;;  %v1774_v19 = vadd.f32 %v5992_v22, %v1682_v52  ;;  %v4014_v39 = vpack.i.bf16 %v2422_v7, %v2420_v40  ;;  %v1779_v22 = vpop.f32.mrf.mxu3 }
 0x47f   : > { %2841 = vmatpush.msrb.mxu2 %v2776_v59  ;;  %v4054_v38 = vpack.i.bf16 %v2532_v2, %v2530_v63  ;;  %v1936_v24 = vrot.slane %v5914_v61, 1  ;;  %v7370_v7 = vld [vmem:[#allocation13_spill] sm:$0xff]  ;;  %v4059_v4 = vpack.i.bf16 %v6058_v12, %v6013_v54 }
 0x480   : > { %v7371_v52 = vld [vmem:[#allocation33_spill] sm:$0xff] }
 0x481   : > { %v1862_v53 = vpop.f32.mrf.mxu1  ;;  %4030 = vrot.lane.b32.xlu2 %v4029_v50, %s4302_s20  ;;  %4025 = vrot.lane.b32.xlu1 %v4024_v42, %s4300_s17  ;;  %v1938_v42 = vrot.slane %v5964_v5, 1  ;;  %v1412_v63 = vadd.f32 %v7371_v52, %v7370_v7  ;;  %v7378_v52 = vld [vmem:[#allocation45_spill] sm:$0xff] }
 0x482   : > { %v6062_v25 = vadd.f32 %v1862_v53, %v1771_v26  ;;  %4010 = vrot.lane.b32.xlu0 %v4009_v37, %s4299_s14  ;;  %3746 = vmatmul.msk.f32.gmra.mxu3 %vm1169_vm2, %v6058_v12  ;;  %v7368_v26 = vld [vmem:[#allocation38_spill] sm:$0xff]  ;;  %v2423_v53 = vrot.slane %v5964_v5, 4  ;;  %v2257_v12 = vrot.slane %v6016_v60, 7 }
 0x483   : > { %v6072_v15 = vpop.permute.xlu2 %3865  ;;  %2842 = vmatpush.msrb.mxu2 %v2775_v21  ;;  %v1501_v37 = vadd.f32 %v7368_v26, %v1409_v28  ;;  %v1939_v33 = vsel %vm1910_vm3, %v1936_v24, %v1938_v42 }
 0x484   : > { %v2152_v44 = vrot.slane %v6062_v25, 6  ;;  %v2426_v43 = vsel %vm2401_vm7, %v2423_v53, %v2425_v49  ;;  %v2047_v58 = vrot.slane %v6062_v25, 2 }
 0x485   : > { %2843 = vmatpush.msrb.mxu2 %v2774_v45  ;;  %v1593_v21 = vadd.f32 %v7369_v3, %v1501_v37  ;;  %v2424_v45 = vsel %vm2401_vm7, %v2421_v29, %v2423_v53  ;;  %v7374_v37 = vld [vmem:[#allocation14_spill] sm:$0xff]  ;;  %v7375_v53 = vld [vmem:[#allocation37_spill] sm:$0xff]  ;;  %v7377_v3 = vld [vmem:[#allocation40_spill] sm:$0xff] }
 0x486   : > { %v6107_v27 = vsel %vm2122_vm4, %v2150_v31, %v2152_v44 }
 0x487   : > { %2844 = vmatpush.msrb.mxu2 %v2773_v17  ;;  %v1685_v11 = vadd.f32 %v6036_v20, %v1593_v21  ;;  %v7372_v20 = vld [vmem:[#allocation42_spill] sm:$0xff]  ;;  %v7373_v17 = vld [vmem:[#allocation53_spill] sm:$0xff] }
 0x488   : > { %v1504_v28 = vadd.f32 %v7372_v20, %v1412_v63 }
 0x489   : > { %v1865_v50 = vpop.f32.mrf.mxu1  ;;  %4055 = vrot.lane.b32.xlu2 %v4054_v38, %s4303_s13  ;;  %4040 = vrot.lane.b32.xlu1 %v4039_v9, %s4301_s18  ;;  %v4044_v38 = vpack.i.bf16 %v2426_v43, %v2424_v45  ;;  %v1937_v9 = vsel %vm1910_vm3, %v1934_v34, %v1936_v24  ;;  %v1777_v40 = vadd.f32 %v6046_v32, %v1685_v11  ;;  %v2045_v32 = vrot.slane %v6016_v60, 2  ;;  %v7376_v24 = vld [vmem:[#allocation15_spill] sm:$0xff]  ;;  %v1782_v43 = vpop.f32.mrf.mxu3 }
 0x48a   : > { %v6111_v59 = vadd.f32 %v1865_v50, %v1774_v19  ;;  %4015 = vrot.lane.b32.xlu0 %v4014_v39, %s4304_s15  ;;  %3747 = vmatmul.msk.f32.gmra.mxu3 %vm1169_vm2, %v6107_v27  ;;  %v4034_v6 = vpack.i.bf16 %v1939_v33, %v1937_v9  ;;  %v1690_v19 = vpop.f32.mrf.mxu2  ;;  %v2255_v39 = vrot.slane %v5964_v5, 7  ;;  %v1596_v50 = vadd.f32 %v7373_v17, %v1504_v28 }
 0x48b   : > { %v6120_v31 = vpop.permute.xlu2 %3870  ;;  %v6122_v23 = vpop.permute.xlu0 %3835  ;;  %2845 = vmatpush.msrb.mxu2 %v2772_v35  ;;  %v1415_v35 = vadd.f32 %v7375_v53, %v7374_v37  ;;  %v1418_v21 = vadd.f32 %v7377_v3, %v7376_v24  ;;  %v2046_v9 = vsel %vm2015_vm5, %v2043_v48, %v2045_v32  ;;  %v4049_v28 = vpack.i.bf16 %v6016_v60, %v5964_v5  ;;  %v7380_v53 = vld [vmem:[#allocation55_spill] sm:$0xff] }
 0x48c   : > { %v2154_v2 = vrot.slane %v6111_v59, 6  ;;  %v1688_v33 = vadd.f32 %v1687_v13, %v1596_v50  ;;  %v2258_v45 = vsel %vm2229_vm6, %v2255_v39, %v2257_v12  ;;  %v2256_v13 = vsel %vm2229_vm6, %v2253_v10, %v2255_v39 }
 0x48d   : > { %2846 = vmatpush.msrb.mxu2 %v2771_v8  ;;  %v2048_v8 = vsel %vm2015_vm5, %v2045_v32, %v2047_v58  ;;  %v1507_v63 = vadd.f32 %v7378_v52, %v1415_v35  ;;  %v4064_v17 = vpack.i.bf16 %v2258_v45, %v2256_v13  ;;  %v2429_v50 = vrot.slane %v6111_v59, 4 }
 0x48e   : > { %v6151_v54 = vsel %vm2122_vm4, %v2152_v44, %v2154_v2  ;;  %v4074_v20 = vpack.i.bf16 %v2048_v8, %v2046_v9  ;;  %v1942_v37 = vrot.slane %v6062_v25, 1  ;;  %v2427_v35 = vrot.slane %v6062_v25, 4 }
 0x48f   : > { %v1599_v48 = vadd.f32 %v7380_v53, %v1507_v63  ;;  %v1940_v24 = vrot.slane %v6016_v60, 1  ;;  %v2533_v3 = vrot.slane %v6062_v25, 5 }
 0x490   : > { %v2430_v9 = vsel %vm2401_vm7, %v2427_v35, %v2429_v50 }
 0x491   : > { %v1868_v29 = vpop.f32.mrf.mxu1  ;;  %4060 = vrot.lane.b32.xlu2 %v4059_v4, %s4300_s17  ;;  %4045 = vrot.lane.b32.xlu1 %v4044_v38, %s4304_s15  ;;  %v7379_v4 = vld [vmem:[#allocation48_spill] sm:$0xff] }
 0x492   : > { %v6154_v34 = vadd.f32 %v1868_v29, %v1777_v40  ;;  %4035 = vrot.lane.b32.xlu0 %v4034_v6, %s4298_s8  ;;  %3748 = vmatmul.msk.f32.gmra.mxu3 %vm1169_vm2, %v6151_v54  ;;  %v1510_v38 = vadd.f32 %v7379_v4, %v1418_v21  ;;  %v1780_v40 = vadd.f32 %v1779_v22, %v1688_v33  ;;  %v3837_v6 = vunpack.i.l.bf16 %v6122_v23  ;;  %v1693_v52 = vpop.f32.mrf.mxu2 }
 0x493   : > { %v6162_v26 = vpop.permute.xlu2 %3875  ;;  %v6164_v44 = vpop.permute.xlu1 %3850  ;;  %v2535_v22 = vrot.slane %v6111_v59, 5  ;;  %v1691_v21 = vadd.f32 %v1690_v19, %v1599_v48  ;;  %v1943_v19 = vsel %vm1910_vm3, %v1940_v24, %v1942_v37 }
 0x494   : > { %v6173_v11 = vpop.permute.xlu0 %3840  ;;  %v2156_v7 = vrot.slane %v6154_v34, 6  ;;  %v3852_v8 = vunpack.i.l.bf16 %v6164_v44 }
 0x495   : > { %v3842_v29 = vunpack.i.l.bf16 %v6173_v11 }
 0x496   : > { %v6197_v10 = vsel %vm2122_vm4, %v2154_v2, %v2156_v7  ;;  %v2618_v2 = vsel %vm1169_vm2, %v5510_v55, %v3837_v6  ;;  %v2536_v55 = vsel %vm679_vm0, %v2533_v3, %v2535_v22  ;;  %v1785_v6 = vpop.f32.mrf.mxu3 }
 0x497   : > { %v2640_v63 = vsel %vm2639_vm8, %v2618_v2, %v3842_v29  ;;  %v2534_v29 = vsel %vm679_vm0, %v2531_v47, %v2533_v3 }
 0x498   : > { %v2662_v53 = vsel %vm2661_vm9, %v2640_v63, %v3852_v8  ;;  %v4089_v2 = vpack.i.bf16 %v2536_v55, %v2534_v29  ;;  %v3853_v63 = vunpack.i.h.bf16 %v6164_v44  ;;  %v7382_v29 = vld [vmem:[#allocation16_spill] sm:$0xff] }
 0x499   : > { %v1871_v32 = vpop.f32.mrf.mxu1  ;;  %4075 = vrot.lane.b32.xlu2 %v4074_v20, %s4301_s18  ;;  %4050 = vrot.lane.b32.xlu1 %v4049_v28, %s4299_s14  ;;  %v2428_v20 = vsel %vm2401_vm7, %v2425_v49, %v2427_v35  ;;  %v1941_v28 = vsel %vm1910_vm3, %v1938_v42, %v1940_v24  ;;  %v2261_v49 = vrot.slane %v6111_v59, 7  ;;  %v3847_v35 = vunpack.i.l.bf16 %v6025_v16 }
 0x49a   : > { %v6200_v39 = vadd.f32 %v1871_v32, %v1780_v40  ;;  %4065 = vrot.lane.b32.xlu0 %v4064_v17, %s4302_s20  ;;  %3749 = vmatmul.msk.f32.gmra.mxu3 %vm1169_vm2, %v6197_v10  ;;  %v1783_v40 = vadd.f32 %v1782_v43, %v1691_v21  ;;  %v3838_v17 = vunpack.i.h.bf16 %v6122_v23  ;;  %v4079_v48 = vpack.i.bf16 %v2430_v9, %v2428_v20  ;;  %v7381_v23 = vld [vmem:[#allocation57_spill] sm:$0xff] }
 0x49b   : > { %v6211_v33 = vpop.permute.xlu2 %3895  ;;  %v3856_v45 = vpop.permute.xlu1 %3855  ;;  %v4069_v32 = vpack.i.bf16 %v1943_v19, %v1941_v28  ;;  %v3843_v43 = vunpack.i.h.bf16 %v6173_v11  ;;  %v1602_v24 = vadd.f32 %v7381_v23, %v1510_v38  ;;  %v2259_v11 = vrot.slane %v6062_v25, 7 }
 0x49c   : > { %v3857_v4 = vunpack.i.l.bf16 %v3856_v45  ;;  %v2158_v13 = vrot.slane %v6200_v39, 6  ;;  %v2619_v8 = vsel %vm1169_vm2, %v5501_v14, %v3838_v17  ;;  %v3877_v9 = vunpack.i.l.bf16 %v6162_v26  ;;  %v7383_v17 = vld [vmem:[#allocation43_spill] sm:$0xff] }
 0x49d   : > { %v2641_v19 = vsel %vm2639_vm8, %v2619_v8, %v3843_v43  ;;  %v3858_v55 = vunpack.i.h.bf16 %v3856_v45  ;;  %v2262_v20 = vsel %vm2229_vm6, %v2259_v11, %v2261_v49  ;;  %v1694_v14 = vadd.f32 %v1693_v52, %v1602_v24 }
 0x49e   : > { %v2684_v21 = vsel %vm2683_vm10, %v2662_v53, %v3857_v4  ;;  %v6242_v47 = vsel %vm2122_vm4, %v2156_v7, %v2158_v13  ;;  %v1421_v53 = vadd.f32 %v7383_v17, %v7382_v29  ;;  %v2260_v45 = vsel %vm2229_vm6, %v2257_v12, %v2259_v11  ;;  %v7385_v29 = vld [vmem:[#allocation58_spill] sm:$0xff] }
 0x49f   : > { %v2706_v7 = vsel %vm2705_vm11, %v2684_v21, %v3847_v35  ;;  %v4084_v21 = vpack.i.bf16 %v6111_v59, %v6062_v25  ;;  %v1786_v43 = vadd.f32 %v1785_v6, %v1694_v14  ;;  %v4099_v35 = vpack.i.bf16 %v2262_v20, %v2260_v45 }
 0x4a0   : > { %v4094_v24 = vpack.i.bf16 %v6151_v54, %v6107_v27  ;;  %v1946_v8 = vrot.slane %v6154_v34, 1  ;;  %v2051_v11 = vrot.slane %v6154_v34, 2  ;;  %v2537_v27 = vrot.slane %v6154_v34, 5 }
 0x4a1   : > { %v1874_v42 = vpop.f32.mrf.mxu1  ;;  %4080 = vrot.lane.b32.xlu2 %v4079_v48, %s4304_s15  ;;  %4070 = vrot.lane.b32.xlu1 %v4069_v32, %s4298_s8  ;;  %v1696_v48 = vpop.f32.mrf.mxu2  ;;  %v2728_v32 = vsel %vm2727_vm12, %v2706_v7, %v3877_v9  ;;  %v2539_v7 = vrot.slane %v6200_v39, 5  ;;  %v3848_v9 = vunpack.i.h.bf16 %v6025_v16  ;;  %v1944_v16 = vrot.slane %v6111_v59, 1 }
 0x4a2   : > { %v6245_v3 = vadd.f32 %v1874_v42, %v1783_v40  ;;  %4090 = vrot.lane.b32.xlu0 %v4089_v2, %s4303_s13  ;;  %3750 = vmatmul.msk.f32.gmra.mxu3 %vm1169_vm2, %v6242_v47  ;;  %v2663_v2 = vsel %vm2661_vm9, %v2641_v19, %v3853_v63  ;;  %v1788_v42 = vpop.f32.mrf.mxu3  ;;  %v7384_v63 = vld [vmem:[#allocation51_spill] sm:$0xff] }
 0x4a3   : > { %v6255_v4 = vpop.permute.xlu2 %3925  ;;  %v6257_v38 = vpop.permute.xlu1 %3860  ;;  %v2685_v23 = vsel %vm2683_vm10, %v2663_v2, %v3858_v55  ;;  %v1513_v19 = vadd.f32 %v7384_v63, %v1421_v53  ;;  %v3878_v53 = vunpack.i.h.bf16 %v6162_v26  ;;  %v1945_v26 = vsel %vm1910_vm3, %v1942_v37, %v1944_v16  ;;  %v7386_v63 = vld [vmem:[#allocation17_spill] sm:$0xff] }
 0x4a4   : > { %v3881_v40 = vpop.permute.xlu0 %3880  ;;  %v2160_v44 = vrot.slane %v6245_v3, 6  ;;  %v2707_v14 = vsel %vm2705_vm11, %v2685_v23, %v3848_v9  ;;  %v7278_v37 = vrot.slane %v6200_v39, 7 }
 0x4a5   : > { %v3882_v28 = vunpack.i.l.bf16 %v3881_v40  ;;  %v3883_v54 = vunpack.i.h.bf16 %v3881_v40  ;;  %v1605_v17 = vadd.f32 %v7385_v29, %v1513_v19  ;;  %v2540_v40 = vsel %vm679_vm0, %v2537_v27, %v2539_v7 }
 0x4a6   : > { %v6284_v6 = vsel %vm2122_vm4, %v2158_v13, %v2160_v44 }
 0x4a7   : > { %v2750_v52 = vsel %vm2749_vm13, %v2728_v32, %v3882_v28  ;;  %v2049_v28 = vrot.slane %v6111_v59, 2  ;;  %v1697_v2 = vadd.f32 %v1696_v48, %v1605_v17  ;;  %v7387_v48 = vld [vmem:[#allocation46_spill] sm:$0xff] }
 0x4a8   : > { %2847 = vmatmul.f32.vlgmr.msrb.gmra.mxu2 %v2750_v52  ;;  %v2729_v52 = vsel %vm2727_vm12, %v2707_v14, %v3878_v53  ;;  %v1424_v19 = vadd.f32 %v7387_v48, %v7386_v63  ;;  %v7391_v63 = vld [vmem:[#allocation50_spill] sm:$0xff] }
 0x4a9   : > { %v1877_v12 = vpop.f32.mrf.mxu1  ;;  %4085 = vrot.lane.b32.xlu2 %v4084_v21, %s4299_s14  ;;  %4100 = vrot.lane.b32.xlu1 %v4099_v35, %s4302_s20  ;;  %v1947_v21 = vsel %vm1910_vm3, %v1944_v16, %v1946_v8  ;;  %v2052_v45 = vsel %vm2015_vm5, %v2049_v28, %v2051_v11  ;;  %v2538_v35 = vsel %vm679_vm0, %v2535_v22, %v2537_v27  ;;  %v1699_v14 = vpop.f32.mrf.mxu2  ;;  %v2433_v27 = vrot.slane %v6200_v39, 4 }
 0x4aa   : > { %v6288_v55 = vadd.f32 %v1877_v12, %v1786_v43  ;;  %4095 = vrot.lane.b32.xlu0 %v4094_v24, %s4300_s17  ;;  %3751 = vmatmul.msk.f32.gmra.mxu3 %vm1169_vm2, %v6284_v6  ;;  %v2751_v23 = vsel %vm2749_vm13, %v2729_v52, %v3883_v54  ;;  %v4104_v24 = vpack.i.bf16 %v1947_v21, %v1945_v26 }
 0x4ab   : > { %v6295_v20 = vpop.permute.xlu2 %3950  ;;  %v6297_v13 = vpop.permute.xlu1 %3890  ;;  %v4124_v9 = vpack.i.bf16 %v2540_v40, %v2538_v35  ;;  %v2050_v12 = vsel %vm2015_vm5, %v2047_v58, %v2049_v28  ;;  %v1789_v29 = vadd.f32 %v1788_v42, %v1697_v2  ;;  %v7388_v58 = vld [vmem:[#allocation54_spill] sm:$0xff]  ;;  %v2263_v42 = vrot.slane %v6154_v34, 7 }
 0x4ac   : > { %v6303_v32 = vpop.permute.xlu0 %3885  ;;  %v2162_v43 = vrot.slane %v6288_v55, 6  ;;  %v4109_v17 = vpack.i.bf16 %v2052_v45, %v2050_v12  ;;  %v1516_v54 = vadd.f32 %v7388_v58, %v1424_v19  ;;  %v1791_v28 = vpop.f32.mrf.mxu3  ;;  %v7389_v45 = vld [vmem:[#allocation59_spill] sm:$0xff]  ;;  %v7390_v12 = vld [vmem:[#allocation18_spill] sm:$0xff] }
 0x4ad   : > { %v2266_v26 = vsel %vm2229_vm6, %v2263_v42, %v7278_v37  ;;  %v1427_v48 = vadd.f32 %v7391_v63, %v7390_v12  ;;  %v2055_v37 = vrot.slane %v6245_v3, 2 }
 0x4ae   : > { %v6332_v22 = vsel %vm2122_vm4, %v2160_v44, %v2162_v43  ;;  %v2431_v44 = vrot.slane %v6154_v34, 4  ;;  %v1608_v2 = vadd.f32 %v7389_v45, %v1516_v54  ;;  %v7277_v54 = vrot.slane %v6288_v55, 5  ;;  %v7392_v45 = vld [vmem:[#allocation56_spill] sm:$0xff] }
 0x4b0   : > { %2850 = vmatmul.f32.gmra.mxu2 %v2751_v23  ;;  %v2434_v35 = vsel %vm2401_vm7, %v2431_v44, %v2433_v27 }
 0x4b1   : > { %v1880_v16 = vpop.f32.mrf.mxu1  ;;  %4105 = vrot.lane.b32.xlu2 %v4104_v24, %s4298_s8  ;;  %4125 = vrot.lane.b32.xlu1 %v4124_v9, %s4303_s13  ;;  %v1700_v24 = vadd.f32 %v1699_v14, %v1608_v2  ;;  %v2264_v9 = vsel %vm2229_vm6, %v2261_v49, %v2263_v42  ;;  %v7279_v14 = vrot.slane %v6288_v55, 4  ;;  %v1519_v2 = vadd.f32 %v7392_v45, %v1427_v48 }
 0x4b2   : > { %v6336_v53 = vadd.f32 %v1880_v16, %v1789_v29  ;;  %4110 = vrot.lane.b32.xlu0 %v4109_v17, %s4301_s18  ;;  %3752 = vmatmul.msk.f32.gmra.mxu3 %vm1169_vm2, %v6332_v22  ;;  %v4134_v19 = vpack.i.bf16 %v2266_v26, %v2264_v9  ;;  %v4129_v29 = vpack.i.bf16 %v6242_v47, %v6197_v10  ;;  %v3862_v49 = vunpack.i.l.bf16 %v6257_v38  ;;  %v1702_v47 = vpop.f32.mrf.mxu2  ;;  %v7393_v26 = vld [vmem:[#allocation60_spill] sm:$0xff] }
 0x4b3   : > { %v6342_v21 = vpop.permute.xlu2 %3955  ;;  %v6344_v40 = vpop.permute.xlu1 %3915  ;;  %v2432_v17 = vsel %vm2401_vm7, %v2429_v50, %v2431_v44  ;;  %v1792_v16 = vadd.f32 %v1791_v28, %v1700_v24  ;;  %v2541_v28 = vrot.slane %v6245_v3, 5  ;;  %v2435_v44 = vrot.slane %v6245_v3, 4 }
 0x4b4   : > { %v6348_v52 = vpop.permute.xlu0 %3900  ;;  %v2164_v23 = vrot.slane %v6336_v53, 6  ;;  %v4114_v58 = vpack.i.bf16 %v2434_v35, %v2432_v17  ;;  %v1611_v35 = vadd.f32 %v7393_v26, %v1519_v2  ;;  %v3887_v17 = vunpack.i.l.bf16 %v6303_v32 }
 0x4b5   : > { %v2544_v12 = vsel %vm679_vm0, %v2541_v28, %v7277_v54  ;;  %v2438_v63 = vsel %vm2401_vm7, %v2435_v44, %v7279_v14  ;;  %v3863_v45 = vunpack.i.h.bf16 %v6257_v38  ;;  %v2542_v2 = vsel %vm679_vm0, %v2539_v7, %v2541_v28 }
 0x4b6   : > { %v6372_v10 = vsel %vm2122_vm4, %v2162_v43, %v2164_v23  ;;  %v1703_v48 = vadd.f32 %v1702_v47, %v1611_v35  ;;  %v4159_v26 = vpack.i.bf16 %v2544_v12, %v2542_v2  ;;  %v3892_v35 = vunpack.i.l.bf16 %v6297_v13 }
 0x4b7   : > { %v1950_v28 = vrot.slane %v6245_v3, 1  ;;  %v3888_v12 = vunpack.i.h.bf16 %v6303_v32  ;;  %v3893_v32 = vunpack.i.h.bf16 %v6297_v13 }
 0x4b9   : > { %v1883_v42 = vpop.f32.mrf.mxu1  ;;  %4135 = vrot.lane.b32.xlu2 %v4134_v19, %s4302_s20  ;;  %4130 = vrot.lane.b32.xlu1 %v4129_v29, %s4300_s17  ;;  %v2620_v19 = vsel %vm1169_vm2, %v5516_v62, %v3862_v49  ;;  %v1794_v29 = vpop.f32.mrf.mxu3  ;;  %v4119_v62 = vpack.i.bf16 %v6200_v39, %v6154_v34 }
 0x4ba   : > { %v6374_v50 = vadd.f32 %v1883_v42, %v1792_v16  ;;  %4115 = vrot.lane.b32.xlu0 %v4114_v58, %s4304_s15  ;;  %3753 = vmatmul.msk.f32.gmra.mxu3 %vm1169_vm2, %v6372_v10  ;;  %v3867_v58 = vunpack.i.l.bf16 %v6072_v15  ;;  %v2436_v42 = vsel %vm2401_vm7, %v2433_v27, %v2435_v44  ;;  %v1795_v49 = vadd.f32 %v1794_v29, %v1703_v48 }
 0x4bb   : > { %v6382_v24 = vpop.permute.xlu2 %3970  ;;  %v6384_v9 = vpop.permute.xlu1 %3920  ;;  %v4144_v47 = vpack.i.bf16 %v2438_v63, %v2436_v42  ;;  %v2053_v27 = vrot.slane %v6200_v39, 2  ;;  %v2621_v44 = vsel %vm1169_vm2, %v5543_v18, %v3863_v45  ;;  %v3868_v48 = vunpack.i.h.bf16 %v6072_v15 }
 0x4bc   : > { %v6386_v43 = vpop.permute.xlu0 %3905  ;;  %v2614_v16 = vrot.slane %v6374_v50, 6  ;;  %v2642_v54 = vsel %vm2639_vm8, %v2620_v19, %v3867_v58  ;;  %v3872_v19 = vunpack.i.l.bf16 %v6120_v31 }
 0x4bd   : > { %v2664_v38 = vsel %vm2661_vm9, %v2642_v54, %v3887_v17  ;;  %v1948_v54 = vrot.slane %v6200_v39, 1  ;;  %v2056_v18 = vsel %vm2015_vm5, %v2053_v27, %v2055_v37  ;;  %v2054_v15 = vsel %vm2015_vm5, %v2051_v11, %v2053_v27 }
 0x4be   : > { %v2615_v7 = vsel %vm2122_vm4, %v2164_v23, %v2614_v16  ;;  %v2686_v17 = vsel %vm2683_vm10, %v2664_v38, %v3892_v35  ;;  %v4164_v11 = vpack.i.bf16 %v6332_v22, %v6284_v6  ;;  %v3897_v35 = vunpack.i.l.bf16 %v6211_v33 }
 0x4bf   : > { %v1951_v45 = vsel %vm1910_vm3, %v1948_v54, %v1950_v28  ;;  %v1949_v13 = vsel %vm1910_vm3, %v1946_v8, %v1948_v54  ;;  %v2441_v38 = vrot.slane %v6374_v50, 4  ;;  %v2269_v6 = vrot.slane %v6288_v55, 7 }
 0x4c0   : > { %v4139_v27 = vpack.i.bf16 %v1951_v45, %v1949_v13  ;;  %v3902_v22 = vunpack.i.l.bf16 %v6348_v52  ;;  %v7395_v13 = vrot.slane %v6200_v39, 7 }
 0x4c1   : > { %v1886_v14 = vpop.f32.mrf.mxu1  ;;  %4160 = vrot.lane.b32.xlu2 %v4159_v26, %s4303_s13  ;;  %4145 = vrot.lane.b32.xlu1 %v4144_v47, %s4304_s15  ;;  %v3917_v47 = vunpack.i.l.bf16 %v6344_v40 }
 0x4c2   : > { %v6418_v63 = vadd.f32 %v1886_v14, %v1795_v49  ;;  %4120 = vrot.lane.b32.xlu0 %v4119_v62, %s4299_s14  ;;  %3754 = vmatmul.msk.f32.gmra.mxu3 %vm1169_vm2, %v2615_v7  ;;  %v2643_v14 = vsel %vm2639_vm8, %v2621_v44, %v3868_v48  ;;  %v2708_v62 = vsel %vm2705_vm11, %v2686_v17, %v3872_v19  ;;  %v2439_v19 = vrot.slane %v6336_v53, 4 }
 0x4c3   : > { %v6424_v23 = vpop.permute.xlu1 %3935  ;;  %v6433_v58 = vpop.permute.xlu2 %3975  ;;  %v2665_v2 = vsel %vm2661_vm9, %v2643_v14, %v3888_v12  ;;  %v4149_v49 = vpack.i.bf16 %v2056_v18, %v2054_v15  ;;  %v2267_v12 = vrot.slane %v6245_v3, 7  ;;  %v3873_v17 = vunpack.i.h.bf16 %v6120_v31 }
 0x4c4   : > { %v3911_v29 = vpop.permute.xlu0 %3910  ;;  %v2616_v42 = vrot.slane %v6418_v63, 6  ;;  %v2687_v8 = vsel %vm2683_vm10, %v2665_v2, %v3893_v32  ;;  %v3922_v18 = vunpack.i.l.bf16 %v6384_v9  ;;  %v2622_v15 = vsel %vm1169_vm2, %v5575_v36, %v3897_v35 }
 0x4c5   : > { %v3912_v26 = vunpack.i.l.bf16 %v3911_v29  ;;  %v3913_v54 = vunpack.i.h.bf16 %v3911_v29  ;;  %v2442_v29 = vsel %vm2401_vm7, %v2439_v19, %v2441_v38  ;;  %v2270_v31 = vsel %vm2229_vm6, %v2267_v12, %v2269_v6 }
 0x4c6   : > { %v2617_v48 = vsel %vm2122_vm4, %v2614_v16, %v2616_v42  ;;  %v2709_v16 = vsel %vm2705_vm11, %v2687_v8, %v3873_v17  ;;  %v2644_v45 = vsel %vm2639_vm8, %v2622_v15, %v3902_v22  ;;  %v7394_v42 = vrot.slane %v6288_v55, 4 }
 0x4c7   : > { %v2730_v7 = vsel %vm2727_vm12, %v2708_v62, %v3912_v26  ;;  %v2731_v2 = vsel %vm2727_vm12, %v2709_v16, %v3913_v54  ;;  %v3918_v36 = vunpack.i.h.bf16 %v6344_v40  ;;  %v2666_v62 = vsel %vm2661_vm9, %v2644_v45, %v3922_v18 }
 0x4c8   : > { %v2752_v44 = vsel %vm2749_vm13, %v2730_v7, %v3917_v47  ;;  %v2440_v26 = vsel %vm2401_vm7, %v7394_v42, %v2439_v19  ;;  %v2268_v47 = vsel %vm2229_vm6, %v7395_v13, %v2267_v12  ;;  %v4154_v35 = vpack.i.bf16 %v6288_v55, %v6245_v3 }
 0x4c9   : > { %4165 = vrot.lane.b32.xlu2 %v4164_v11, %s4300_s17  ;;  %4150 = vrot.lane.b32.xlu1 %v4149_v49, %s4301_s18  ;;  %v4174_v49 = vpack.i.bf16 %v2442_v29, %v2440_v26  ;;  %v3927_v7 = vunpack.i.l.bf16 %v6255_v4  ;;  %v2547_v8 = vrot.slane %v6374_v50, 5  ;;  %v2753_v22 = vsel %vm2749_vm13, %v2731_v2, %v3918_v36 }
 0x4ca   : > { %2853 = vmatmul.f32.gmra.mxu2 %v2752_v44  ;;  %4140 = vrot.lane.b32.xlu0 %v4139_v27, %s4298_s8  ;;  %v4169_v27 = vpack.i.bf16 %v2270_v31, %v2268_v47  ;;  %v3898_v44 = vunpack.i.h.bf16 %v6211_v33  ;;  %v3903_v40 = vunpack.i.h.bf16 %v6348_v52  ;;  %v3923_v54 = vunpack.i.h.bf16 %v6384_v9 }
 0x4cb   : > { %3755 = vmatmul.msk.f32.gmra.mxu3 %vm1169_vm2, %v2617_v48  ;;  %v6466_v32 = vpop.permute.xlu1 %3940  ;;  %v6489_v11 = vpop.permute.xlu2 %3980  ;;  %v2688_v12 = vsel %vm2683_vm10, %v2666_v62, %v3927_v7  ;;  %v3907_v48 = vunpack.i.l.bf16 %v6386_v43  ;;  %v2545_v19 = vrot.slane %v6336_v53, 5  ;;  %v3952_v52 = vunpack.i.l.bf16 %v6295_v20 }
 0x4cc   : > { %v6468_v14 = vpop.permute.xlu0 %3930  ;;  %v2623_v29 = vsel %vm1169_vm2, %v5610_v41, %v3898_v44  ;;  %v7396_v41 = vrot.slane %v6288_v55, 5  ;;  %v3928_v13 = vunpack.i.h.bf16 %v6255_v4  ;;  %v2271_v44 = vrot.slane %v6336_v53, 7 }
 0x4cd   : > { %v2710_v15 = vsel %vm2705_vm11, %v2688_v12, %v3907_v48  ;;  %v2548_v16 = vsel %vm679_vm0, %v2545_v19, %v2547_v8  ;;  %v2645_v9 = vsel %vm2639_vm8, %v2623_v29, %v3903_v40  ;;  %v3932_v2 = vunpack.i.l.bf16 %v6468_v14 }
 0x4ce   : > { %v2667_v45 = vsel %vm2661_vm9, %v2645_v9, %v3923_v54  ;;  %v2546_v26 = vsel %vm679_vm0, %v7396_v41, %v2545_v19  ;;  %v3957_v54 = vunpack.i.l.bf16 %v6342_v21  ;;  %v2272_v48 = vsel %vm2229_vm6, %v2269_v6, %v2271_v44 }
 0x4cf   : > { %v4179_v47 = vpack.i.bf16 %v2548_v16, %v2546_v26  ;;  %v2624_v4 = vsel %vm1169_vm2, %v5650_v46, %v3932_v2  ;;  %v3933_v46 = vunpack.i.h.bf16 %v6468_v14  ;;  %v2549_v29 = vrot.slane %v6418_v63, 5 }
 0x4d1   : > { %4175 = vrot.lane.b32.xlu2 %v4174_v49, %s4304_s15  ;;  %4155 = vrot.lane.b32.xlu1 %v4154_v35, %s4299_s14  ;;  %v2689_v49 = vsel %vm2683_vm10, %v2667_v45, %v3928_v13  ;;  %v3908_v35 = vunpack.i.h.bf16 %v6386_v43  ;;  %v3953_v43 = vunpack.i.h.bf16 %v6295_v20  ;;  %v3942_v20 = vunpack.i.l.bf16 %v6466_v32 }
 0x4d2   : > { %2856 = vmatmul.f32.gmra.mxu2 %v2753_v22  ;;  %4170 = vrot.lane.b32.xlu0 %v4169_v27, %s4302_s20  ;;  %v3937_v27 = vunpack.i.l.bf16 %v6424_v23  ;;  %v2625_v55 = vsel %vm1169_vm2, %v5688_v30, %v3933_v46  ;;  %v3958_v45 = vunpack.i.h.bf16 %v6342_v21  ;;  %v3943_v21 = vunpack.i.h.bf16 %v6466_v32 }
 0x4d3   : > { %v3946_v33 = vpop.permute.xlu1 %3945  ;;  %v6523_v36 = vpop.permute.xlu2 %4000 }
 0x4d4   : > { %v3947_v17 = vunpack.i.l.bf16 %v3946_v33  ;;  %v6505_v18 = vpop.permute.xlu0 %3960  ;;  %v3948_v62 = vunpack.i.h.bf16 %v3946_v33  ;;  %v2646_v22 = vsel %vm2639_vm8, %v2624_v4, %v3937_v27 }
 0x4d5   : > { %v3962_v40 = vunpack.i.l.bf16 %v6505_v18  ;;  %v2668_v33 = vsel %vm2661_vm9, %v2646_v22, %v3957_v54  ;;  %v3963_v30 = vunpack.i.h.bf16 %v6505_v18 }
 0x4d6   : > { %v2732_v31 = vsel %vm2727_vm12, %v2710_v15, %v3947_v17  ;;  %v2443_v15 = vrot.slane %v6418_v63, 4 }
 0x4d7   : > { %v2754_v42 = vsel %vm2749_vm13, %v2732_v31, %v3952_v52  ;;  %v2690_v17 = vsel %vm2683_vm10, %v2668_v33, %v3962_v40 }
 0x4d8   : > { %v2712_v9 = vsel %vm2705_vm11, %v2690_v17, %v3942_v20  ;;  %v2444_v41 = vsel %vm2401_vm7, %v2441_v38, %v2443_v15 }
 0x4d9   : > { %2097 = vrot.lane.b32.xlu2 %v2055_v37, %s4301_s18  ;;  %1992 = vrot.lane.b32.xlu1 %v1950_v28, %s4298_s8  ;;  %v2711_v28 = vsel %vm2705_vm11, %v2689_v49, %v3908_v35  ;;  %v3983_v49 = vunpack.i.h.bf16 %v6489_v11 }
 0x4da   : > { %2859 = vmatmul.f32.gmra.mxu2 %v2754_v42  ;;  %4180 = vrot.lane.b32.xlu0 %v4179_v47, %s4303_s13  ;;  %v2733_v12 = vsel %vm2727_vm12, %v2711_v28, %v3948_v62 }
 0x4db   : > { %v6536_v7 = vpop.permute.xlu1 %3965  ;;  %v2755_v19 = vsel %vm2749_vm13, %v2733_v12, %v3953_v43  ;;  %v6561_v6 = vpop.permute.xlu2 %4030 }
 0x4dc   : > { %v3986_v37 = vpop.permute.xlu0 %3985  ;;  %v3967_v50 = vunpack.i.l.bf16 %v6536_v7  ;;  %v3968_v28 = vunpack.i.h.bf16 %v6536_v7  ;;  %v3977_v7 = vunpack.i.l.bf16 %v6433_v58 }
 0x4dd   : > { %v3987_v16 = vunpack.i.l.bf16 %v3986_v37 }
 0x4de   : > { %v2626_v32 = vsel %vm1169_vm2, %v5731_v1, %v3967_v50  ;;  %v2627_v43 = vsel %vm1169_vm2, %v5759_v56, %v3968_v28  ;;  %v3973_v1 = vunpack.i.h.bf16 %v6382_v24 }
 0x4e0   : > { %v2649_v17 = vsel %vm2639_vm8, %v2627_v43, %v3973_v1 }
 0x4e1   : > { %2376 = vrot.lane.b32.xlu2 %v6336_v53, %s4299_s14  ;;  %2313 = vrot.lane.b32.xlu1 %v2272_v48, %s4302_s20  ;;  %v3938_v53 = vunpack.i.h.bf16 %v6424_v23  ;;  %v2550_v23 = vsel %vm679_vm0, %v2547_v8, %v2549_v29  ;;  %v3988_v8 = vunpack.i.h.bf16 %v3986_v37  ;;  %v3972_v37 = vunpack.i.l.bf16 %v6382_v24  ;;  %s270_s14 = scalar_lea.vmem [#allocation2], %s269_s9 }
 0x4e2   : > { %2862 = vmatmul.f32.gmra.mxu2 %v2755_v19  ;;  %2206 = vrot.lane.b32.xlu0 %v6372_v10, %s4300_s17  ;;  %v3982_v10 = vunpack.i.l.bf16 %v6489_v11  ;;  %v4002_v24 = vunpack.i.l.bf16 %v6523_v36  ;;  %s3549_s17 = sshll.u32 %s270_s14, 4  ;;  %s3550_s17 = int_to_ptr.vmem [resolvable:$true] %s3549_s17 }
 0x4e3   : > { %v6563_v14 = vpop.permute.xlu1 %3995  ;;  %v2647_v31 = vsel %vm2639_vm8, %v2625_v55, %v3938_v53  ;;  %v6588_v47 = vpop.permute.xlu2 %4055  ;;  %v2648_v22 = vsel %vm2639_vm8, %v2626_v32, %v3972_v37 }
 0x4e4   : > { %v3991_v52 = vpop.permute.xlu0 %3990  ;;  %v2734_v2 = vsel %vm2727_vm12, %v2712_v9, %v3982_v10  ;;  %v2669_v42 = vsel %vm2661_vm9, %v2647_v31, %v3958_v45  ;;  %v3997_v11 = vunpack.i.l.bf16 %v6563_v14  ;;  %v3998_v19 = vunpack.i.h.bf16 %v6563_v14 }
 0x4e5   : > { %v2756_v63 = vsel %vm2749_vm13, %v2734_v2, %v3987_v16  ;;  %v2691_v18 = vsel %vm2683_vm10, %v2669_v42, %v3963_v30  ;;  %v3992_v27 = vunpack.i.l.bf16 %v3991_v52  ;;  %v3993_v54 = vunpack.i.h.bf16 %v3991_v52 }
 0x4e6   : > { %v2713_v62 = vsel %vm2705_vm11, %v2691_v18, %v3943_v21  ;;  %v3978_v10 = vunpack.i.h.bf16 %v6433_v58  ;;  %v2628_v45 = vsel %vm1169_vm2, %v5798_v51, %v4002_v24  ;;  %v4032_v21 = vunpack.i.l.bf16 %v6561_v6 }
 0x4e7   : > { %v2735_v38 = vsel %vm2727_vm12, %v2713_v62, %v3983_v49  ;;  %v2670_v12 = vsel %vm2661_vm9, %v2648_v22, %v3992_v27  ;;  %v2671_v55 = vsel %vm2661_vm9, %v2649_v17, %v3993_v54  ;;  %v4057_v28 = vunpack.i.l.bf16 %v6588_v47 }
 0x4e8   : > { %v2757_v35 = vsel %vm2749_vm13, %v2735_v38, %v3988_v8  ;;  %v2692_v48 = vsel %vm2683_vm10, %v2670_v12, %v3997_v11  ;;  %v2693_v14 = vsel %vm2683_vm10, %v2671_v55, %v3998_v19  ;;  %v4003_v8 = vunpack.i.h.bf16 %v6523_v36 }
 0x4e9   : > { %2591 = vrot.lane.b32.xlu1 %v2550_v23, %s4303_s13  ;;  %v2714_v56 = vsel %vm2705_vm11, %v2692_v48, %v3977_v7  ;;  %v2715_v23 = vsel %vm2705_vm11, %v2693_v14, %v3978_v10  ;;  %v4033_v22 = vunpack.i.h.bf16 %v6561_v6  ;;  %s3539_s13 = scalar_lea.sflag [#allocation3], %s269_s9 }
 0x4ea   : > { %2865 = vmatmul.f32.gmra.mxu2 %v2756_v63  ;;  %2485 = vrot.lane.b32.xlu0 %v2444_v41, %s4304_s15  ;;  %v2629_v32 = vsel %vm1169_vm2, %v5830_v0, %v4003_v8 }
 0x4eb   : > { %v4021_v26 = vpop.permute.xlu1 %4020  ;;  %v6603_v40 = vpop.permute.xlu2 %4060 }
 0x4ec   : > { %v6586_v13 = vpop.permute.xlu0 %4005  ;;  %v4022_v29 = vunpack.i.l.bf16 %v4021_v26  ;;  %v4023_v41 = vunpack.i.h.bf16 %v4021_v26 }
 0x4ed   : > { %v4007_v15 = vunpack.i.l.bf16 %v6586_v13  ;;  %v4008_v62 = vunpack.i.h.bf16 %v6586_v13 }
 0x4ef   : > { %v2650_v42 = vsel %vm2639_vm8, %v2628_v45, %v4007_v15  ;;  %v2651_v37 = vsel %vm2639_vm8, %v2629_v32, %v4008_v62 }
 0x4f2   : > { %2868 = vmatmul.f32.gmra.mxu2 %v2757_v35 }
 0x4f3   : > { %v4026_v4 = vpop.permute.xlu1 %4025  ;;  %v6621_v16 = vpop.permute.xlu2 %4075 }
 0x4f4   : > { %v6597_v44 = vpop.permute.xlu0 %4010  ;;  %v4027_v31 = vunpack.i.l.bf16 %v4026_v4  ;;  %v4028_v50 = vunpack.i.h.bf16 %v4026_v4 }
 0x4f5   : > { %v4012_v38 = vunpack.i.l.bf16 %v6597_v44  ;;  %v4013_v54 = vunpack.i.h.bf16 %v6597_v44  ;;  %v4062_v44 = vunpack.i.l.bf16 %v6603_v40 }
 0x4f6   : > { %v2672_v18 = vsel %vm2661_vm9, %v2650_v42, %v4027_v31  ;;  %v2673_v11 = vsel %vm2661_vm9, %v2651_v37, %v4028_v50  ;;  %v4063_v42 = vunpack.i.h.bf16 %v6603_v40 }
 0x4f7   : > { %v2694_v51 = vsel %vm2683_vm10, %v2672_v18, %v4032_v21  ;;  %v2695_v0 = vsel %vm2683_vm10, %v2673_v11, %v4033_v22 }
 0x4f8   : > { %v2716_v36 = vsel %vm2705_vm11, %v2694_v51, %v4012_v38  ;;  %v2717_v19 = vsel %vm2705_vm11, %v2695_v0, %v4013_v54 }
 0x4fb   : > { %v6609_v46 = vpop.permute.xlu1 %4040  ;;  %v6637_v35 = vpop.permute.xlu2 %4080 }
 0x4fc   : > { %v4016_v33 = vpop.permute.xlu0 %4015  ;;  %v4042_v48 = vunpack.i.l.bf16 %v6609_v46  ;;  %v4043_v14 = vunpack.i.h.bf16 %v6609_v46  ;;  %v4082_v45 = vunpack.i.l.bf16 %v6637_v35  ;;  %v4083_v32 = vunpack.i.h.bf16 %v6637_v35 }
 0x4fd   : > { %v4017_v20 = vunpack.i.l.bf16 %v4016_v33  ;;  %v4018_v9 = vunpack.i.h.bf16 %v4016_v33 }
 0x4ff   : > { %v2736_v53 = vsel %vm2727_vm12, %v2714_v56, %v4017_v20  ;;  %v2737_v63 = vsel %vm2727_vm12, %v2715_v23, %v4018_v9  ;;  %v6665_v9 = vpop.f32.mrf.mxu3 }
 0x500   : > { %v2758_v52 = vsel %vm2749_vm13, %v2736_v53, %v4022_v29  ;;  %v2759_v58 = vsel %vm2749_vm13, %v2737_v63, %v4023_v41  ;;  %v4058_v29 = vunpack.i.h.bf16 %v6588_v47 }
 0x501   : > { %2871 = vmatmul.f32.gmra.mxu2 %v2758_v52 }
 0x503   : > { %v4046_v30 = vpop.permute.xlu1 %4045  ;;  %v6654_v17 = vpop.permute.xlu2 %4085 }
 0x504   : > { %v4036_v2 = vpop.permute.xlu0 %4035  ;;  %v4047_v49 = vunpack.i.l.bf16 %v4046_v30  ;;  %v4048_v43 = vunpack.i.h.bf16 %v4046_v30 }
 0x505   : > { %v4037_v4 = vunpack.i.l.bf16 %v4036_v2  ;;  %v4038_v56 = vunpack.i.h.bf16 %v4036_v2 }
 0x506   : > { %v2738_v13 = vsel %vm2727_vm12, %v2716_v36, %v4047_v49  ;;  %v2739_v55 = vsel %vm2727_vm12, %v2717_v19, %v4048_v43  ;;  %v4087_v43 = vunpack.i.l.bf16 %v6654_v17 }
 0x507   : > { %v2760_v12 = vsel %vm2749_vm13, %v2738_v13, %v4057_v28  ;;  %v2630_v1 = vsel %vm1169_vm2, %v5874_v57, %v4037_v4  ;;  %v2761_v24 = vsel %vm2749_vm13, %v2739_v55, %v4058_v29  ;;  %v2631_v15 = vsel %vm1169_vm2, %v5914_v61, %v4038_v56  ;;  %v6683_v38 = vpop.f32.mrf.mxu3 }
 0x508   : > { %v2652_v6 = vsel %vm2639_vm8, %v2630_v1, %v4042_v48  ;;  %v2653_v2 = vsel %vm2639_vm8, %v2631_v15, %v4043_v14 }
 0x509   : > { %2874 = vmatmul.f32.gmra.mxu2 %v2759_v58  ;;  %v2674_v57 = vsel %vm2661_vm9, %v2652_v6, %v4062_v44  ;;  %v2675_v18 = vsel %vm2661_vm9, %v2653_v2, %v4063_v42 }
 0x50b   : > { %v4051_v26 = vpop.permute.xlu1 %4050  ;;  %v6672_v63 = vpop.permute.xlu2 %4105 }
 0x50c   : > { %v4066_v27 = vpop.permute.xlu0 %4065  ;;  %v4052_v53 = vunpack.i.l.bf16 %v4051_v26  ;;  %v4053_v41 = vunpack.i.h.bf16 %v4051_v26  ;;  %v4077_v26 = vunpack.i.l.bf16 %v6621_v16 }
 0x50d   : > { %v4067_v20 = vunpack.i.l.bf16 %v4066_v27  ;;  %v4068_v23 = vunpack.i.h.bf16 %v4066_v27 }
 0x50f   : > { %v2696_v52 = vsel %vm2683_vm10, %v2674_v57, %v4067_v20  ;;  %v2697_v8 = vsel %vm2683_vm10, %v2675_v18, %v4068_v23  ;;  %v6701_v20 = vpop.f32.mrf.mxu3 }
 0x510   : > { %v2718_v30 = vsel %vm2705_vm11, %v2696_v52, %v4052_v53  ;;  %v2719_v50 = vsel %vm2705_vm11, %v2697_v8, %v4053_v41  ;;  %v4088_v53 = vunpack.i.h.bf16 %v6654_v17  ;;  %v4108_v17 = vunpack.i.h.bf16 %v6672_v63 }
 0x511   : > { %2877 = vmatmul.f32.gmra.mxu2 %v2760_v12  ;;  %v2740_v61 = vsel %vm2727_vm12, %v2718_v30, %v4082_v45  ;;  %v2741_v13 = vsel %vm2727_vm12, %v2719_v50, %v4083_v32  ;;  %v4078_v12 = vunpack.i.h.bf16 %v6621_v16  ;;  %v4107_v16 = vunpack.i.l.bf16 %v6672_v63 }
 0x513   : > { %v4071_v7 = vpop.permute.xlu1 %4070  ;;  %v6691_v11 = vpop.permute.xlu2 %4135  ;;  %v2634_v52 = vsel %vm1169_vm2, %v6062_v25, %v4107_v16 }
 0x514   : > { %v4091_v33 = vpop.permute.xlu0 %4090  ;;  %v4072_v46 = vunpack.i.l.bf16 %v4071_v7  ;;  %v4073_v27 = vunpack.i.h.bf16 %v4071_v7  ;;  %v4137_v23 = vunpack.i.l.bf16 %v6691_v11 }
 0x515   : > { %v4092_v47 = vunpack.i.l.bf16 %v4091_v33  ;;  %v4093_v49 = vunpack.i.h.bf16 %v4091_v33 }
 0x516   : > { %v2632_v62 = vsel %vm1169_vm2, %v5964_v5, %v4072_v46  ;;  %v2633_v4 = vsel %vm1169_vm2, %v6016_v60, %v4073_v27 }
 0x517   : > { %v2762_v21 = vsel %vm2749_vm13, %v2740_v61, %v4092_v47  ;;  %v2654_v37 = vsel %vm2639_vm8, %v2632_v62, %v4077_v26  ;;  %v2763_v28 = vsel %vm2749_vm13, %v2741_v13, %v4093_v49  ;;  %v2655_v48 = vsel %vm2639_vm8, %v2633_v4, %v4078_v12  ;;  %v6718_v61 = vpop.f32.mrf.mxu3 }
 0x519   : > { %2880 = vmatmul.f32.gmra.mxu2 %v2761_v24 }
 0x51b   : > { %v4101_v10 = vpop.permute.xlu1 %4100  ;;  %v4161_v24 = vpop.permute.xlu2 %4160 }
 0x51c   : > { %v4096_v31 = vpop.permute.xlu0 %4095  ;;  %v4102_v36 = vunpack.i.l.bf16 %v4101_v10  ;;  %v4103_v1 = vunpack.i.h.bf16 %v4101_v10  ;;  %v4162_v26 = vunpack.i.l.bf16 %v4161_v24 }
 0x51d   : > { %v4097_v51 = vunpack.i.l.bf16 %v4096_v31  ;;  %v4098_v22 = vunpack.i.h.bf16 %v4096_v31 }
 0x51f   : > { %v2676_v5 = vsel %vm2661_vm9, %v2654_v37, %v4097_v51  ;;  %v2677_v33 = vsel %vm2661_vm9, %v2655_v48, %v4098_v22  ;;  %v6736_v22 = vpop.f32.mrf.mxu3  ;;  %v4163_v48 = vunpack.i.h.bf16 %v4161_v24 }
 0x520   : > { %v2698_v35 = vsel %vm2683_vm10, %v2676_v5, %v4102_v36  ;;  %v2699_v56 = vsel %vm2683_vm10, %v2677_v33, %v4103_v1  ;;  %v4138_v36 = vunpack.i.h.bf16 %v6691_v11 }
 0x521   : > { %2883 = vmatmul.f32.gmra.mxu2 %v2762_v21  ;;  %v2720_v6 = vsel %vm2705_vm11, %v2698_v35, %v4087_v43  ;;  %v2721_v10 = vsel %vm2705_vm11, %v2699_v56, %v4088_v53 }
 0x523   : > { %v4126_v58 = vpop.permute.xlu1 %4125  ;;  %v4166_v49 = vpop.permute.xlu2 %4165 }
 0x524   : > { %v6680_v40 = vpop.permute.xlu0 %4110  ;;  %v4127_v19 = vunpack.i.l.bf16 %v4126_v58  ;;  %v4128_v30 = vunpack.i.h.bf16 %v4126_v58  ;;  %v2635_v58 = vsel %vm1169_vm2, %v6111_v59, %v4108_v17 }
 0x525   : > { %v4112_v29 = vunpack.i.l.bf16 %v6680_v40  ;;  %v4113_v25 = vunpack.i.h.bf16 %v6680_v40 }
 0x527   : > { %v2656_v47 = vsel %vm2639_vm8, %v2634_v52, %v4112_v29  ;;  %v2657_v51 = vsel %vm2639_vm8, %v2635_v58, %v4113_v25 }
 0x529   : > { %2886 = vmatmul.f32.gmra.mxu2 %v2763_v28 }
 0x52b   : > { %v4131_v0 = vpop.permute.xlu1 %4130  ;;  %v6723_v8 = vpop.f32.mrf.mxu2 }
 0x52c   : > { %v4116_v54 = vpop.permute.xlu0 %4115  ;;  %v4132_v57 = vunpack.i.l.bf16 %v4131_v0  ;;  %v4133_v46 = vunpack.i.h.bf16 %v4131_v0  ;;  %v4167_v0 = vunpack.i.l.bf16 %v4166_v49 }
 0x52d   : > { %v4117_v7 = vunpack.i.l.bf16 %v4116_v54  ;;  %v4118_v44 = vunpack.i.h.bf16 %v4116_v54 }
 0x52e   : > { %v2678_v45 = vsel %vm2661_vm9, %v2656_v47, %v4132_v57  ;;  %v2679_v32 = vsel %vm2661_vm9, %v2657_v51, %v4133_v46 }
 0x52f   : > { %v2742_v60 = vsel %vm2727_vm12, %v2720_v6, %v4117_v7  ;;  %v2743_v31 = vsel %vm2727_vm12, %v2721_v10, %v4118_v44  ;;  %v2700_v18 = vsel %vm2683_vm10, %v2678_v45, %v4137_v23  ;;  %v2701_v28 = vsel %vm2683_vm10, %v2679_v32, %v4138_v36 }
 0x530   : > { %v2764_v55 = vsel %vm2749_vm13, %v2742_v60, %v4127_v19  ;;  %v2765_v42 = vsel %vm2749_vm13, %v2743_v31, %v4128_v30  ;;  %v4168_v10 = vunpack.i.h.bf16 %v4166_v49 }
 0x531   : > { %2889 = vmatmul.f32.gmra.mxu2 %v2764_v55 }
 0x533   : > { %v4146_v15 = vpop.permute.xlu1 %4145  ;;  %v6739_v11 = vpop.f32.mrf.mxu2 }
 0x534   : > { %v4121_v14 = vpop.permute.xlu0 %4120  ;;  %v4147_v41 = vunpack.i.l.bf16 %v4146_v15  ;;  %v4148_v5 = vunpack.i.h.bf16 %v4146_v15 }
 0x535   : > { %v4122_v2 = vunpack.i.l.bf16 %v4121_v14  ;;  %v4123_v27 = vunpack.i.h.bf16 %v4121_v14  ;;  %v6751_v14 = vpop.f32.mrf.mxu3 }
 0x537   : > { %v2722_v21 = vsel %vm2705_vm11, %v2700_v18, %v4122_v2  ;;  %v2723_v4 = vsel %vm2705_vm11, %v2701_v28, %v4123_v27 }
 0x538   : > { %v2744_v40 = vsel %vm2727_vm12, %v2722_v21, %v4147_v41  ;;  %v2745_v1 = vsel %vm2727_vm12, %v2723_v4, %v4148_v5 }
 0x539   : > { %2892 = vmatmul.f32.gmra.mxu2 %v2765_v42  ;;  %v2766_v13 = vsel %vm2749_vm13, %v2744_v40, %v4162_v26  ;;  %v2767_v60 = vsel %vm2749_vm13, %v2745_v1, %v4163_v48 }
 0x53b   : > { %v4151_v62 = vpop.permute.xlu1 %4150 }
 0x53c   : > { %v4141_v63 = vpop.permute.xlu0 %4140  ;;  %v4152_v37 = vunpack.i.l.bf16 %v4151_v62  ;;  %v4153_v16 = vunpack.i.h.bf16 %v4151_v62 }
 0x53d   : > { %v4142_v50 = vunpack.i.l.bf16 %v4141_v63  ;;  %v4143_v7 = vunpack.i.h.bf16 %v4141_v63  ;;  %v2946_v63 = vpop.f32.mrf.mxu3 }
 0x53f   : > { %v2636_v59 = vsel %vm1169_vm2, %v6154_v34, %v4142_v50  ;;  %v4176_v34 = vpop.permute.xlu2 %4175  ;;  %v2637_v55 = vsel %vm1169_vm2, %v6200_v39, %v4143_v7 }
 0x540   : > { %v2658_v12 = vsel %vm2639_vm8, %v2636_v59, %v4152_v37  ;;  %v4177_v44 = vunpack.i.l.bf16 %v4176_v34  ;;  %v2659_v57 = vsel %vm2639_vm8, %v2637_v55, %v4153_v16  ;;  %v4178_v18 = vunpack.i.h.bf16 %v4176_v34 }
 0x541   : > { %2895 = vmatmul.f32.gmra.mxu2 %v2766_v13  ;;  %v2680_v19 = vsel %vm2661_vm9, %v2658_v12, %v4167_v0  ;;  %v2681_v39 = vsel %vm2661_vm9, %v2659_v57, %v4168_v10 }
 0x543   : > { %v4156_v35 = vpop.permute.xlu1 %4155 }
 0x544   : > { %v4171_v43 = vpop.permute.xlu0 %4170  ;;  %v4157_v33 = vunpack.i.l.bf16 %v4156_v35  ;;  %v4158_v30 = vunpack.i.h.bf16 %v4156_v35 }
 0x545   : > { %v4172_v54 = vunpack.i.l.bf16 %v4171_v43  ;;  %v4173_v24 = vunpack.i.h.bf16 %v4171_v43  ;;  %v2949_v37 = vpop.f32.mrf.mxu3 }
 0x547   : > { %v2702_v6 = vsel %vm2683_vm10, %v2680_v19, %v4172_v54  ;;  %v2098_v45 = vpop.permute.xlu2 %2097  ;;  %v2703_v2 = vsel %vm2683_vm10, %v2681_v39, %v4173_v24 }
 0x548   : > { %v2724_v29 = vsel %vm2705_vm11, %v2702_v6, %v4157_v33  ;;  %v2725_v41 = vsel %vm2705_vm11, %v2703_v2, %v4158_v30 }
 0x549   : > { %2898 = vmatmul.f32.gmra.mxu2 %v2767_v60  ;;  %v2746_v47 = vsel %vm2727_vm12, %v2724_v29, %v4177_v44  ;;  %v2747_v62 = vsel %vm2727_vm12, %v2725_v41, %v4178_v18  ;;  %v2932_v18 = vadd.f32 %v6683_v38, %v6739_v11 }
 0x54b   : > { %v1993_v56 = vpop.permute.xlu1 %1992 }
 0x54c   : > { %v4181_v53 = vpop.permute.xlu0 %4180  ;;  %v2638_v23 = vsel %vm1169_vm2, %v6245_v3, %v1993_v56 }
 0x54d   : > { %v4182_v52 = vunpack.i.l.bf16 %v4181_v53  ;;  %v6749_v15 = vpop.f32.mrf.mxu2  ;;  %v4183_v17 = vunpack.i.h.bf16 %v4181_v53  ;;  %v2660_v46 = vsel %vm2639_vm8, %v2638_v23, %v2098_v45  ;;  %v2952_v5 = vpop.f32.mrf.mxu3 }
 0x54e   : > { %v2935_v41 = vadd.f32 %v6701_v20, %v6749_v15  ;;  %v2993_v20 = vld [vmem:[%s7273_s4 + $0x10] sm:$0xff] }
 0x54f   : > { %v2768_v31 = vsel %vm2749_vm13, %v2746_v47, %v4182_v52  ;;  %v2769_v49 = vsel %vm2749_vm13, %v2747_v62, %v4183_v17  ;;  %v2377_v3 = vpop.permute.xlu2 %2376 }
 0x551   : > { %2901 = vmatmul.f32.gmra.mxu2 %v2768_v31 }
 0x553   : > { %v2314_v42 = vpop.permute.xlu1 %2313 }
 0x554   : > { %v2207_v25 = vpop.permute.xlu0 %2206 }
 0x555   : > { %v6761_v21 = vpop.f32.mrf.mxu2  ;;  %v2682_v58 = vsel %vm2661_vm9, %v2660_v46, %v2207_v25  ;;  %v2955_v28 = vpop.f32.mrf.mxu3 }
 0x556   : > { %v2704_v51 = vsel %vm2683_vm10, %v2682_v58, %v2314_v42  ;;  %v2938_v25 = vadd.f32 %v6718_v61, %v6761_v21  ;;  %v2995_v21 = vld [vmem:[%s7273_s4 + $0x20] sm:$0xff] }
 0x557   : > { %v2726_v50 = vsel %vm2705_vm11, %v2704_v51, %v2377_v3  ;;  %v2994_v51 = vld [vmem:[%s7273_s4 + $0x18] sm:$0xff]  ;;  %v2999_v3 = vld [vmem:[%s7273_s4 + $0x40] sm:$0xf] }
 0x559   : > { %2904 = vmatmul.f32.gmra.mxu2 %v2769_v49  ;;  %v2997_v49 = vld [vmem:[%s7273_s4 + $0x30] sm:$0xff] }
 0x55b   : > { %v2592_v26 = vpop.permute.xlu1 %2591 }
 0x55c   : > { %v2486_v40 = vpop.permute.xlu0 %2485 }
 0x55d   : > { %v2748_v32 = vsel %vm2727_vm12, %v2726_v50, %v2486_v40  ;;  %v2860_v27 = vpop.f32.mrf.mxu2  ;;  %v2958_v12 = vpop.f32.mrf.mxu3  ;;  %v2996_v50 = vld [vmem:[%s7273_s4 + $0x28] sm:$0xff]  ;;  %v2998_v40 = vld [vmem:[%s7273_s4 + $0x38] sm:$0xff] }
 0x55e   : > { %v2770_v36 = vsel %vm2749_vm13, %v2748_v32, %v2592_v26  ;;  %v2941_v17 = vadd.f32 %v6736_v22, %v2860_v27  ;;  %v2991_v22 = vld [vmem:[%s7273_s4] sm:$0xff]  ;;  %v3000_v26 = vld [vmem:[%s7273_s4 + $0x48] sm:$0xf]  ;;  %v3239_v27 = vld [vmem:[%s7274_s5 + $0x118] sm:$0xff] }
 0x561   : > { %2907 = vmatmul.f32.gmra.mxu2 %v2770_v36  ;;  %v3238_v36 = vld [vmem:[%s7274_s5 + $0x110] sm:$0xff] }
 0x565   : > { %v2863_v13 = vpop.f32.mrf.mxu2  ;;  %v2961_v0 = vpop.f32.mrf.mxu3 }
 0x566   : > { %v2944_v23 = vadd.f32 %v6751_v14, %v2863_v13  ;;  %v2929_v14 = vadd.f32 %v6665_v9, %v6723_v8  ;;  %v3236_v13 = vld [vmem:[%s7274_s5 + $0x100] sm:$0xff] }
 0x56d   : > { %v2866_v59 = vpop.f32.mrf.mxu2  ;;  %v2964_v1 = vpop.f32.mrf.mxu3 }
 0x56e   : > { %v2947_v45 = vadd.f32 %v2946_v63, %v2866_v59  ;;  %v2992_v63 = vld [vmem:[%s7273_s4 + $0x8] sm:$0xff] }
 0x575   : > { %v2869_v4 = vpop.f32.mrf.mxu2  ;;  %v2967_v34 = vpop.f32.mrf.mxu3 }
 0x576   : > { %v2950_v39 = vadd.f32 %v2949_v37, %v2869_v4  ;;  %v3237_v37 = vld [vmem:[%s7274_s5 + $0x108] sm:$0xff] }
 0x57d   : > { %v2970_v19 = vpop.f32.mrf.mxu3 }
 0x584   : > { %v2872_v35 = vpop.f32.mrf.mxu2 }
 0x585   : > { %v2953_v43 = vadd.f32 %v2952_v5, %v2872_v35  ;;  %v2973_v60 = vpop.f32.mrf.mxu3 }
 0x58c   : > { %v2875_v54 = vpop.f32.mrf.mxu2 }
 0x58d   : > { %v2976_v55 = vpop.f32.mrf.mxu3  ;;  %v2956_v31 = vadd.f32 %v2955_v28, %v2875_v54 }
 0x594   : > { %v2878_v48 = vpop.f32.mrf.mxu2 }
 0x595   : > { %v2979_v10 = vpop.f32.mrf.mxu3  ;;  %v2959_v47 = vadd.f32 %v2958_v12, %v2878_v48 }
 0x59c   : > { %v2881_v7 = vpop.f32.mrf.mxu2 }
 0x59d   : > { %v2962_v52 = vadd.f32 %v2961_v0, %v2881_v7  ;;  %v2982_v2 = vpop.f32.mrf.mxu3 }
 0x5a4   : > { %v2884_v33 = vpop.f32.mrf.mxu2 }
 0x5a5   : > { %v2965_v57 = vadd.f32 %v2964_v1, %v2884_v33  ;;  %v2985_v46 = vpop.f32.mrf.mxu3  ;;  %v3234_v33 = vld [vmem:[%s7274_s5 + $0xf0] sm:$0xff] }
 0x5ac   : > { %v2887_v6 = vpop.f32.mrf.mxu2 }
 0x5ad   : > { %v2968_v53 = vadd.f32 %v2967_v34, %v2887_v6  ;;  %v2988_v61 = vpop.f32.mrf.mxu3  ;;  %v3235_v34 = vld [vmem:[%s7274_s5 + $0xf8] sm:$0xff] }
 0x5b4   : > { %v2890_v16 = vpop.f32.mrf.mxu2 }
 0x5b5   : > { %v2971_v56 = vadd.f32 %v2970_v19, %v2890_v16  ;;  %v3218_v16 = vld [vmem:[%s7274_s5 + $0x70] sm:$0xff] }
 0x5bc   : > { %v2893_v29 = vpop.f32.mrf.mxu2 }
 0x5bd   : > { %v2974_v44 = vadd.f32 %v2973_v60, %v2893_v29  ;;  %v3219_v60 = vld [vmem:[%s7274_s5 + $0x78] sm:$0xff] }
 0x5be   : > { %3246 = vmatpush.msrb.mxu1 %v3219_v60  ;;  %v3209_v60 = vld [vmem:[%s7274_s5 + $0x28] sm:$0xff] }
 0x5bf   : > { %3020 = vmatpush.msra.mxu2 %v2974_v44 }
 0x5c0   : > { %3247 = vmatpush.msrb.mxu1 %v3218_v16  ;;  %v3222_v16 = vld [vmem:[%s7274_s5 + $0x90] sm:$0xff] }
 0x5c1   : > { %3021 = vmatpush.msra.mxu2 %v2971_v56  ;;  %v3233_v56 = vld [vmem:[%s7274_s5 + $0xe8] sm:$0xff] }
 0x5c3   : > { %3022 = vmatpush.msra.mxu2 %v2968_v53 }
 0x5c4   : > { %v2896_v24 = vpop.f32.mrf.mxu2 }
 0x5c5   : > { %3023 = vmatpush.msra.mxu2 %v2965_v57  ;;  %v2977_v62 = vadd.f32 %v2976_v55, %v2896_v24 }
 0x5c7   : > { %3024 = vmatpush.msra.mxu2 %v2962_v52 }
 0x5c9   : > { %3025 = vmatpush.msra.mxu2 %v2959_v47 }
 0x5cb   : > { %3026 = vmatpush.msra.mxu2 %v2956_v31 }
 0x5cc   : > { %v2899_v30 = vpop.f32.mrf.mxu2 }
 0x5cd   : > { %3027 = vmatpush.msra.mxu2 %v2953_v43  ;;  %v2980_v8 = vadd.f32 %v2979_v10, %v2899_v30  ;;  %v3217_v10 = vld [vmem:[%s7274_s5 + $0x68] sm:$0xff] }
 0x5ce   : > { %3248 = vmatpush.msrb.mxu1 %v3217_v10 }
 0x5cf   : > { %3028 = vmatpush.msra.mxu2 %v2950_v39  ;;  %v3232_v39 = vld [vmem:[%s7274_s5 + $0xe0] sm:$0xff] }
 0x5d1   : > { %3029 = vmatpush.msra.mxu2 %v2947_v45 }
 0x5d3   : > { %3030 = vmatpush.msra.mxu2 %v2944_v23 }
 0x5d4   : > { %v2902_v42 = vpop.f32.mrf.mxu2 }
 0x5d5   : > { %3031 = vmatpush.msra.mxu2 %v2941_v17  ;;  %v2983_v9 = vadd.f32 %v2982_v2, %v2902_v42 }
 0x5d7   : > { %3032 = vmatpush.msra.mxu2 %v2938_v25 }
 0x5d9   : > { %3033 = vmatpush.msra.mxu2 %v2935_v41 }
 0x5db   : > { %3034 = vmatpush.msra.mxu2 %v2932_v18  ;;  %v3231_v18 = vld [vmem:[%s7274_s5 + $0xd8] sm:$0xff] }
 0x5dc   : > { %v2905_v58 = vpop.f32.mrf.mxu2 }
 0x5dd   : > { %3035 = vmatpush.msra.mxu2 %v2929_v14  ;;  %v2986_v11 = vadd.f32 %v2985_v46, %v2905_v58  ;;  %v3216_v14 = vld [vmem:[%s7274_s5 + $0x60] sm:$0xff]  ;;  %v3230_v58 = vld [vmem:[%s7274_s5 + $0xd0] sm:$0xff] }
 0x5de   : > { %3036 = vmatmul.f32.vlgmr.msra.gmra.mxu2 %v2991_v22  ;;  %3249 = vmatpush.msrb.mxu1 %v3216_v14 }
 0x5df   : > { %3272 = vmatpush.msrb.mxu2 %v3235_v34 }
 0x5e1   : > { %3273 = vmatpush.msrb.mxu2 %v3234_v33 }
 0x5e3   : > { %3274 = vmatpush.msrb.mxu2 %v3233_v56  ;;  %v3220_v56 = vld [vmem:[%s7274_s5 + $0x80] sm:$0xff] }
 0x5e4   : > { %v2908_v15 = vpop.f32.mrf.mxu2 }
 0x5e5   : > { %v2989_v38 = vadd.f32 %v2988_v61, %v2908_v15  ;;  %3275 = vmatpush.msrb.mxu2 %v3232_v39  ;;  %v3215_v15 = vld [vmem:[%s7274_s5 + $0x58] sm:$0xff] }
 0x5e6   : > { %3039 = vmatmul.f32.gmra.mxu2 %v2993_v20  ;;  %3250 = vmatpush.msrb.mxu1 %v3215_v15 }
 0x5e7   : > { %3756 = vmatpush.msk.msra.mxu3 %vm2015_vm5, %v2989_v38  ;;  %3276 = vmatpush.msrb.mxu2 %v3231_v18  ;;  %v3229_v38 = vld [vmem:[%s7274_s5 + $0xc8] sm:$0xff] }
 0x5e9   : > { %3064 = vmatpush.msra.mxu3 %v2986_v11  ;;  %3277 = vmatpush.msrb.mxu2 %v3230_v58 }
 0x5eb   : > { %3065 = vmatpush.msra.mxu3 %v2983_v9  ;;  %3278 = vmatpush.msrb.mxu2 %v3229_v38 }
 0x5ed   : > { %3066 = vmatpush.msra.mxu3 %v2980_v8 }
 0x5ee   : > { %3042 = vmatmul.f32.gmra.mxu2 %v2995_v21  ;;  %v3214_v21 = vld [vmem:[%s7274_s5 + $0x50] sm:$0xff] }
 0x5ef   : > { %3067 = vmatpush.msra.mxu3 %v2977_v62  ;;  %v3228_v62 = vld [vmem:[%s7274_s5 + $0xc0] sm:$0xff]  ;;  %3251 = vmatpush.msrb.mxu1 %v3214_v21 }
 0x5f0   : > { %3757 = vmatmul.msk.f32.vlgmr.msra.gmra.mxu3 %vm3001_vm14, %v2992_v63  ;;  %3279 = vmatpush.msrb.mxu2 %v3228_v62 }
 0x5f1   : > { %3310 = vmatpush.msrb.mxu3 %v3239_v27 }
 0x5f3   : > { %3311 = vmatpush.msrb.mxu3 %v3238_v36  ;;  %v3213_v36 = vld [vmem:[%s7274_s5 + $0x48] sm:$0xff] }
 0x5f4   : > { %3252 = vmatpush.msrb.mxu1 %v3213_v36 }
 0x5f5   : > { %3312 = vmatpush.msrb.mxu3 %v3237_v37 }
 0x5f6   : > { %3045 = vmatmul.f32.gmra.mxu2 %v2997_v49 }
 0x5f7   : > { %3313 = vmatpush.msrb.mxu3 %v3236_v13  ;;  %v3226_v13 = vld [vmem:[%s7274_s5 + $0xb0] sm:$0xff] }
 0x5f8   : > { %3758 = vmatmul.msk.f32.gmra.mxu3 %vm3001_vm14, %v2994_v51 }
 0x5fe   : > { %3048 = vmatmul.f32.gmra.mxu2 %v2999_v3 }
 0x600   : > { %3759 = vmatmul.msk.f32.gmra.mxu3 %vm3001_vm14, %v2996_v50 }
 0x608   : > { %3760 = vmatmul.msk.f32.gmra.mxu3 %vm3001_vm14, %v2998_v40 }
 0x610   : > { %3761 = vmatmul.msk.f32.gmra.mxu3 %vm3001_vm14, %v3000_v26 }
 0x661   : > { %v3037_v32 = vpop.f32.mrf.mxu2 }
 0x669   : > { %v3040_v59 = vpop.f32.mrf.mxu2 }
 0x671   : > { %v3043_v35 = vpop.f32.mrf.mxu2 }
 0x673   : > { %v3069_v5 = vpop.f32.mrf.mxu3 }
 0x674   : > { %v6823_v28 = vadd.f32 %v3069_v5, %v3037_v32  ;;  %v3227_v32 = vld [vmem:[%s7274_s5 + $0xb8] sm:$0xff] }
 0x675   : > { %3280 = vmatpush.msrb.mxu2 %v3227_v32 }
 0x676   : > { %v3087_v43 = vrot.slane %v6823_v28, 1  ;;  %v3101_v55 = vrot.slane %v6823_v28, 2  ;;  %v3116_v44 = vrot.slane %v6823_v28, 6 }
 0x677   : > { %3281 = vmatpush.msrb.mxu2 %v3226_v13 }
 0x679   : > { %v3046_v47 = vpop.f32.mrf.mxu2 }
 0x67b   : > { %v3072_v4 = vpop.f32.mrf.mxu3 }
 0x67c   : > { %v6825_v12 = vadd.f32 %v3072_v4, %v3040_v59  ;;  %v3212_v59 = vld [vmem:[%s7274_s5 + $0x40] sm:$0xff]  ;;  %v3225_v4 = vld [vmem:[%s7274_s5 + $0xa8] sm:$0xff] }
 0x67d   : > { %3253 = vmatpush.msrb.mxu1 %v3212_v59  ;;  %3282 = vmatpush.msrb.mxu2 %v3225_v4 }
 0x67e   : > { %v3088_v0 = vrot.slane %v6825_v12, 1  ;;  %v3102_v7 = vrot.slane %v6825_v12, 2  ;;  %v3117_v6 = vrot.slane %v6825_v12, 6  ;;  %v3152_v29 = vrot.slane %v6825_v12, 4 }
 0x67f   : > { %v3168_v57 = vrot.slane %v6825_v12, 5  ;;  %v3133_v10 = vrot.slane %v6825_v12, 7 }
 0x680   : > { %v3089_v54 = vsel %vm1910_vm3, %v3087_v43, %v3088_v0  ;;  %v3103_v31 = vsel %vm2015_vm5, %v3101_v55, %v3102_v7  ;;  %v3118_v2 = vsel %vm2122_vm4, %v3116_v44, %v3117_v6  ;;  %v3208_v55 = vld [vmem:[%s7274_s5 + $0x20] sm:$0xff]  ;;  %v3207_v44 = vld [vmem:[%s7274_s5 + $0x18] sm:$0xff] }
 0x681   : > { %v4184_v1 = vpack.i.bf16 %v3089_v54, %v6825_v12  ;;  %v3049_v26 = vpop.f32.mrf.mxu2  ;;  %v3211_v54 = vld [vmem:[%s7274_s5 + $0x38] sm:$0xff] }
 0x682   : > { %3254 = vmatpush.msrb.mxu1 %v3211_v54 }
 0x683   : > { %v3075_v48 = vpop.f32.mrf.mxu3  ;;  %4185 = vrot.lane.b32.xlu2 %v4184_v1, %s4301_s18  ;;  %v3224_v1 = vld [vmem:[%s7274_s5 + $0xa0] sm:$0xff] }
 0x684   : > { %v6838_v19 = vadd.f32 %v3075_v48, %v3043_v35  ;;  %3283 = vmatpush.msrb.mxu2 %v3224_v1 }
 0x686   : > { %v3153_v53 = vrot.slane %v6838_v19, 4  ;;  %v3169_v24 = vrot.slane %v6838_v19, 5  ;;  %v3119_v52 = vrot.slane %v6838_v19, 6  ;;  %v3090_v30 = vrot.slane %v6838_v19, 1 }
 0x687   : > { %v3104_v61 = vrot.slane %v6838_v19, 2  ;;  %v3135_v15 = vrot.slane %v6838_v19, 7 }
 0x688   : > { %v3154_v45 = vsel %vm2401_vm7, %v3152_v29, %v3153_v53  ;;  %v3170_v23 = vsel %vm679_vm0, %v3168_v57, %v3169_v24  ;;  %v3120_v17 = vsel %vm2122_vm4, %v3117_v6, %v3119_v52  ;;  %v3091_v41 = vsel %vm1910_vm3, %v3088_v0, %v3090_v30  ;;  %v3223_v6 = vld [vmem:[%s7274_s5 + $0x98] sm:$0xff]  ;;  %v3221_v29 = vld [vmem:[%s7274_s5 + $0x88] sm:$0xff] }
 0x689   : > { %v4189_v42 = vpack.i.bf16 %v3103_v31, %v3154_v45  ;;  %v4194_v25 = vpack.i.bf16 %v3118_v2, %v3170_v23  ;;  %3762 = vmatmul.msk.f32.vlgmr.msrb.gmra.mxu3 %vm2639_vm8, %v3120_v17  ;;  %v4199_v46 = vpack.i.bf16 %v3091_v41, %v6838_v19  ;;  %v3105_v63 = vsel %vm2015_vm5, %v3102_v7, %v3104_v61  ;;  %v3210_v7 = vld [vmem:[%s7274_s5 + $0x30] sm:$0xff]  ;;  %v3205_v57 = vld [vmem:[%s7274_s5 + $0x8] sm:$0xff] }
 0x68a   : > { %3255 = vmatpush.msrb.mxu1 %v3210_v7  ;;  %3284 = vmatpush.msrb.mxu2 %v3223_v6 }
 0x68b   : > { %v3078_v22 = vpop.f32.mrf.mxu3  ;;  %4190 = vrot.lane.b32.xlu0 %v4189_v42, %s4302_s20  ;;  %4195 = vrot.lane.b32.xlu1 %v4194_v25, %s4304_s15 }
 0x68c   : > { %v6884_v20 = vadd.f32 %v3078_v22, %v3046_v47  ;;  %4200 = vrot.lane.b32.xlu2 %v4199_v46, %s4301_s18  ;;  %3256 = vmatpush.msrb.mxu1 %v3209_v60  ;;  %v3132_v47 = vrot.slane %v6823_v28, 7  ;;  %v3407_v60 = vld [vmem:[%s7275_s6 + $0x78] sm:$0xff] }
 0x68d   : > { %3285 = vmatpush.msrb.mxu2 %v3222_v16  ;;  %v3406_v16 = vld [vmem:[%s7275_s6 + $0x70] sm:$0xff] }
 0x68e   : > { %v3155_v11 = vrot.slane %v6884_v20, 4  ;;  %v3171_v9 = vrot.slane %v6884_v20, 5  ;;  %v3121_v8 = vrot.slane %v6884_v20, 6  ;;  %v4204_v27 = vpack.i.bf16 %v3090_v30, %v6884_v20  ;;  %3257 = vmatpush.msrb.mxu1 %v3208_v55  ;;  %v3405_v55 = vld [vmem:[%s7275_s6 + $0x68] sm:$0xff] }
 0x68f   : > { %3286 = vmatpush.msrb.mxu2 %v3221_v29  ;;  %v3134_v45 = vsel %vm2229_vm6, %v3132_v47, %v3133_v10  ;;  %v3423_v29 = vld [vmem:[%s7275_s6 + $0xf8] sm:$0xff] }
 0x690   : > { %v3156_v49 = vsel %vm2401_vm7, %v3153_v53, %v3155_v11  ;;  %v3172_v51 = vsel %vm679_vm0, %v3169_v24, %v3171_v9  ;;  %v3122_v3 = vsel %vm2122_vm4, %v3119_v52, %v3121_v8  ;;  %v3206_v53 = vld [vmem:[%s7274_s5 + $0x10] sm:$0xff]  ;;  %3258 = vmatpush.msrb.mxu1 %v3207_v44  ;;  %v3204_v24 = vld [vmem:[%s7274_s5] sm:$0xff] }
 0x691   : > { %v4209_v50 = vpack.i.bf16 %v3105_v63, %v3156_v49  ;;  %v4214_v40 = vpack.i.bf16 %v3120_v17, %v3172_v51  ;;  %3763 = vmatmul.msk.f32.gmra.mxu3 %vm2639_vm8, %v3122_v3  ;;  %3287 = vmatpush.msrb.mxu2 %v3220_v56  ;;  %v3422_v44 = vld [vmem:[%s7275_s6 + $0xf0] sm:$0xff] }
 0x692   : > { %3259 = vmatpush.msrb.mxu1 %v3206_v53 }
 0x693   : > { %4210 = vrot.lane.b32.xlu0 %v4209_v50, %s4302_s20  ;;  %4215 = vrot.lane.b32.xlu1 %v4214_v40, %s4304_s15  ;;  %v3081_v37 = vpop.f32.mrf.mxu3 }
 0x694   : > { %v3082_v5 = vadd.f32 %v3081_v37, %v3049_v26  ;;  %4205 = vrot.lane.b32.xlu2 %v4204_v27, %s4301_s18  ;;  %3260 = vmatpush.msrb.mxu1 %v3205_v57  ;;  %v3137_v26 = vrot.slane %v6884_v20, 7  ;;  %v3404_v57 = vld [vmem:[%s7275_s6 + $0x60] sm:$0xff] }
 0x695   : > { %3476 = vmatpush.msra.mxu2 %v3423_v29  ;;  %v3411_v29 = vld [vmem:[%s7275_s6 + $0x98] sm:$0xff] }
 0x696   : > { %v3157_v35 = vrot.slane %v3082_v5, 4  ;;  %v3173_v43 = vrot.slane %v3082_v5, 5  ;;  %v3184_v0 = vrot.slane %v3082_v5, 6  ;;  %3261 = vmatpush.msrb.mxu1 %v3204_v24  ;;  %v3138_v13 = vsel %vm2229_vm6, %v3135_v15, %v3137_v26  ;;  %v3421_v24 = vld [vmem:[%s7275_s6 + $0xe8] sm:$0xff] }
 0x697   : > { %3477 = vmatpush.msra.mxu2 %v3422_v44  ;;  %v3433_v26 = vld [vmem:[%s7275_s6 + $0x148] sm:$0xff]  ;;  %v3430_v44 = vld [vmem:[%s7275_s6 + $0x130] sm:$0xff] }
 0x698   : > { %v3185_v48 = vsel %vm2122_vm4, %v3121_v8, %v3184_v0  ;;  %v3158_v34 = vsel %vm2401_vm7, %v3155_v11, %v3157_v35  ;;  %v3174_v33 = vsel %vm679_vm0, %v3171_v9, %v3173_v43  ;;  %3456 = vmatpush.msra.mxu1 %v3407_v60  ;;  %v3412_v60 = vld [vmem:[%s7275_s6 + $0xa0] sm:$0xff] }
 0x699   : > { %3764 = vmatmul.msk.f32.gmra.mxu3 %vm2639_vm8, %v3185_v48  ;;  %3478 = vmatpush.msra.mxu2 %v3421_v24  ;;  %v3449_v24 = vld [vmem:[%s7275_s6 + $0x1c8] sm:$0xff] }
 0x69a   : > { %3457 = vmatpush.msra.mxu1 %v3406_v16  ;;  %v3431_v16 = vld [vmem:[%s7275_s6 + $0x138] sm:$0xff] }
 0x69b   : > { %3163 = vrot.lane.b32.xlu0 %v3158_v34, %s4302_s20  ;;  %3179 = vrot.lane.b32.xlu1 %v3174_v33, %s4304_s15 }
 0x69c   : > { %3110 = vrot.lane.b32.xlu2 %v3104_v61, %s4302_s20  ;;  %3458 = vmatpush.msra.mxu1 %v3405_v55  ;;  %v3451_v55 = vld [vmem:[%s7275_s6 + $0x1d8] sm:$0xff] }
 0x69e   : > { %3459 = vmatpush.msra.mxu1 %v3404_v57  ;;  %v3429_v57 = vld [vmem:[%s7275_s6 + $0x128] sm:$0xff] }
 0x6a3   : > { %3127 = vrot.lane.b32.xlu0 %v3122_v3, %s4304_s15 }
 0x6dd   : > { %v4186_v52 = vpop.permute.xlu2 %4185 }
 0x6de   : > { %v4188_v31 = vunpack.i.h.bf16 %v4186_v52  ;;  %v4187_v30 = vunpack.i.l.bf16 %v4186_v52  ;;  %v3439_v52 = vld [vmem:[%s7275_s6 + $0x178] sm:$0xff] }
 0x6df   : > { %3496 = vmatpush.msra.mxu3 %v3439_v52  ;;  %v3409_v52 = vld [vmem:[%s7275_s6 + $0x88] sm:$0xff] }
 0x6e0   : > { %v3186_v18 = vsel %vm2639_vm8, %v6823_v28, %v4188_v31  ;;  %v3195_v46 = vsel %vm2639_vm8, %v3134_v45, %v4187_v30  ;;  %v3136_v28 = vsel %vm2229_vm6, %v3133_v10, %v3135_v15  ;;  %v3403_v31 = vld [vmem:[%s7275_s6 + $0x58] sm:$0xff]  ;;  %v3438_v30 = vld [vmem:[%s7275_s6 + $0x170] sm:$0xff] }
 0x6e1   : > { %3460 = vmatpush.msra.mxu1 %v3403_v31  ;;  %3497 = vmatpush.msra.mxu3 %v3438_v30  ;;  %v3408_v31 = vld [vmem:[%s7275_s6 + $0x80] sm:$0xff]  ;;  %v3427_v30 = vld [vmem:[%s7275_s6 + $0x118] sm:$0xff] }
 0x6e6   : > { %v4201_v39 = vpop.permute.xlu2 %4200 }
 0x6e7   : > { %v4203_v38 = vunpack.i.h.bf16 %v4201_v39  ;;  %v4202_v11 = vunpack.i.l.bf16 %v4201_v39 }
 0x6e9   : > { %v3196_v3 = vsel %vm2639_vm8, %v3136_v28, %v4202_v11  ;;  %v3187_v50 = vsel %vm2639_vm8, %v6825_v12, %v4203_v38  ;;  %v3400_v38 = vld [vmem:[%s7275_s6 + $0x40] sm:$0xff]  ;;  %v3435_v11 = vld [vmem:[%s7275_s6 + $0x158] sm:$0xff] }
 0x6ee   : > { %v4206_v51 = vpop.permute.xlu2 %4205 }
 0x6ef   : > { %v4207_v36 = vunpack.i.l.bf16 %v4206_v51  ;;  %v4208_v35 = vunpack.i.h.bf16 %v4206_v51 }
 0x6f1   : > { %v3197_v59 = vsel %vm2639_vm8, %v3138_v13, %v4207_v36  ;;  %v3188_v0 = vsel %vm2639_vm8, %v6838_v19, %v4208_v35  ;;  %v3415_v36 = vld [vmem:[%s7275_s6 + $0xb8] sm:$0xff]  ;;  %v3396_v13 = vld [vmem:[%s7275_s6 + $0x20] sm:$0xff]  ;;  %v3394_v35 = vld [vmem:[%s7275_s6 + $0x10] sm:$0xff] }
 0x6f6   : > { %v3111_v43 = vpop.permute.xlu2 %3110 }
 0x6f7   : > { %v3191_v54 = vsel %vm2683_vm10, %v3188_v0, %v3111_v43  ;;  %v3392_v0 = vld [vmem:[%s7275_s6] sm:$0xff] }
 0x6fd   : > { %v4191_v2 = vpop.permute.xlu0 %4190  ;;  %v4196_v23 = vpop.permute.xlu1 %4195 }
 0x6fe   : > { %v4193_v17 = vunpack.i.h.bf16 %v4191_v2  ;;  %v4192_v42 = vunpack.i.l.bf16 %v4191_v2  ;;  %v4198_v25 = vunpack.i.h.bf16 %v4196_v23  ;;  %v4197_v41 = vunpack.i.l.bf16 %v4196_v23  ;;  %v3420_v2 = vld [vmem:[%s7275_s6 + $0xe0] sm:$0xff] }
 0x6ff   : > { %3479 = vmatpush.msra.mxu2 %v3420_v2  ;;  %v3446_v2 = vld [vmem:[%s7275_s6 + $0x1b0] sm:$0xff] }
 0x700   : > { %v3189_v14 = vsel %vm2683_vm10, %v3186_v18, %v4193_v17  ;;  %v3198_v22 = vsel %vm2683_vm10, %v3195_v46, %v4192_v42  ;;  %v3402_v17 = vld [vmem:[%s7275_s6 + $0x50] sm:$0xff]  ;;  %v3437_v42 = vld [vmem:[%s7275_s6 + $0x168] sm:$0xff] }
 0x701   : > { %v3201_v58 = vsel %vm2727_vm12, %v3198_v22, %v4197_v41  ;;  %v3192_v61 = vsel %vm2727_vm12, %v3189_v14, %v4198_v25  ;;  %v3419_v25 = vld [vmem:[%s7275_s6 + $0xd8] sm:$0xff]  ;;  %v3401_v46 = vld [vmem:[%s7275_s6 + $0x48] sm:$0xff]  ;;  %v3436_v14 = vld [vmem:[%s7275_s6 + $0x160] sm:$0xff]  ;;  %3461 = vmatpush.msra.mxu1 %v3402_v17  ;;  %3498 = vmatpush.msra.mxu3 %v3437_v42 }
 0x702   : > { %3288 = vmatmul.f32.vlgmr.msrb.gmra.mxu2 %v3201_v58  ;;  %3262 = vmatmul.f32.vlgmr.msrb.gmra.mxu1 %v3192_v61  ;;  %v3418_v22 = vld [vmem:[%s7275_s6 + $0xd0] sm:$0xff]  ;;  %v3445_v17 = vld [vmem:[%s7275_s6 + $0x1a8] sm:$0xff]  ;;  %v3424_v42 = vld [vmem:[%s7275_s6 + $0x100] sm:$0xff] }
 0x703   : > { %3480 = vmatpush.msra.mxu2 %v3419_v25  ;;  %3462 = vmatpush.msra.mxu1 %v3401_v46  ;;  %v3444_v25 = vld [vmem:[%s7275_s6 + $0x1a0] sm:$0xff]  ;;  %v3442_v46 = vld [vmem:[%s7275_s6 + $0x190] sm:$0xff] }
 0x704   : > { %3499 = vmatpush.msra.mxu3 %v3436_v14  ;;  %v3441_v14 = vld [vmem:[%s7275_s6 + $0x188] sm:$0xff] }
 0x705   : > { %v4211_v9 = vpop.permute.xlu0 %4210  ;;  %v4216_v8 = vpop.permute.xlu1 %4215  ;;  %3481 = vmatpush.msra.mxu2 %v3418_v22  ;;  %3463 = vmatpush.msra.mxu1 %v3400_v38  ;;  %v3440_v22 = vld [vmem:[%s7275_s6 + $0x180] sm:$0xff] }
 0x706   : > { %v4213_v21 = vunpack.i.h.bf16 %v4211_v9  ;;  %v4212_v62 = vunpack.i.l.bf16 %v4211_v9  ;;  %v4218_v63 = vunpack.i.h.bf16 %v4216_v8  ;;  %v4217_v49 = vunpack.i.l.bf16 %v4216_v8  ;;  %3500 = vmatpush.msra.mxu3 %v3435_v11 }
 0x708   : > { %v3199_v40 = vsel %vm2683_vm10, %v3196_v3, %v4212_v62  ;;  %v3190_v32 = vsel %vm2683_vm10, %v3187_v50, %v4213_v21  ;;  %v3399_v21 = vld [vmem:[%s7275_s6 + $0x38] sm:$0xff]  ;;  %v3417_v62 = vld [vmem:[%s7275_s6 + $0xc8] sm:$0xff]  ;;  %v3398_v3 = vld [vmem:[%s7275_s6 + $0x30] sm:$0xff] }
 0x709   : > { %v3202_v27 = vsel %vm2727_vm12, %v3199_v40, %v4217_v49  ;;  %v3193_v37 = vsel %vm2727_vm12, %v3190_v32, %v4218_v63  ;;  %v3434_v49 = vld [vmem:[%s7275_s6 + $0x150] sm:$0xff]  ;;  %v3416_v50 = vld [vmem:[%s7275_s6 + $0xc0] sm:$0xff]  ;;  %3464 = vmatpush.msra.mxu1 %v3399_v21  ;;  %3482 = vmatpush.msra.mxu2 %v3417_v62 }
 0x70a   : > { %3291 = vmatmul.f32.gmra.mxu2 %v3202_v27  ;;  %3265 = vmatmul.f32.gmra.mxu1 %v3193_v37  ;;  %v3397_v27 = vld [vmem:[%s7275_s6 + $0x28] sm:$0xff] }
 0x70b   : > { %3501 = vmatpush.msra.mxu3 %v3434_v49  ;;  %3465 = vmatpush.msra.mxu1 %v3398_v3 }
 0x70c   : > { %v3315_v34 = vpop.f32.mrf.mxu3  ;;  %3483 = vmatpush.msra.mxu2 %v3416_v50 }
 0x70d   : > { %v3164_v5 = vpop.permute.xlu0 %3163  ;;  %v3180_v4 = vpop.permute.xlu1 %3179  ;;  %3502 = vmatpush.msra.mxu3 %v3433_v26  ;;  %3466 = vmatpush.msra.mxu1 %v3397_v27 }
 0x70e   : > { %v3200_v12 = vsel %vm2683_vm10, %v3197_v59, %v3164_v5  ;;  %v3414_v5 = vld [vmem:[%s7275_s6 + $0xb0] sm:$0xff]  ;;  %3484 = vmatpush.msra.mxu2 %v3415_v36 }
 0x70f   : > { %v3203_v20 = vsel %vm2727_vm12, %v3200_v12, %v3180_v4  ;;  %v3395_v4 = vld [vmem:[%s7275_s6 + $0x18] sm:$0xff]  ;;  %3467 = vmatpush.msra.mxu1 %v3396_v13 }
 0x710   : > { %3485 = vmatpush.msra.mxu2 %v3414_v5 }
 0x711   : > { %3468 = vmatpush.msra.mxu1 %v3395_v4 }
 0x712   : > { %3294 = vmatmul.f32.gmra.mxu2 %v3203_v20  ;;  %v3393_v20 = vld [vmem:[%s7275_s6 + $0x8] sm:$0xff] }
 0x713   : > { %3469 = vmatpush.msra.mxu1 %v3394_v35 }
 0x714   : > { %v3318_v45 = vpop.f32.mrf.mxu3 }
 0x715   : > { %v3128_v1 = vpop.permute.xlu0 %3127  ;;  %3470 = vmatpush.msra.mxu1 %v3393_v20 }
 0x716   : > { %v3194_v48 = vsel %vm2727_vm12, %v3191_v54, %v3128_v1  ;;  %v3455_v54 = vld [vmem:[%s7275_s6 + $0x1f8] sm:$0xff] }
 0x717   : > { %3268 = vmatmul.f32.gmra.mxu1 %v3194_v48  ;;  %v3454_v48 = vld [vmem:[%s7275_s6 + $0x1f0] sm:$0xff] }
 0x718   : > { %3471 = vmatpush.msra.mxu1 %v3392_v0 }
 0x71a   : > { %3516 = vmatpush.msrb.mxu1 %v3455_v54 }
 0x71c   : > { %v3321_v40 = vpop.f32.mrf.mxu3  ;;  %3517 = vmatpush.msrb.mxu1 %v3454_v48 }
 0x77f   : > { %v3263_v7 = vpop.f32.mrf.mxu1 }
 0x785   : > { %v3289_v33 = vpop.f32.mrf.mxu2 }
 0x786   : > { %v3290_v6 = vadd.f32 %v3289_v33, %v3263_v7  ;;  %v3453_v7 = vld [vmem:[%s7275_s6 + $0x1e8] sm:$0xff]  ;;  %v3432_v33 = vld [vmem:[%s7275_s6 + $0x140] sm:$0xff] }
 0x787   : > { %v3266_v10 = vpop.f32.mrf.mxu1  ;;  %3518 = vmatpush.msrb.mxu1 %v3453_v7  ;;  %3503 = vmatpush.msra.mxu3 %v3432_v33 }
 0x788   : > { %v7008_v19 = vadd.f32 %v3315_v34, %v3290_v6  ;;  %v3413_v34 = vld [vmem:[%s7275_s6 + $0xa8] sm:$0xff]  ;;  %v3452_v6 = vld [vmem:[%s7275_s6 + $0x1e0] sm:$0xff] }
 0x789   : > { %3486 = vmatpush.msra.mxu2 %v3413_v34  ;;  %3519 = vmatpush.msrb.mxu1 %v3452_v6 }
 0x78a   : > { %v3325_v56 = vrot.slane %v7008_v19, 1  ;;  %v3339_v53 = vrot.slane %v7008_v19, 7  ;;  %v3329_v18 = vrot.slane %v7008_v19, 2  ;;  %v3333_v58 = vrot.slane %v7008_v19, 3  ;;  %3504 = vmatpush.msra.mxu3 %v3431_v16 }
 0x78b   : > { %3487 = vmatpush.msra.mxu2 %v3412_v60  ;;  %3520 = vmatpush.msrb.mxu1 %v3451_v55  ;;  %v3337_v11 = vrot.slane %v7008_v19, 6 }
 0x78c   : > { %v4219_v47 = vpack.i.bf16 %v3325_v56, %v3339_v53  ;;  %v3450_v56 = vld [vmem:[%s7275_s6 + $0x1d0] sm:$0xff]  ;;  %3505 = vmatpush.msra.mxu3 %v3430_v44 }
 0x78d   : > { %v3292_v39 = vpop.f32.mrf.mxu2  ;;  %v3410_v53 = vld [vmem:[%s7275_s6 + $0x90] sm:$0xff]  ;;  %3488 = vmatpush.msra.mxu2 %v3411_v29  ;;  %3521 = vmatpush.msrb.mxu1 %v3450_v56 }
 0x78e   : > { %v3293_v23 = vadd.f32 %v3292_v39, %v3266_v10  ;;  %4220 = vrot.lane.b32.xlu1 %v4219_v47, %s4301_s18  ;;  %v3428_v10 = vld [vmem:[%s7275_s6 + $0x120] sm:$0xff]  ;;  %3506 = vmatpush.msra.mxu3 %v3429_v57  ;;  %v3447_v39 = vld [vmem:[%s7275_s6 + $0x1b8] sm:$0xff] }
 0x78f   : > { %3489 = vmatpush.msra.mxu2 %v3410_v53  ;;  %v3448_v47 = vld [vmem:[%s7275_s6 + $0x1c0] sm:$0xff]  ;;  %3522 = vmatpush.msrb.mxu1 %v3449_v24 }
 0x790   : > { %v7049_v41 = vadd.f32 %v3318_v45, %v3293_v23  ;;  %3507 = vmatpush.msra.mxu3 %v3428_v10  ;;  %v3426_v45 = vld [vmem:[%s7275_s6 + $0x110] sm:$0xff]  ;;  %v3425_v23 = vld [vmem:[%s7275_s6 + $0x108] sm:$0xff] }
 0x791   : > { %3490 = vmatpush.msra.mxu2 %v3409_v52  ;;  %3523 = vmatpush.msrb.mxu1 %v3448_v47 }
 0x792   : > { %v3347_v61 = vrot.slane %v7049_v41, 1  ;;  %v4224_v15 = vpack.i.bf16 %v3329_v18, %v7049_v41  ;;  %v3353_v8 = vrot.slane %v7049_v41, 5  ;;  %v3357_v37 = vrot.slane %v7049_v41, 6  ;;  %3508 = vmatpush.msra.mxu3 %v3427_v30  ;;  %v3443_v18 = vld [vmem:[%s7275_s6 + $0x198] sm:$0xff] }
 0x793   : > { %v3361_v59 = vrot.slane %v7049_v41, 7  ;;  %3491 = vmatpush.msra.mxu2 %v3408_v31  ;;  %3524 = vmatpush.msrb.mxu1 %v3447_v39 }
 0x794   : > { %v4229_v9 = vpack.i.bf16 %v3333_v58, %v3347_v61  ;;  %v3269_v28 = vpop.f32.mrf.mxu1  ;;  %4225 = vrot.lane.b32.xlu2 %v4224_v15, %s4302_s20  ;;  %3509 = vmatpush.msra.mxu3 %v3426_v45 }
 0x795   : > { %v3295_v63 = vpop.f32.mrf.mxu2  ;;  %3525 = vmatpush.msrb.mxu1 %v3446_v2 }
 0x796   : > { %4230 = vrot.lane.b32.xlu0 %v4229_v9, %s4304_s15  ;;  %3354 = vrot.lane.b32.xlu1 %v3353_v8, %s4301_s18  ;;  %v3296_v51 = vadd.f32 %v3295_v63, %v3269_v28 }
 0x797   : > { %3510 = vmatpush.msra.mxu3 %v3425_v23  ;;  %3526 = vmatpush.msrb.mxu1 %v3445_v17 }
 0x798   : > { %v7092_v32 = vadd.f32 %v3321_v40, %v3296_v51  ;;  %v3351_v40 = vrot.slane %v7049_v41, 4 }
 0x799   : > { %3511 = vmatpush.msra.mxu3 %v3424_v42  ;;  %3527 = vmatpush.msrb.mxu1 %v3444_v25 }
 0x79a   : > { %v3368_v12 = vrot.slane %v7092_v32, 3  ;;  %v3372_v43 = vrot.slane %v7092_v32, 4  ;;  %v3376_v1 = vrot.slane %v7092_v32, 5  ;;  %v3366_v41 = vrot.slane %v7092_v32, 2 }
 0x79b   : > { %3528 = vmatpush.msrb.mxu1 %v3443_v18 }
 0x79c   : > { %3358 = vrot.lane.b32.xlu2 %v3357_v37, %s4302_s20 }
 0x79d   : > { %3529 = vmatpush.msrb.mxu1 %v3442_v46 }
 0x79e   : > { %3362 = vrot.lane.b32.xlu0 %v3361_v59, %s4304_s15  ;;  %3369 = vrot.lane.b32.xlu1 %v3368_v12, %s4301_s18 }
 0x79f   : > { %3530 = vmatpush.msrb.mxu1 %v3441_v14 }
 0x7a1   : > { %3531 = vmatpush.msrb.mxu1 %v3440_v22 }
 0x7a4   : > { %3373 = vrot.lane.b32.xlu2 %v3372_v43, %s4302_s20  ;;  %s3547_s20 = scalar_lea.hbm %s7276_s7, %s4366_s28 }
 0x7a6   : > { %3377 = vrot.lane.b32.xlu0 %v3376_v1, %s4304_s15  ;;  %s3551_s15 = sshll.u32 %s3547_s20, 4  ;;  %s3552_s15 = int_to_ptr.hbm [resolvable:$true] %s3551_s15 }
 0x7a7   : > { %s4248_s21 = sshra.s32 %s3552_s15, 4  ;;  %s4249_s21 = int_to_ptr.hbm [resolvable:$true] %s4248_s21 }
 0x7a8   : > { %s4250_s19 = scalar_lea.hbm %s4249_s21, 1  ;;  %p4255_p0 = scmp.lt.s32.totalorder %s4249_s21, %s7276_s7 }
 0x7a9   : > { %p4251_p11 = scmp.ne.s32.totalorder %s4249_s21, %s4250_s19  ;;  %p4256_p1 = scmp.lt.s32.totalorder %s4254_s22, %s4250_s19 }
 0x7ab   : > { %p4252_p12 = pnand %p4251_p11, %p4383_p5  ;;  %p4257_p2 = por %p4256_p1, %p4255_p0 }
 0x7ad   : > { %p4253_p13 = pneg %p4252_p12 }
 0x7af   : > { %p4258_p3 = pnand %p4257_p2, %p4253_p13 }
 0x7ee   : > { %v4226_v61 = vpop.permute.xlu2 %4225 }
 0x7ef   : > { %v4228_v28 = vunpack.i.h.bf16 %v4226_v61  ;;  %v4227_v21 = vunpack.i.l.bf16 %v4226_v61 }
 0x800   : > { %v4221_v58 = vpop.permute.xlu1 %4220 }
 0x801   : > { %v4223_v15 = vunpack.i.h.bf16 %v4221_v58  ;;  %v4222_v38 = vunpack.i.l.bf16 %v4221_v58 }
 0x803   : > { %v3380_v9 = vsel %vm2639_vm8, %v7008_v19, %v4223_v15  ;;  %v3383_v8 = vsel %vm2639_vm8, %v3337_v11, %v4222_v38  ;;  %v3359_v19 = vpop.permute.xlu2 %3358 }
 0x804   : > { %v3381_v3 = vsel %vm2683_vm10, %v3380_v9, %v4228_v28  ;;  %v3384_v50 = vsel %vm2683_vm10, %v3383_v8, %v4227_v21 }
 0x808   : > { %v4231_v62 = vpop.permute.xlu0 %4230  ;;  %v3355_v63 = vpop.permute.xlu1 %3354 }
 0x809   : > { %v4233_v49 = vunpack.i.h.bf16 %v4231_v62  ;;  %v4232_v51 = vunpack.i.l.bf16 %v4231_v62  ;;  %v3386_v36 = vsel %vm2639_vm8, %v3351_v40, %v3355_v63 }
 0x80a   : > { %v3387_v13 = vsel %vm2683_vm10, %v3386_v36, %v3359_v19 }
 0x80b   : > { %v3382_v26 = vsel %vm2727_vm12, %v3381_v3, %v4233_v49  ;;  %v3385_v27 = vsel %vm2727_vm12, %v3384_v50, %v4232_v51  ;;  %v3374_v4 = vpop.permute.xlu2 %3373 }
 0x80c   : > { %3472 = vmatmul.f32.vlgmr.msra.gmra.mxu1 %v3382_v26  ;;  %3492 = vmatmul.f32.vlgmr.msra.gmra.mxu2 %v3385_v27 }
 0x810   : > { %v3363_v37 = vpop.permute.xlu0 %3362  ;;  %v3370_v59 = vpop.permute.xlu1 %3369 }
 0x811   : > { %v3388_v5 = vsel %vm2727_vm12, %v3387_v13, %v3363_v37  ;;  %v3389_v12 = vsel %vm2639_vm8, %v3366_v41, %v3370_v59 }
 0x812   : > { %3512 = vmatmul.f32.vlgmr.msra.gmra.mxu3 %v3388_v5  ;;  %v3390_v20 = vsel %vm2683_vm10, %v3389_v12, %v3374_v4 }
 0x818   : > { %v3378_v35 = vpop.permute.xlu0 %3377 }
 0x819   : > { %v3391_v43 = vsel %vm2727_vm12, %v3390_v20, %v3378_v35 }
 0x81a   : > { %3532 = vmatmul.f32.vlgmr.msrb.gmra.mxu1 %v3391_v43 }
 0x889   : > { %v3473_v0 = vpop.f32.mrf.mxu1 }
 0x88f   : > { %v3493_v54 = vpop.f32.mrf.mxu2 }
 0x890   : > { %v3494_v1 = vadd.f32 %v3493_v54, %v3473_v0 }
 0x895   : > { %v3513_v48 = vpop.f32.mrf.mxu3 }
 0x896   : > { %v3514_v32 = vadd.f32 %v3513_v48, %v3494_v1 }
 0x897   : > { %v3533_v7 = vpop.f32.mrf.mxu1 }
 0x898   : > { %v3534_v34 = vadd.f32 %v3533_v7, %v3514_v32 }
 0x89a   : > { %3537 = vst.msk [vmem:[%s270_s14] sm:$0x1] %vm3536_vm15, %v3534_v34 }
 0x89b   : > { %4261 = shalt.err (!%p4258_p3)
}
 0x89c   : > { %3788 = dma.vmem_to_hbm [thread:$0]  (%p4383_p5), %s3550_s17, 16, %s3552_s15, %s3539_s13  }
 0x89d PF: > { %p3794_p4 = scmp.ge.s32.totalorder %s4296_s27, 2  ;;  %s3563_s9 = sand.u32 1, %s4284_s24  }
 0x89e   : > { %s3564_s16 = scalar_lea.sflag [#allocation3], %s3563_s9 }
 0x89f   : > { %p3791_p7 = pnand %p3794_p4, %p4387_p6 }
 0x8a1   : > { %p3792_p8 = pneg %p3791_p7 }
 0x8a3   : > { %4279 = dma.done.wait (%p3792_p8), %s3564_s16, 16  }
 0x8a4   : > { %4281 = vsyncadd (%p3792_p8), %s3564_s16, 4294967280  ;;  %p17_p9 = scmp.ge.s32.totalorder %s4370_s30, 4   ;;  %s7397_s24 = smov %s4288_s25 }
 0x8a5   : > { %s7398_s25 = smov %s4292_s26  ;;  %s7399_s26 = smov %s4381_s10 }
 0x8a6   : > { %s7400_s27 = smov %s4370_s30  ;;  %19 = sbr.rel (!%p17_p9) target bundleno = 3 (0x3), region = 83 }
 0x8ab   :  { %3569 = vsyncpa [#allocation3], 1 }
 0x8ac   :  { %3571 = vsyncpa [#allocation3 + $0x1], 1 }

</bundles_post_ra>
